<compile_context>
chip_gen: v7x
topology: tpu7x:2x2x1
jax: 0.10.0
libtpu: 0.0.40
codegen_flags: <defaults>
</compile_context>

<pallas_src>
import functools

import jax
import jax.numpy as jnp
import numpy as np
from jax import lax
from jax.experimental import pallas as pl
from jax.experimental.pallas import tpu as pltpu


def _gru_sup_kernel(h_ref, t_ref, wi_ref, wh_ref, bx_ref, bhn_ref,
                    wlin_ref, blin_ref, pad_ref, out_ref,
                    seq_buf, gxr_buf, gxz_buf, gxn_buf, m_buf,
                    *, num_layers, unroll):
    """GRU stack + pad masking + Linear(H->H) + Sigmoid for one batch block.

    h_ref:    (S, Bb, H)    bf16  input latents, time-major
    t_ref:    (Bb, 1)       i32   valid lengths
    wi_ref:   (L, 3, H, H)  bf16  per-gate input->hidden weights (r, z, n)
    wh_ref:   (L, 3, H, H)  bf16  per-gate hidden->hidden weights
    bx_ref:   (L, 3, 1, H)  f32   [bi_r+bh_r | bi_z+bh_z | bi_n]
    bhn_ref:  (L, 1, H)     f32   bh_n (kept separate: used inside r * (...))
    wlin_ref: (H, H)        bf16  linear weight, x @ W layout
    blin_ref: (1, H)        f32   linear bias
    pad_ref:  (1, H)        f32   sigmoid(pad * sum(Wlin) + b) constant row
    out_ref:  (S, Bb, H)    f32   H_hat, time-major
    seq_buf:  (S, Bb, H)    bf16  layer output buffer (in-place across layers)
    gx*_buf:  (S, Bb, H)    f32   hoisted per-gate input projections
    m_buf:    (S, Bb, H)    f32   validity mask (1.0 while t < T[b])
    """
    S, Bb, Hd = m_buf.shape

    # Validity mask computed ONCE at full lane width: the per-step blend and
    # the final pad blend use a full-width operand (no per-step lane
    # broadcast on the serial path).  Free VMEM for H <= 128 (lane padding).
    lengths = t_ref[...]                                          # (Bb, 1) i32
    t_idx = lax.broadcasted_iota(jnp.int32, (S, Bb, Hd), 0)
    m_buf[...] = (t_idx < lengths[None, :, :]).astype(jnp.float32)

    for layer in range(num_layers):
        # Per-gate recurrent weights hoisted out of the time loop.  Gates live
        # on a leading weight axis -> 3 independent (H,H) matmuls per step,
        # so NO intra-vreg lane slicing on the serial critical path.
        wh_r = wh_ref[layer, 0]
        wh_z = wh_ref[layer, 1]
        wh_n = wh_ref[layer, 2]
        bhn_l = bhn_ref[layer]                                    # (1, H) f32

        # Hoisted input->gate projections: bulk MXU matmuls per layer, off the
        # serial path.  The (S,Bb,H)<->(S*Bb,H) reshape is a free relayout
        # when Bb % 8 == 0 (block picker prefers that).
        if layer == 0:
            x_flat = h_ref[...].reshape(S * Bb, Hd)               # bf16 input
        else:
            x_flat = seq_buf[...].reshape(S * Bb, Hd)             # bf16 buffer
        gxr_buf[...] = (jnp.dot(x_flat, wi_ref[layer, 0],
                                preferred_element_type=jnp.float32)
                        + bx_ref[layer, 0]).reshape(S, Bb, Hd)
        gxz_buf[...] = (jnp.dot(x_flat, wi_ref[layer, 1],
                                preferred_element_type=jnp.float32)
                        + bx_ref[layer, 1]).reshape(S, Bb, Hd)
        gxn_buf[...] = (jnp.dot(x_flat, wi_ref[layer, 2],
                                preferred_element_type=jnp.float32)
                        + bx_ref[layer, 2]).reshape(S, Bb, Hd)

        def step(t, h_prev):
            # Hidden state stays in the carry (vregs): no VMEM round trip on
            # the serial dependence chain.
            h_b = h_prev.astype(jnp.bfloat16)
            gh_r = jnp.dot(h_b, wh_r, preferred_element_type=jnp.float32)
            gh_z = jnp.dot(h_b, wh_z, preferred_element_type=jnp.float32)
            gh_n = jnp.dot(h_b, wh_n, preferred_element_type=jnp.float32)
            r = jax.nn.sigmoid(gxr_buf[t] + gh_r)
            z = jax.nn.sigmoid(gxz_buf[t] + gh_z)
            n = jnp.tanh(gxn_buf[t] + r * (gh_n + bhn_l))
            h_new = (1.0 - z) * n + z * h_prev
            # Packed-sequence semantics: state only advances while t < T[b].
            m = m_buf[t]                                          # (Bb, H)
            h_upd = h_prev + m * (h_new - h_prev)
            seq_buf[t] = h_upd.astype(jnp.bfloat16)               # next layer in
            return h_upd

        h0 = jnp.zeros((Bb, Hd), jnp.float32)
        lax.fori_loop(0, S, step, h0, unroll=unroll)

    # Linear(H -> H) + sigmoid as one bulk MXU matmul over the whole sequence.
    seq_flat = seq_buf[...].reshape(S * Bb, Hd)                   # bf16
    logits = jnp.dot(seq_flat, wlin_ref[...],
                     preferred_element_type=jnp.float32) + blin_ref[...]
    h_hat = jax.nn.sigmoid(logits).reshape(S, Bb, Hd)
    # Padded positions collapse to a constant row (padding applied before the
    # Linear in the reference module).
    pad_row = pad_ref[...][None]                                  # (1, 1, H)
    out_ref[...] = pad_row + m_buf[...] * (h_hat - pad_row)


def _pick_b_block(batch):
    """Per-grid-block batch size.

    Prefer a multiple of 8 that divides the batch (free reshapes, (8,128)
    tiling) and exposes >= 2 grid steps so v7x megacore can use both
    TensorCores, while keeping enough rows per block to fill the MXU height.
    Falls back to the full batch for small / odd batches."""
    if batch % 8 == 0:
        for cand in (256, 128, 64, 32, 16, 8):
            if cand < batch and batch % cand == 0:
                return cand
    return batch


def supervisor_forward(H, T, params, *, max_seq_len, padding_value, num_layers):
    """H: (B, S, hidden) f32, T: (B,) lengths -> H_hat (B, S, hidden) f32."""
    B, S, Hd = H.shape
    assert S == max_seq_len
    gru_layers = num_layers - 1 if num_layers > 1 else num_layers
    L = gru_layers

    # TODO(synk): fold these transposes into the kernel at large S*B*Hd (each
    # is an extra full-tensor HBM pass); negligible at these shapes.
    H_tm = jnp.transpose(H, (1, 0, 2)).astype(jnp.bfloat16)       # (S, B, H)
    T2 = T.astype(jnp.int32).reshape(B, 1)

    # Repack fused (L, H, 3H) gate weights into per-gate (L, 3, H, H) so the
    # kernel never slices gates out of a single 128-lane tile.
    wi = params["wi"].reshape(L, Hd, 3, Hd).transpose(0, 2, 1, 3).astype(jnp.bfloat16)
    wh = params["wh"].reshape(L, Hd, 3, Hd).transpose(0, 2, 1, 3).astype(jnp.bfloat16)
    wlin = params["wlin"].astype(jnp.bfloat16)                    # (H, H)
    blin = params["blin"].astype(jnp.float32)                     # (1, H)
    # Pre-summed per-gate biases: r,z get bi+bh; n keeps only bi (bh_n is
    # applied inside r * (...) in the step).
    bi, bh = params["bi"], params["bh"]
    bx = jnp.stack([bi[:, :, :Hd] + bh[:, :, :Hd],
                    bi[:, :, Hd:2 * Hd] + bh[:, :, Hd:2 * Hd],
                    bi[:, :, 2 * Hd:]], axis=1).astype(jnp.float32)  # (L,3,1,H)
    bhn = bh[:, :, 2 * Hd:].astype(jnp.float32)                      # (L,1,H)
    # Constant output row at padded positions (padding applied before Linear).
    pad_row = jax.nn.sigmoid(
        padding_value * jnp.sum(params["wlin"], axis=0, keepdims=True)
        + params["blin"]).astype(jnp.float32)                        # (1, H)

    Bb = _pick_b_block(B)
    nb = B // Bb

    def nbytes(shape, dtype):
        s = list(shape)
        if len(s) >= 2:                      # account for (8,128) tile padding
            s[-2] = -(-s[-2] // 8) * 8
            s[-1] = -(-s[-1] // 128) * 128
        return int(np.prod(s)) * jnp.dtype(dtype).itemsize

    footprint = (
        2 * nbytes((S, Bb, Hd), jnp.bfloat16)        # input block (double-buffered)
        + 2 * nbytes((S, Bb, Hd), jnp.float32)       # output block (double-buffered)
        + nbytes((S, Bb, Hd), jnp.bfloat16)          # seq_buf
        + 3 * nbytes((S, Bb, Hd), jnp.float32)       # gx_r, gx_z, gx_n
        + nbytes((S, Bb, Hd), jnp.float32)           # validity mask
        + 2 * nbytes(wi.shape, jnp.bfloat16)         # wi + wh
        + nbytes(wlin.shape, jnp.bfloat16)
        + nbytes(bx.shape, jnp.float32) + nbytes(bhn.shape, jnp.float32)
        + 2 * nbytes((1, Hd), jnp.float32))
    # Size the VMEM limit off the actual part: ~7/8 of physical leaves headroom
    # for compiler scratch / pipelining buffers (56 MiB on v7x, 112 MiB v5e/v6e).
    try:
        phys_vmem = int(pltpu.get_tpu_info().vmem_capacity_bytes)
    except Exception:
        phys_vmem = 64 * 1024 * 1024                 # conservative (v7x per-TC)
    vmem_cap = (phys_vmem * 7) // 8
    vmem_bytes = int(min(max(16 * 1024 * 1024, 3 * footprint), vmem_cap))

    unroll = S if S <= 8 else 4
    kernel = functools.partial(_gru_sup_kernel, num_layers=gru_layers,
                               unroll=unroll)

    grid_spec = pltpu.PrefetchScalarGridSpec(
        num_scalar_prefetch=0,
        grid=(nb,),
        in_specs=[
            pl.BlockSpec((S, Bb, Hd), lambda b: (0, b, 0)),        # H (time-major)
            pl.BlockSpec((Bb, 1), lambda b: (b, 0)),               # lengths
            pl.BlockSpec((L, 3, Hd, Hd), lambda b: (0, 0, 0, 0)),  # wi
            pl.BlockSpec((L, 3, Hd, Hd), lambda b: (0, 0, 0, 0)),  # wh
            pl.BlockSpec((L, 3, 1, Hd), lambda b: (0, 0, 0, 0)),   # bx
            pl.BlockSpec((L, 1, Hd), lambda b: (0, 0, 0)),         # bh_n
            pl.BlockSpec((Hd, Hd), lambda b: (0, 0)),              # wlin
            pl.BlockSpec((1, Hd), lambda b: (0, 0)),               # blin
            pl.BlockSpec((1, Hd), lambda b: (0, 0)),               # pad row
        ],
        out_specs=pl.BlockSpec((S, Bb, Hd), lambda b: (0, b, 0)),
        scratch_shapes=[
            pltpu.VMEM((S, Bb, Hd), jnp.bfloat16),   # layer sequence buffer
            pltpu.VMEM((S, Bb, Hd), jnp.float32),    # gx_r
            pltpu.VMEM((S, Bb, Hd), jnp.float32),    # gx_z
            pltpu.VMEM((S, Bb, Hd), jnp.float32),    # gx_n
            pltpu.VMEM((S, Bb, Hd), jnp.float32),    # validity mask
        ],
    )

    out_sbh = pl.pallas_call(
        kernel,
        out_shape=jax.ShapeDtypeStruct((S, B, Hd), jnp.float32),
        grid_spec=grid_spec,
        compiler_params=pltpu.CompilerParams(
            dimension_semantics=("parallel",),
            vmem_limit_bytes=vmem_bytes),
    )(H_tm, T2, wi, wh, bx, bhn, wlin, blin, pad_row)

    return jnp.transpose(out_sbh, (1, 0, 2))          # (B, S, H)


def init_params(key, hidden_dim, gru_layers):
    """Synthetic init matching PyTorch GRU/Linear shapes (fused gate layout).

    wi/wh are stored as (L, H, 3H) pre-transposed for x @ W with gate order
    r, z, n concatenated on the output dim; wlin is (H, H) for x @ W."""
    ks = jax.random.split(key, 6)
    s = 1.0 / np.sqrt(hidden_dim)
    L, Hd = gru_layers, hidden_dim
    wi = jax.random.uniform(ks[0], (L, Hd, 3 * Hd), jnp.float32, -s, s)
    wh = jax.random.uniform(ks[1], (L, Hd, 3 * Hd), jnp.float32, -s, s)
    bi = jax.random.uniform(ks[2], (L, 1, 3 * Hd), jnp.float32, -s, s)
    bh = jax.random.uniform(ks[3], (L, 1, 3 * Hd), jnp.float32, -s, s)
    wlin = jax.random.uniform(ks[4], (Hd, Hd), jnp.float32, -s, s)
    blin = jax.random.uniform(ks[5], (1, Hd), jnp.float32, -s, s)
    return dict(wi=wi, wh=wh, bi=bi, bh=bh, wlin=wlin, blin=blin)


def reference_forward(H, T, params, *, max_seq_len, padding_value, num_layers):
    """Pure-JAX f32 reference with identical semantics (sanity check)."""
    B, S, Hd = H.shape
    gru_layers = num_layers - 1 if num_layers > 1 else num_layers
    x = H.astype(jnp.float32)
    lengths = T.astype(jnp.int32)
    for layer in range(gru_layers):
        wi, wh = params["wi"][layer], params["wh"][layer]
        bi, bh = params["bi"][layer], params["bh"][layer]

        def step(h, inp):
            xt, t = inp
            gx = xt @ wi + bi
            gh = h @ wh + bh
            r = jax.nn.sigmoid(gx[:, :Hd] + gh[:, :Hd])
            z = jax.nn.sigmoid(gx[:, Hd:2 * Hd] + gh[:, Hd:2 * Hd])
            n = jnp.tanh(gx[:, 2 * Hd:] + r * gh[:, 2 * Hd:])
            h_new = (1.0 - z) * n + z * h
            h_upd = jnp.where((t < lengths)[:, None], h_new, h)
            return h_upd, h_upd

        h0 = jnp.zeros((B, Hd), jnp.float32)
        _, ys = lax.scan(step, h0, (jnp.transpose(x, (1, 0, 2)), jnp.arange(S)))
        x = jnp.transpose(ys, (1, 0, 2))
    valid = jnp.arange(S)[None, :, None] < lengths[:, None, None]
    out = jnp.where(valid, x, padding_value)
    logits = out @ params["wlin"] + params["blin"]
    return jax.nn.sigmoid(logits)


if __name__ == "__main__":
    hidden_dim = 32
    num_layers = 3            # module keeps num_layers - 1 = 2 GRU layers
    max_seq_len = 8
    padding_value = -1.0
    batch = 2

    key = jax.random.PRNGKey(0)
    k_params, k_h = jax.random.split(key)
    gru_layers = num_layers - 1 if num_layers > 1 else num_layers
    params = init_params(k_params, hidden_dim, gru_layers)

    H = jax.random.normal(k_h, (batch, max_seq_len, hidden_dim), jnp.float32)
    T = jnp.array([8, 5], dtype=jnp.int32)   # variable valid lengths

    H_hat = supervisor_forward(H, T, params,
                               max_seq_len=max_seq_len,
                               padding_value=padding_value,
                               num_layers=num_layers)
    H_hat = jax.block_until_ready(H_hat)

    ref = reference_forward(H, T, params,
                            max_seq_len=max_seq_len,
                            padding_value=padding_value,
                            num_layers=num_layers)
    np.testing.assert_allclose(np.asarray(H_hat), np.asarray(ref),
                               rtol=2e-2, atol=2e-2)
    assert H_hat.shape == (batch, max_seq_len, hidden_dim)
    print("KERNEL_OK")
</pallas_src>

<mosaic_0001>
module attributes {stable_mosaic.version = 11 : i64} {
  func.func @_gru_sup_kernel(%arg0: i32, %arg1: memref<8x2x32xbf16, #tpu.memory_space<vmem>>, %arg2: memref<2x1xi32, #tpu.memory_space<vmem>>, %arg3: memref<2x3x32x32xbf16, #tpu.memory_space<vmem>>, %arg4: memref<2x3x32x32xbf16, #tpu.memory_space<vmem>>, %arg5: memref<2x3x1x32xf32, #tpu.memory_space<vmem>>, %arg6: memref<2x1x32xf32, #tpu.memory_space<vmem>>, %arg7: memref<32x32xbf16, #tpu.memory_space<vmem>>, %arg8: memref<1x32xf32, #tpu.memory_space<vmem>>, %arg9: memref<1x32xf32, #tpu.memory_space<vmem>>, %arg10: memref<8x2x32xf32, #tpu.memory_space<vmem>>, %arg11: memref<8x2x32xbf16, #tpu.memory_space<vmem>>, %arg12: memref<8x2x32xf32, #tpu.memory_space<vmem>>, %arg13: memref<8x2x32xf32, #tpu.memory_space<vmem>>, %arg14: memref<8x2x32xf32, #tpu.memory_space<vmem>>, %arg15: memref<8x2x32xf32, #tpu.memory_space<vmem>>) attributes {dimension_semantics = [#tpu.dimension_semantics<parallel>], iteration_bounds = array<i64: 1>, scalar_prefetch = 0 : i64, scratch_operands = 5 : i64, tpu.core_type = #tpu.core_type<tc>, window_params = [{transform_indices = @transform_0, window_bounds = array<i64: 8, 2, 32>}, {transform_indices = @transform_1, window_bounds = array<i64: 2, 1>}, {pipeline_mode = #tpu.pipeline_mode<synchronous>, transform_indices = @transform_2, window_bounds = array<i64: 2, 3, 32, 32>}, {pipeline_mode = #tpu.pipeline_mode<synchronous>, transform_indices = @transform_3, window_bounds = array<i64: 2, 3, 32, 32>}, {pipeline_mode = #tpu.pipeline_mode<synchronous>, transform_indices = @transform_4, window_bounds = array<i64: 2, 3, 1, 32>}, {pipeline_mode = #tpu.pipeline_mode<synchronous>, transform_indices = @transform_5, window_bounds = array<i64: 2, 1, 32>}, {pipeline_mode = #tpu.pipeline_mode<synchronous>, transform_indices = @transform_6, window_bounds = array<i64: 32, 32>}, {pipeline_mode = #tpu.pipeline_mode<synchronous>, transform_indices = @transform_7, window_bounds = array<i64: 1, 32>}, {pipeline_mode = #tpu.pipeline_mode<synchronous>, transform_indices = @transform_8, window_bounds = array<i64: 1, 32>}, {transform_indices = @transform_9, window_bounds = array<i64: 8, 2, 32>}]} {
    %c0 = arith.constant 0 : index
    %c0_0 = arith.constant 0 : index
    %0 = vector.load %arg2[%c0, %c0_0] : memref<2x1xi32, #tpu.memory_space<vmem>>, vector<2x1xi32>
    %1 = tpu.iota {dimensions = array<i32: 0>} : vector<8x2x32xi32>
    %2 = vector.shape_cast %0 : vector<2x1xi32> to vector<1x2x1xi32>
    %3 = vector.broadcast %2 : vector<1x2x1xi32> to vector<8x2x32xi32>
    %4 = arith.cmpi slt, %1, %3 : vector<8x2x32xi32>
    %5 = arith.extui %4 : vector<8x2x32xi1> to vector<8x2x32xi32>
    %6 = arith.sitofp %5 : vector<8x2x32xi32> to vector<8x2x32xf32>
    %c0_1 = arith.constant 0 : index
    %c0_2 = arith.constant 0 : index
    %c0_3 = arith.constant 0 : index
    %7 = vector.load %arg15[%c0_1, %c0_2, %c0_3] : memref<8x2x32xf32, #tpu.memory_space<vmem>>, vector<8x2x32xf32>
    tpu.vector_store %arg15[%c0_1, %c0_2, %c0_3], %6 {strides = array<i32>} : memref<8x2x32xf32, #tpu.memory_space<vmem>>, vector<8x2x32xf32>,
    %c0_4 = arith.constant 0 : index
    %c0_5 = arith.constant 0 : index
    %c0_6 = arith.constant 0 : index
    %c0_7 = arith.constant 0 : index
    %8 = vector.load %arg4[%c0_4, %c0_5, %c0_6, %c0_7] : memref<2x3x32x32xbf16, #tpu.memory_space<vmem>>, vector<1x1x32x32xbf16>
    %9 = vector.shape_cast %8 : vector<1x1x32x32xbf16> to vector<32x32xbf16>
    %c0_8 = arith.constant 0 : index
    %c1 = arith.constant 1 : index
    %c0_9 = arith.constant 0 : index
    %c0_10 = arith.constant 0 : index
    %10 = vector.load %arg4[%c0_8, %c1, %c0_9, %c0_10] : memref<2x3x32x32xbf16, #tpu.memory_space<vmem>>, vector<1x1x32x32xbf16>
    %11 = vector.shape_cast %10 : vector<1x1x32x32xbf16> to vector<32x32xbf16>
    %c0_11 = arith.constant 0 : index
    %c2 = arith.constant 2 : index
    %c0_12 = arith.constant 0 : index
    %c0_13 = arith.constant 0 : index
    %12 = vector.load %arg4[%c0_11, %c2, %c0_12, %c0_13] : memref<2x3x32x32xbf16, #tpu.memory_space<vmem>>, vector<1x1x32x32xbf16>
    %13 = vector.shape_cast %12 : vector<1x1x32x32xbf16> to vector<32x32xbf16>
    %c0_14 = arith.constant 0 : index
    %c0_15 = arith.constant 0 : index
    %c0_16 = arith.constant 0 : index
    %14 = vector.load %arg6[%c0_14, %c0_15, %c0_16] : memref<2x1x32xf32, #tpu.memory_space<vmem>>, vector<1x1x32xf32>
    %15 = vector.shape_cast %14 : vector<1x1x32xf32> to vector<1x32xf32>
    %c0_17 = arith.constant 0 : index
    %c0_18 = arith.constant 0 : index
    %c0_19 = arith.constant 0 : index
    %16 = vector.load %arg1[%c0_17, %c0_18, %c0_19] : memref<8x2x32xbf16, #tpu.memory_space<vmem>>, vector<8x2x32xbf16>
    %17 = vector.shape_cast %16 : vector<8x2x32xbf16> to vector<16x32xbf16>
    %c0_20 = arith.constant 0 : index
    %c0_21 = arith.constant 0 : index
    %c0_22 = arith.constant 0 : index
    %c0_23 = arith.constant 0 : index
    %18 = vector.load %arg3[%c0_20, %c0_21, %c0_22, %c0_23] : memref<2x3x32x32xbf16, #tpu.memory_space<vmem>>, vector<1x1x32x32xbf16>
    %19 = vector.shape_cast %18 : vector<1x1x32x32xbf16> to vector<32x32xbf16>
    %cst = arith.constant dense<0.000000e+00> : vector<16x32xf32>
    %20 = tpu.matmul %17, %19, %cst {dimension_numbers = #tpu.dot_dimension_numbers<[1], [0], [0], [1], [0, 0, 1, 1], [], []>} : vector<16x32xbf16>, vector<32x32xbf16>, vector<16x32xf32> -> vector<16x32xf32>
    %c0_24 = arith.constant 0 : index
    %c0_25 = arith.constant 0 : index
    %c0_26 = arith.constant 0 : index
    %c0_27 = arith.constant 0 : index
    %21 = vector.load %arg5[%c0_24, %c0_25, %c0_26, %c0_27] : memref<2x3x1x32xf32, #tpu.memory_space<vmem>>, vector<1x1x1x32xf32>
    %22 = vector.shape_cast %21 : vector<1x1x1x32xf32> to vector<1x32xf32>
    %23 = vector.broadcast %22 : vector<1x32xf32> to vector<16x32xf32>
    %24 = arith.addf %20, %23 : vector<16x32xf32>
    %25 = vector.shape_cast %24 : vector<16x32xf32> to vector<8x2x32xf32>
    %c0_28 = arith.constant 0 : index
    %c0_29 = arith.constant 0 : index
    %c0_30 = arith.constant 0 : index
    %26 = vector.load %arg12[%c0_28, %c0_29, %c0_30] : memref<8x2x32xf32, #tpu.memory_space<vmem>>, vector<8x2x32xf32>
    tpu.vector_store %arg12[%c0_28, %c0_29, %c0_30], %25 {strides = array<i32>} : memref<8x2x32xf32, #tpu.memory_space<vmem>>, vector<8x2x32xf32>,
    %c0_31 = arith.constant 0 : index
    %c1_32 = arith.constant 1 : index
    %c0_33 = arith.constant 0 : index
    %c0_34 = arith.constant 0 : index
    %27 = vector.load %arg3[%c0_31, %c1_32, %c0_33, %c0_34] : memref<2x3x32x32xbf16, #tpu.memory_space<vmem>>, vector<1x1x32x32xbf16>
    %28 = vector.shape_cast %27 : vector<1x1x32x32xbf16> to vector<32x32xbf16>
    %cst_35 = arith.constant dense<0.000000e+00> : vector<16x32xf32>
    %29 = tpu.matmul %17, %28, %cst_35 {dimension_numbers = #tpu.dot_dimension_numbers<[1], [0], [0], [1], [0, 0, 1, 1], [], []>} : vector<16x32xbf16>, vector<32x32xbf16>, vector<16x32xf32> -> vector<16x32xf32>
    %c0_36 = arith.constant 0 : index
    %c1_37 = arith.constant 1 : index
    %c0_38 = arith.constant 0 : index
    %c0_39 = arith.constant 0 : index
    %30 = vector.load %arg5[%c0_36, %c1_37, %c0_38, %c0_39] : memref<2x3x1x32xf32, #tpu.memory_space<vmem>>, vector<1x1x1x32xf32>
    %31 = vector.shape_cast %30 : vector<1x1x1x32xf32> to vector<1x32xf32>
    %32 = vector.broadcast %31 : vector<1x32xf32> to vector<16x32xf32>
    %33 = arith.addf %29, %32 : vector<16x32xf32>
    %34 = vector.shape_cast %33 : vector<16x32xf32> to vector<8x2x32xf32>
    %c0_40 = arith.constant 0 : index
    %c0_41 = arith.constant 0 : index
    %c0_42 = arith.constant 0 : index
    %35 = vector.load %arg13[%c0_40, %c0_41, %c0_42] : memref<8x2x32xf32, #tpu.memory_space<vmem>>, vector<8x2x32xf32>
    tpu.vector_store %arg13[%c0_40, %c0_41, %c0_42], %34 {strides = array<i32>} : memref<8x2x32xf32, #tpu.memory_space<vmem>>, vector<8x2x32xf32>,
    %c0_43 = arith.constant 0 : index
    %c2_44 = arith.constant 2 : index
    %c0_45 = arith.constant 0 : index
    %c0_46 = arith.constant 0 : index
    %36 = vector.load %arg3[%c0_43, %c2_44, %c0_45, %c0_46] : memref<2x3x32x32xbf16, #tpu.memory_space<vmem>>, vector<1x1x32x32xbf16>
    %37 = vector.shape_cast %36 : vector<1x1x32x32xbf16> to vector<32x32xbf16>
    %cst_47 = arith.constant dense<0.000000e+00> : vector<16x32xf32>
    %38 = tpu.matmul %17, %37, %cst_47 {dimension_numbers = #tpu.dot_dimension_numbers<[1], [0], [0], [1], [0, 0, 1, 1], [], []>} : vector<16x32xbf16>, vector<32x32xbf16>, vector<16x32xf32> -> vector<16x32xf32>
    %c0_48 = arith.constant 0 : index
    %c2_49 = arith.constant 2 : index
    %c0_50 = arith.constant 0 : index
    %c0_51 = arith.constant 0 : index
    %39 = vector.load %arg5[%c0_48, %c2_49, %c0_50, %c0_51] : memref<2x3x1x32xf32, #tpu.memory_space<vmem>>, vector<1x1x1x32xf32>
    %40 = vector.shape_cast %39 : vector<1x1x1x32xf32> to vector<1x32xf32>
    %41 = vector.broadcast %40 : vector<1x32xf32> to vector<16x32xf32>
    %42 = arith.addf %38, %41 : vector<16x32xf32>
    %43 = vector.shape_cast %42 : vector<16x32xf32> to vector<8x2x32xf32>
    %c0_52 = arith.constant 0 : index
    %c0_53 = arith.constant 0 : index
    %c0_54 = arith.constant 0 : index
    %44 = vector.load %arg14[%c0_52, %c0_53, %c0_54] : memref<8x2x32xf32, #tpu.memory_space<vmem>>, vector<8x2x32xf32>
    tpu.vector_store %arg14[%c0_52, %c0_53, %c0_54], %43 {strides = array<i32>} : memref<8x2x32xf32, #tpu.memory_space<vmem>>, vector<8x2x32xf32>,
    %cst_55 = arith.constant 0.000000e+00 : f32
    %45 = vector.broadcast %cst_55 : f32 to vector<2x32xf32>
    %c0_i32 = arith.constant 0 : i32
    %46 = arith.truncf %45 : vector<2x32xf32> to vector<2x32xbf16>
    %cst_56 = arith.constant dense<0.000000e+00> : vector<2x32xf32>
    %47 = tpu.matmul %46, %9, %cst_56 {dimension_numbers = #tpu.dot_dimension_numbers<[1], [0], [0], [1], [0, 0, 1, 1], [], []>} : vector<2x32xbf16>, vector<32x32xbf16>, vector<2x32xf32> -> vector<2x32xf32>
    %cst_57 = arith.constant dense<0.000000e+00> : vector<2x32xf32>
    %48 = tpu.matmul %46, %11, %cst_57 {dimension_numbers = #tpu.dot_dimension_numbers<[1], [0], [0], [1], [0, 0, 1, 1], [], []>} : vector<2x32xbf16>, vector<32x32xbf16>, vector<2x32xf32> -> vector<2x32xf32>
    %cst_58 = arith.constant dense<0.000000e+00> : vector<2x32xf32>
    %49 = tpu.matmul %46, %13, %cst_58 {dimension_numbers = #tpu.dot_dimension_numbers<[1], [0], [0], [1], [0, 0, 1, 1], [], []>} : vector<2x32xbf16>, vector<32x32xbf16>, vector<2x32xf32> -> vector<2x32xf32>
    %50 = arith.index_cast %c0_i32 : i32 to index
    %c0_59 = arith.constant 0 : index
    %c0_60 = arith.constant 0 : index
    %51 = vector.load %arg12[%50, %c0_59, %c0_60] : memref<8x2x32xf32, #tpu.memory_space<vmem>>, vector<1x2x32xf32>
    %52 = vector.shape_cast %51 : vector<1x2x32xf32> to vector<2x32xf32>
    %53 = arith.addf %52, %47 : vector<2x32xf32>
    %54 = arith.negf %53 : vector<2x32xf32>
    %55 = math.exp %54 : vector<2x32xf32>
    %cst_61 = arith.constant 1.000000e+00 : f32
    %56 = vector.broadcast %cst_61 : f32 to vector<2x32xf32>
    %57 = arith.addf %56, %55 : vector<2x32xf32>
    %58 = arith.divf %56, %57 : vector<2x32xf32>
    %59 = arith.index_cast %c0_i32 : i32 to index
    %c0_62 = arith.constant 0 : index
    %c0_63 = arith.constant 0 : index
    %60 = vector.load %arg13[%59, %c0_62, %c0_63] : memref<8x2x32xf32, #tpu.memory_space<vmem>>, vector<1x2x32xf32>
    %61 = vector.shape_cast %60 : vector<1x2x32xf32> to vector<2x32xf32>
    %62 = arith.addf %61, %48 : vector<2x32xf32>
    %63 = arith.negf %62 : vector<2x32xf32>
    %64 = math.exp %63 : vector<2x32xf32>
    %cst_64 = arith.constant 1.000000e+00 : f32
    %65 = vector.broadcast %cst_64 : f32 to vector<2x32xf32>
    %66 = arith.addf %65, %64 : vector<2x32xf32>
    %67 = arith.divf %65, %66 : vector<2x32xf32>
    %68 = arith.index_cast %c0_i32 : i32 to index
    %c0_65 = arith.constant 0 : index
    %c0_66 = arith.constant 0 : index
    %69 = vector.load %arg14[%68, %c0_65, %c0_66] : memref<8x2x32xf32, #tpu.memory_space<vmem>>, vector<1x2x32xf32>
    %70 = vector.shape_cast %69 : vector<1x2x32xf32> to vector<2x32xf32>
    %71 = vector.broadcast %15 : vector<1x32xf32> to vector<2x32xf32>
    %72 = arith.addf %49, %71 : vector<2x32xf32>
    %73 = arith.mulf %58, %72 : vector<2x32xf32>
    %74 = arith.addf %70, %73 : vector<2x32xf32>
    %75 = math.tanh %74 : vector<2x32xf32>
    %cst_67 = arith.constant 1.000000e+00 : f32
    %76 = vector.broadcast %cst_67 : f32 to vector<2x32xf32>
    %77 = arith.subf %76, %67 : vector<2x32xf32>
    %78 = arith.mulf %77, %75 : vector<2x32xf32>
    %79 = arith.mulf %67, %45 : vector<2x32xf32>
    %80 = arith.addf %78, %79 : vector<2x32xf32>
    %81 = arith.index_cast %c0_i32 : i32 to index
    %c0_68 = arith.constant 0 : index
    %c0_69 = arith.constant 0 : index
    %82 = vector.load %arg15[%81, %c0_68, %c0_69] : memref<8x2x32xf32, #tpu.memory_space<vmem>>, vector<1x2x32xf32>
    %83 = vector.shape_cast %82 : vector<1x2x32xf32> to vector<2x32xf32>
    %84 = arith.subf %80, %45 : vector<2x32xf32>
    %85 = arith.mulf %83, %84 : vector<2x32xf32>
    %86 = arith.addf %45, %85 : vector<2x32xf32>
    %87 = arith.truncf %86 : vector<2x32xf32> to vector<2x32xbf16>
    %88 = arith.index_cast %c0_i32 : i32 to index
    %c0_70 = arith.constant 0 : index
    %c0_71 = arith.constant 0 : index
    %89 = vector.load %arg11[%88, %c0_70, %c0_71] : memref<8x2x32xbf16, #tpu.memory_space<vmem>>, vector<1x2x32xbf16>
    %90 = vector.shape_cast %89 : vector<1x2x32xbf16> to vector<2x32xbf16>
    %91 = vector.shape_cast %87 : vector<2x32xbf16> to vector<1x2x32xbf16>
    tpu.vector_store %arg11[%88, %c0_70, %c0_71], %91 {strides = array<i32>} : memref<8x2x32xbf16, #tpu.memory_space<vmem>>, vector<1x2x32xbf16>,
    %c1_i32 = arith.constant 1 : i32
    %92 = arith.truncf %86 : vector<2x32xf32> to vector<2x32xbf16>
    %cst_72 = arith.constant dense<0.000000e+00> : vector<2x32xf32>
    %93 = tpu.matmul %92, %9, %cst_72 {dimension_numbers = #tpu.dot_dimension_numbers<[1], [0], [0], [1], [0, 0, 1, 1], [], []>} : vector<2x32xbf16>, vector<32x32xbf16>, vector<2x32xf32> -> vector<2x32xf32>
    %cst_73 = arith.constant dense<0.000000e+00> : vector<2x32xf32>
    %94 = tpu.matmul %92, %11, %cst_73 {dimension_numbers = #tpu.dot_dimension_numbers<[1], [0], [0], [1], [0, 0, 1, 1], [], []>} : vector<2x32xbf16>, vector<32x32xbf16>, vector<2x32xf32> -> vector<2x32xf32>
    %cst_74 = arith.constant dense<0.000000e+00> : vector<2x32xf32>
    %95 = tpu.matmul %92, %13, %cst_74 {dimension_numbers = #tpu.dot_dimension_numbers<[1], [0], [0], [1], [0, 0, 1, 1], [], []>} : vector<2x32xbf16>, vector<32x32xbf16>, vector<2x32xf32> -> vector<2x32xf32>
    %96 = arith.index_cast %c1_i32 : i32 to index
    %c0_75 = arith.constant 0 : index
    %c0_76 = arith.constant 0 : index
    %97 = vector.load %arg12[%96, %c0_75, %c0_76] : memref<8x2x32xf32, #tpu.memory_space<vmem>>, vector<1x2x32xf32>
    %98 = vector.shape_cast %97 : vector<1x2x32xf32> to vector<2x32xf32>
    %99 = arith.addf %98, %93 : vector<2x32xf32>
    %100 = arith.negf %99 : vector<2x32xf32>
    %101 = math.exp %100 : vector<2x32xf32>
    %cst_77 = arith.constant 1.000000e+00 : f32
    %102 = vector.broadcast %cst_77 : f32 to vector<2x32xf32>
    %103 = arith.addf %102, %101 : vector<2x32xf32>
    %104 = arith.divf %102, %103 : vector<2x32xf32>
    %105 = arith.index_cast %c1_i32 : i32 to index
    %c0_78 = arith.constant 0 : index
    %c0_79 = arith.constant 0 : index
    %106 = vector.load %arg13[%105, %c0_78, %c0_79] : memref<8x2x32xf32, #tpu.memory_space<vmem>>, vector<1x2x32xf32>
    %107 = vector.shape_cast %106 : vector<1x2x32xf32> to vector<2x32xf32>
    %108 = arith.addf %107, %94 : vector<2x32xf32>
    %109 = arith.negf %108 : vector<2x32xf32>
    %110 = math.exp %109 : vector<2x32xf32>
    %cst_80 = arith.constant 1.000000e+00 : f32
    %111 = vector.broadcast %cst_80 : f32 to vector<2x32xf32>
    %112 = arith.addf %111, %110 : vector<2x32xf32>
    %113 = arith.divf %111, %112 : vector<2x32xf32>
    %114 = arith.index_cast %c1_i32 : i32 to index
    %c0_81 = arith.constant 0 : index
    %c0_82 = arith.constant 0 : index
    %115 = vector.load %arg14[%114, %c0_81, %c0_82] : memref<8x2x32xf32, #tpu.memory_space<vmem>>, vector<1x2x32xf32>
    %116 = vector.shape_cast %115 : vector<1x2x32xf32> to vector<2x32xf32>
    %117 = vector.broadcast %15 : vector<1x32xf32> to vector<2x32xf32>
    %118 = arith.addf %95, %117 : vector<2x32xf32>
    %119 = arith.mulf %104, %118 : vector<2x32xf32>
    %120 = arith.addf %116, %119 : vector<2x32xf32>
    %121 = math.tanh %120 : vector<2x32xf32>
    %cst_83 = arith.constant 1.000000e+00 : f32
    %122 = vector.broadcast %cst_83 : f32 to vector<2x32xf32>
    %123 = arith.subf %122, %113 : vector<2x32xf32>
    %124 = arith.mulf %123, %121 : vector<2x32xf32>
    %125 = arith.mulf %113, %86 : vector<2x32xf32>
    %126 = arith.addf %124, %125 : vector<2x32xf32>
    %127 = arith.index_cast %c1_i32 : i32 to index
    %c0_84 = arith.constant 0 : index
    %c0_85 = arith.constant 0 : index
    %128 = vector.load %arg15[%127, %c0_84, %c0_85] : memref<8x2x32xf32, #tpu.memory_space<vmem>>, vector<1x2x32xf32>
    %129 = vector.shape_cast %128 : vector<1x2x32xf32> to vector<2x32xf32>
    %130 = arith.subf %126, %86 : vector<2x32xf32>
    %131 = arith.mulf %129, %130 : vector<2x32xf32>
    %132 = arith.addf %86, %131 : vector<2x32xf32>
    %133 = arith.truncf %132 : vector<2x32xf32> to vector<2x32xbf16>
    %134 = arith.index_cast %c1_i32 : i32 to index
    %c0_86 = arith.constant 0 : index
    %c0_87 = arith.constant 0 : index
    %135 = vector.load %arg11[%134, %c0_86, %c0_87] : memref<8x2x32xbf16, #tpu.memory_space<vmem>>, vector<1x2x32xbf16>
    %136 = vector.shape_cast %135 : vector<1x2x32xbf16> to vector<2x32xbf16>
    %137 = vector.shape_cast %133 : vector<2x32xbf16> to vector<1x2x32xbf16>
    tpu.vector_store %arg11[%134, %c0_86, %c0_87], %137 {strides = array<i32>} : memref<8x2x32xbf16, #tpu.memory_space<vmem>>, vector<1x2x32xbf16>,
    %c2_i32 = arith.constant 2 : i32
    %138 = arith.truncf %132 : vector<2x32xf32> to vector<2x32xbf16>
    %cst_88 = arith.constant dense<0.000000e+00> : vector<2x32xf32>
    %139 = tpu.matmul %138, %9, %cst_88 {dimension_numbers = #tpu.dot_dimension_numbers<[1], [0], [0], [1], [0, 0, 1, 1], [], []>} : vector<2x32xbf16>, vector<32x32xbf16>, vector<2x32xf32> -> vector<2x32xf32>
    %cst_89 = arith.constant dense<0.000000e+00> : vector<2x32xf32>
    %140 = tpu.matmul %138, %11, %cst_89 {dimension_numbers = #tpu.dot_dimension_numbers<[1], [0], [0], [1], [0, 0, 1, 1], [], []>} : vector<2x32xbf16>, vector<32x32xbf16>, vector<2x32xf32> -> vector<2x32xf32>
    %cst_90 = arith.constant dense<0.000000e+00> : vector<2x32xf32>
    %141 = tpu.matmul %138, %13, %cst_90 {dimension_numbers = #tpu.dot_dimension_numbers<[1], [0], [0], [1], [0, 0, 1, 1], [], []>} : vector<2x32xbf16>, vector<32x32xbf16>, vector<2x32xf32> -> vector<2x32xf32>
    %142 = arith.index_cast %c2_i32 : i32 to index
    %c0_91 = arith.constant 0 : index
    %c0_92 = arith.constant 0 : index
    %143 = vector.load %arg12[%142, %c0_91, %c0_92] : memref<8x2x32xf32, #tpu.memory_space<vmem>>, vector<1x2x32xf32>
    %144 = vector.shape_cast %143 : vector<1x2x32xf32> to vector<2x32xf32>
    %145 = arith.addf %144, %139 : vector<2x32xf32>
    %146 = arith.negf %145 : vector<2x32xf32>
    %147 = math.exp %146 : vector<2x32xf32>
    %cst_93 = arith.constant 1.000000e+00 : f32
    %148 = vector.broadcast %cst_93 : f32 to vector<2x32xf32>
    %149 = arith.addf %148, %147 : vector<2x32xf32>
    %150 = arith.divf %148, %149 : vector<2x32xf32>
    %151 = arith.index_cast %c2_i32 : i32 to index
    %c0_94 = arith.constant 0 : index
    %c0_95 = arith.constant 0 : index
    %152 = vector.load %arg13[%151, %c0_94, %c0_95] : memref<8x2x32xf32, #tpu.memory_space<vmem>>, vector<1x2x32xf32>
    %153 = vector.shape_cast %152 : vector<1x2x32xf32> to vector<2x32xf32>
    %154 = arith.addf %153, %140 : vector<2x32xf32>
    %155 = arith.negf %154 : vector<2x32xf32>
    %156 = math.exp %155 : vector<2x32xf32>
    %cst_96 = arith.constant 1.000000e+00 : f32
    %157 = vector.broadcast %cst_96 : f32 to vector<2x32xf32>
    %158 = arith.addf %157, %156 : vector<2x32xf32>
    %159 = arith.divf %157, %158 : vector<2x32xf32>
    %160 = arith.index_cast %c2_i32 : i32 to index
    %c0_97 = arith.constant 0 : index
    %c0_98 = arith.constant 0 : index
    %161 = vector.load %arg14[%160, %c0_97, %c0_98] : memref<8x2x32xf32, #tpu.memory_space<vmem>>, vector<1x2x32xf32>
    %162 = vector.shape_cast %161 : vector<1x2x32xf32> to vector<2x32xf32>
    %163 = vector.broadcast %15 : vector<1x32xf32> to vector<2x32xf32>
    %164 = arith.addf %141, %163 : vector<2x32xf32>
    %165 = arith.mulf %150, %164 : vector<2x32xf32>
    %166 = arith.addf %162, %165 : vector<2x32xf32>
    %167 = math.tanh %166 : vector<2x32xf32>
    %cst_99 = arith.constant 1.000000e+00 : f32
    %168 = vector.broadcast %cst_99 : f32 to vector<2x32xf32>
    %169 = arith.subf %168, %159 : vector<2x32xf32>
    %170 = arith.mulf %169, %167 : vector<2x32xf32>
    %171 = arith.mulf %159, %132 : vector<2x32xf32>
    %172 = arith.addf %170, %171 : vector<2x32xf32>
    %173 = arith.index_cast %c2_i32 : i32 to index
    %c0_100 = arith.constant 0 : index
    %c0_101 = arith.constant 0 : index
    %174 = vector.load %arg15[%173, %c0_100, %c0_101] : memref<8x2x32xf32, #tpu.memory_space<vmem>>, vector<1x2x32xf32>
    %175 = vector.shape_cast %174 : vector<1x2x32xf32> to vector<2x32xf32>
    %176 = arith.subf %172, %132 : vector<2x32xf32>
    %177 = arith.mulf %175, %176 : vector<2x32xf32>
    %178 = arith.addf %132, %177 : vector<2x32xf32>
    %179 = arith.truncf %178 : vector<2x32xf32> to vector<2x32xbf16>
    %180 = arith.index_cast %c2_i32 : i32 to index
    %c0_102 = arith.constant 0 : index
    %c0_103 = arith.constant 0 : index
    %181 = vector.load %arg11[%180, %c0_102, %c0_103] : memref<8x2x32xbf16, #tpu.memory_space<vmem>>, vector<1x2x32xbf16>
    %182 = vector.shape_cast %181 : vector<1x2x32xbf16> to vector<2x32xbf16>
    %183 = vector.shape_cast %179 : vector<2x32xbf16> to vector<1x2x32xbf16>
    tpu.vector_store %arg11[%180, %c0_102, %c0_103], %183 {strides = array<i32>} : memref<8x2x32xbf16, #tpu.memory_space<vmem>>, vector<1x2x32xbf16>,
    %c3_i32 = arith.constant 3 : i32
    %184 = arith.truncf %178 : vector<2x32xf32> to vector<2x32xbf16>
    %cst_104 = arith.constant dense<0.000000e+00> : vector<2x32xf32>
    %185 = tpu.matmul %184, %9, %cst_104 {dimension_numbers = #tpu.dot_dimension_numbers<[1], [0], [0], [1], [0, 0, 1, 1], [], []>} : vector<2x32xbf16>, vector<32x32xbf16>, vector<2x32xf32> -> vector<2x32xf32>
    %cst_105 = arith.constant dense<0.000000e+00> : vector<2x32xf32>
    %186 = tpu.matmul %184, %11, %cst_105 {dimension_numbers = #tpu.dot_dimension_numbers<[1], [0], [0], [1], [0, 0, 1, 1], [], []>} : vector<2x32xbf16>, vector<32x32xbf16>, vector<2x32xf32> -> vector<2x32xf32>
    %cst_106 = arith.constant dense<0.000000e+00> : vector<2x32xf32>
    %187 = tpu.matmul %184, %13, %cst_106 {dimension_numbers = #tpu.dot_dimension_numbers<[1], [0], [0], [1], [0, 0, 1, 1], [], []>} : vector<2x32xbf16>, vector<32x32xbf16>, vector<2x32xf32> -> vector<2x32xf32>
    %188 = arith.index_cast %c3_i32 : i32 to index
    %c0_107 = arith.constant 0 : index
    %c0_108 = arith.constant 0 : index
    %189 = vector.load %arg12[%188, %c0_107, %c0_108] : memref<8x2x32xf32, #tpu.memory_space<vmem>>, vector<1x2x32xf32>
    %190 = vector.shape_cast %189 : vector<1x2x32xf32> to vector<2x32xf32>
    %191 = arith.addf %190, %185 : vector<2x32xf32>
    %192 = arith.negf %191 : vector<2x32xf32>
    %193 = math.exp %192 : vector<2x32xf32>
    %cst_109 = arith.constant 1.000000e+00 : f32
    %194 = vector.broadcast %cst_109 : f32 to vector<2x32xf32>
    %195 = arith.addf %194, %193 : vector<2x32xf32>
    %196 = arith.divf %194, %195 : vector<2x32xf32>
    %197 = arith.index_cast %c3_i32 : i32 to index
    %c0_110 = arith.constant 0 : index
    %c0_111 = arith.constant 0 : index
    %198 = vector.load %arg13[%197, %c0_110, %c0_111] : memref<8x2x32xf32, #tpu.memory_space<vmem>>, vector<1x2x32xf32>
    %199 = vector.shape_cast %198 : vector<1x2x32xf32> to vector<2x32xf32>
    %200 = arith.addf %199, %186 : vector<2x32xf32>
    %201 = arith.negf %200 : vector<2x32xf32>
    %202 = math.exp %201 : vector<2x32xf32>
    %cst_112 = arith.constant 1.000000e+00 : f32
    %203 = vector.broadcast %cst_112 : f32 to vector<2x32xf32>
    %204 = arith.addf %203, %202 : vector<2x32xf32>
    %205 = arith.divf %203, %204 : vector<2x32xf32>
    %206 = arith.index_cast %c3_i32 : i32 to index
    %c0_113 = arith.constant 0 : index
    %c0_114 = arith.constant 0 : index
    %207 = vector.load %arg14[%206, %c0_113, %c0_114] : memref<8x2x32xf32, #tpu.memory_space<vmem>>, vector<1x2x32xf32>
    %208 = vector.shape_cast %207 : vector<1x2x32xf32> to vector<2x32xf32>
    %209 = vector.broadcast %15 : vector<1x32xf32> to vector<2x32xf32>
    %210 = arith.addf %187, %209 : vector<2x32xf32>
    %211 = arith.mulf %196, %210 : vector<2x32xf32>
    %212 = arith.addf %208, %211 : vector<2x32xf32>
    %213 = math.tanh %212 : vector<2x32xf32>
    %cst_115 = arith.constant 1.000000e+00 : f32
    %214 = vector.broadcast %cst_115 : f32 to vector<2x32xf32>
    %215 = arith.subf %214, %205 : vector<2x32xf32>
    %216 = arith.mulf %215, %213 : vector<2x32xf32>
    %217 = arith.mulf %205, %178 : vector<2x32xf32>
    %218 = arith.addf %216, %217 : vector<2x32xf32>
    %219 = arith.index_cast %c3_i32 : i32 to index
    %c0_116 = arith.constant 0 : index
    %c0_117 = arith.constant 0 : index
    %220 = vector.load %arg15[%219, %c0_116, %c0_117] : memref<8x2x32xf32, #tpu.memory_space<vmem>>, vector<1x2x32xf32>
    %221 = vector.shape_cast %220 : vector<1x2x32xf32> to vector<2x32xf32>
    %222 = arith.subf %218, %178 : vector<2x32xf32>
    %223 = arith.mulf %221, %222 : vector<2x32xf32>
    %224 = arith.addf %178, %223 : vector<2x32xf32>
    %225 = arith.truncf %224 : vector<2x32xf32> to vector<2x32xbf16>
    %226 = arith.index_cast %c3_i32 : i32 to index
    %c0_118 = arith.constant 0 : index
    %c0_119 = arith.constant 0 : index
    %227 = vector.load %arg11[%226, %c0_118, %c0_119] : memref<8x2x32xbf16, #tpu.memory_space<vmem>>, vector<1x2x32xbf16>
    %228 = vector.shape_cast %227 : vector<1x2x32xbf16> to vector<2x32xbf16>
    %229 = vector.shape_cast %225 : vector<2x32xbf16> to vector<1x2x32xbf16>
    tpu.vector_store %arg11[%226, %c0_118, %c0_119], %229 {strides = array<i32>} : memref<8x2x32xbf16, #tpu.memory_space<vmem>>, vector<1x2x32xbf16>,
    %c4_i32 = arith.constant 4 : i32
    %230 = arith.truncf %224 : vector<2x32xf32> to vector<2x32xbf16>
    %cst_120 = arith.constant dense<0.000000e+00> : vector<2x32xf32>
    %231 = tpu.matmul %230, %9, %cst_120 {dimension_numbers = #tpu.dot_dimension_numbers<[1], [0], [0], [1], [0, 0, 1, 1], [], []>} : vector<2x32xbf16>, vector<32x32xbf16>, vector<2x32xf32> -> vector<2x32xf32>
    %cst_121 = arith.constant dense<0.000000e+00> : vector<2x32xf32>
    %232 = tpu.matmul %230, %11, %cst_121 {dimension_numbers = #tpu.dot_dimension_numbers<[1], [0], [0], [1], [0, 0, 1, 1], [], []>} : vector<2x32xbf16>, vector<32x32xbf16>, vector<2x32xf32> -> vector<2x32xf32>
    %cst_122 = arith.constant dense<0.000000e+00> : vector<2x32xf32>
    %233 = tpu.matmul %230, %13, %cst_122 {dimension_numbers = #tpu.dot_dimension_numbers<[1], [0], [0], [1], [0, 0, 1, 1], [], []>} : vector<2x32xbf16>, vector<32x32xbf16>, vector<2x32xf32> -> vector<2x32xf32>
    %234 = arith.index_cast %c4_i32 : i32 to index
    %c0_123 = arith.constant 0 : index
    %c0_124 = arith.constant 0 : index
    %235 = vector.load %arg12[%234, %c0_123, %c0_124] : memref<8x2x32xf32, #tpu.memory_space<vmem>>, vector<1x2x32xf32>
    %236 = vector.shape_cast %235 : vector<1x2x32xf32> to vector<2x32xf32>
    %237 = arith.addf %236, %231 : vector<2x32xf32>
    %238 = arith.negf %237 : vector<2x32xf32>
    %239 = math.exp %238 : vector<2x32xf32>
    %cst_125 = arith.constant 1.000000e+00 : f32
    %240 = vector.broadcast %cst_125 : f32 to vector<2x32xf32>
    %241 = arith.addf %240, %239 : vector<2x32xf32>
    %242 = arith.divf %240, %241 : vector<2x32xf32>
    %243 = arith.index_cast %c4_i32 : i32 to index
    %c0_126 = arith.constant 0 : index
    %c0_127 = arith.constant 0 : index
    %244 = vector.load %arg13[%243, %c0_126, %c0_127] : memref<8x2x32xf32, #tpu.memory_space<vmem>>, vector<1x2x32xf32>
    %245 = vector.shape_cast %244 : vector<1x2x32xf32> to vector<2x32xf32>
    %246 = arith.addf %245, %232 : vector<2x32xf32>
    %247 = arith.negf %246 : vector<2x32xf32>
    %248 = math.exp %247 : vector<2x32xf32>
    %cst_128 = arith.constant 1.000000e+00 : f32
    %249 = vector.broadcast %cst_128 : f32 to vector<2x32xf32>
    %250 = arith.addf %249, %248 : vector<2x32xf32>
    %251 = arith.divf %249, %250 : vector<2x32xf32>
    %252 = arith.index_cast %c4_i32 : i32 to index
    %c0_129 = arith.constant 0 : index
    %c0_130 = arith.constant 0 : index
    %253 = vector.load %arg14[%252, %c0_129, %c0_130] : memref<8x2x32xf32, #tpu.memory_space<vmem>>, vector<1x2x32xf32>
    %254 = vector.shape_cast %253 : vector<1x2x32xf32> to vector<2x32xf32>
    %255 = vector.broadcast %15 : vector<1x32xf32> to vector<2x32xf32>
    %256 = arith.addf %233, %255 : vector<2x32xf32>
    %257 = arith.mulf %242, %256 : vector<2x32xf32>
    %258 = arith.addf %254, %257 : vector<2x32xf32>
    %259 = math.tanh %258 : vector<2x32xf32>
    %cst_131 = arith.constant 1.000000e+00 : f32
    %260 = vector.broadcast %cst_131 : f32 to vector<2x32xf32>
    %261 = arith.subf %260, %251 : vector<2x32xf32>
    %262 = arith.mulf %261, %259 : vector<2x32xf32>
    %263 = arith.mulf %251, %224 : vector<2x32xf32>
    %264 = arith.addf %262, %263 : vector<2x32xf32>
    %265 = arith.index_cast %c4_i32 : i32 to index
    %c0_132 = arith.constant 0 : index
    %c0_133 = arith.constant 0 : index
    %266 = vector.load %arg15[%265, %c0_132, %c0_133] : memref<8x2x32xf32, #tpu.memory_space<vmem>>, vector<1x2x32xf32>
    %267 = vector.shape_cast %266 : vector<1x2x32xf32> to vector<2x32xf32>
    %268 = arith.subf %264, %224 : vector<2x32xf32>
    %269 = arith.mulf %267, %268 : vector<2x32xf32>
    %270 = arith.addf %224, %269 : vector<2x32xf32>
    %271 = arith.truncf %270 : vector<2x32xf32> to vector<2x32xbf16>
    %272 = arith.index_cast %c4_i32 : i32 to index
    %c0_134 = arith.constant 0 : index
    %c0_135 = arith.constant 0 : index
    %273 = vector.load %arg11[%272, %c0_134, %c0_135] : memref<8x2x32xbf16, #tpu.memory_space<vmem>>, vector<1x2x32xbf16>
    %274 = vector.shape_cast %273 : vector<1x2x32xbf16> to vector<2x32xbf16>
    %275 = vector.shape_cast %271 : vector<2x32xbf16> to vector<1x2x32xbf16>
    tpu.vector_store %arg11[%272, %c0_134, %c0_135], %275 {strides = array<i32>} : memref<8x2x32xbf16, #tpu.memory_space<vmem>>, vector<1x2x32xbf16>,
    %c5_i32 = arith.constant 5 : i32
    %276 = arith.truncf %270 : vector<2x32xf32> to vector<2x32xbf16>
    %cst_136 = arith.constant dense<0.000000e+00> : vector<2x32xf32>
    %277 = tpu.matmul %276, %9, %cst_136 {dimension_numbers = #tpu.dot_dimension_numbers<[1], [0], [0], [1], [0, 0, 1, 1], [], []>} : vector<2x32xbf16>, vector<32x32xbf16>, vector<2x32xf32> -> vector<2x32xf32>
    %cst_137 = arith.constant dense<0.000000e+00> : vector<2x32xf32>
    %278 = tpu.matmul %276, %11, %cst_137 {dimension_numbers = #tpu.dot_dimension_numbers<[1], [0], [0], [1], [0, 0, 1, 1], [], []>} : vector<2x32xbf16>, vector<32x32xbf16>, vector<2x32xf32> -> vector<2x32xf32>
    %cst_138 = arith.constant dense<0.000000e+00> : vector<2x32xf32>
    %279 = tpu.matmul %276, %13, %cst_138 {dimension_numbers = #tpu.dot_dimension_numbers<[1], [0], [0], [1], [0, 0, 1, 1], [], []>} : vector<2x32xbf16>, vector<32x32xbf16>, vector<2x32xf32> -> vector<2x32xf32>
    %280 = arith.index_cast %c5_i32 : i32 to index
    %c0_139 = arith.constant 0 : index
    %c0_140 = arith.constant 0 : index
    %281 = vector.load %arg12[%280, %c0_139, %c0_140] : memref<8x2x32xf32, #tpu.memory_space<vmem>>, vector<1x2x32xf32>
    %282 = vector.shape_cast %281 : vector<1x2x32xf32> to vector<2x32xf32>
    %283 = arith.addf %282, %277 : vector<2x32xf32>
    %284 = arith.negf %283 : vector<2x32xf32>
    %285 = math.exp %284 : vector<2x32xf32>
    %cst_141 = arith.constant 1.000000e+00 : f32
    %286 = vector.broadcast %cst_141 : f32 to vector<2x32xf32>
    %287 = arith.addf %286, %285 : vector<2x32xf32>
    %288 = arith.divf %286, %287 : vector<2x32xf32>
    %289 = arith.index_cast %c5_i32 : i32 to index
    %c0_142 = arith.constant 0 : index
    %c0_143 = arith.constant 0 : index
    %290 = vector.load %arg13[%289, %c0_142, %c0_143] : memref<8x2x32xf32, #tpu.memory_space<vmem>>, vector<1x2x32xf32>
    %291 = vector.shape_cast %290 : vector<1x2x32xf32> to vector<2x32xf32>
    %292 = arith.addf %291, %278 : vector<2x32xf32>
    %293 = arith.negf %292 : vector<2x32xf32>
    %294 = math.exp %293 : vector<2x32xf32>
    %cst_144 = arith.constant 1.000000e+00 : f32
    %295 = vector.broadcast %cst_144 : f32 to vector<2x32xf32>
    %296 = arith.addf %295, %294 : vector<2x32xf32>
    %297 = arith.divf %295, %296 : vector<2x32xf32>
    %298 = arith.index_cast %c5_i32 : i32 to index
    %c0_145 = arith.constant 0 : index
    %c0_146 = arith.constant 0 : index
    %299 = vector.load %arg14[%298, %c0_145, %c0_146] : memref<8x2x32xf32, #tpu.memory_space<vmem>>, vector<1x2x32xf32>
    %300 = vector.shape_cast %299 : vector<1x2x32xf32> to vector<2x32xf32>
    %301 = vector.broadcast %15 : vector<1x32xf32> to vector<2x32xf32>
    %302 = arith.addf %279, %301 : vector<2x32xf32>
    %303 = arith.mulf %288, %302 : vector<2x32xf32>
    %304 = arith.addf %300, %303 : vector<2x32xf32>
    %305 = math.tanh %304 : vector<2x32xf32>
    %cst_147 = arith.constant 1.000000e+00 : f32
    %306 = vector.broadcast %cst_147 : f32 to vector<2x32xf32>
    %307 = arith.subf %306, %297 : vector<2x32xf32>
    %308 = arith.mulf %307, %305 : vector<2x32xf32>
    %309 = arith.mulf %297, %270 : vector<2x32xf32>
    %310 = arith.addf %308, %309 : vector<2x32xf32>
    %311 = arith.index_cast %c5_i32 : i32 to index
    %c0_148 = arith.constant 0 : index
    %c0_149 = arith.constant 0 : index
    %312 = vector.load %arg15[%311, %c0_148, %c0_149] : memref<8x2x32xf32, #tpu.memory_space<vmem>>, vector<1x2x32xf32>
    %313 = vector.shape_cast %312 : vector<1x2x32xf32> to vector<2x32xf32>
    %314 = arith.subf %310, %270 : vector<2x32xf32>
    %315 = arith.mulf %313, %314 : vector<2x32xf32>
    %316 = arith.addf %270, %315 : vector<2x32xf32>
    %317 = arith.truncf %316 : vector<2x32xf32> to vector<2x32xbf16>
    %318 = arith.index_cast %c5_i32 : i32 to index
    %c0_150 = arith.constant 0 : index
    %c0_151 = arith.constant 0 : index
    %319 = vector.load %arg11[%318, %c0_150, %c0_151] : memref<8x2x32xbf16, #tpu.memory_space<vmem>>, vector<1x2x32xbf16>
    %320 = vector.shape_cast %319 : vector<1x2x32xbf16> to vector<2x32xbf16>
    %321 = vector.shape_cast %317 : vector<2x32xbf16> to vector<1x2x32xbf16>
    tpu.vector_store %arg11[%318, %c0_150, %c0_151], %321 {strides = array<i32>} : memref<8x2x32xbf16, #tpu.memory_space<vmem>>, vector<1x2x32xbf16>,
    %c6_i32 = arith.constant 6 : i32
    %322 = arith.truncf %316 : vector<2x32xf32> to vector<2x32xbf16>
    %cst_152 = arith.constant dense<0.000000e+00> : vector<2x32xf32>
    %323 = tpu.matmul %322, %9, %cst_152 {dimension_numbers = #tpu.dot_dimension_numbers<[1], [0], [0], [1], [0, 0, 1, 1], [], []>} : vector<2x32xbf16>, vector<32x32xbf16>, vector<2x32xf32> -> vector<2x32xf32>
    %cst_153 = arith.constant dense<0.000000e+00> : vector<2x32xf32>
    %324 = tpu.matmul %322, %11, %cst_153 {dimension_numbers = #tpu.dot_dimension_numbers<[1], [0], [0], [1], [0, 0, 1, 1], [], []>} : vector<2x32xbf16>, vector<32x32xbf16>, vector<2x32xf32> -> vector<2x32xf32>
    %cst_154 = arith.constant dense<0.000000e+00> : vector<2x32xf32>
    %325 = tpu.matmul %322, %13, %cst_154 {dimension_numbers = #tpu.dot_dimension_numbers<[1], [0], [0], [1], [0, 0, 1, 1], [], []>} : vector<2x32xbf16>, vector<32x32xbf16>, vector<2x32xf32> -> vector<2x32xf32>
    %326 = arith.index_cast %c6_i32 : i32 to index
    %c0_155 = arith.constant 0 : index
    %c0_156 = arith.constant 0 : index
    %327 = vector.load %arg12[%326, %c0_155, %c0_156] : memref<8x2x32xf32, #tpu.memory_space<vmem>>, vector<1x2x32xf32>
    %328 = vector.shape_cast %327 : vector<1x2x32xf32> to vector<2x32xf32>
    %329 = arith.addf %328, %323 : vector<2x32xf32>
    %330 = arith.negf %329 : vector<2x32xf32>
    %331 = math.exp %330 : vector<2x32xf32>
    %cst_157 = arith.constant 1.000000e+00 : f32
    %332 = vector.broadcast %cst_157 : f32 to vector<2x32xf32>
    %333 = arith.addf %332, %331 : vector<2x32xf32>
    %334 = arith.divf %332, %333 : vector<2x32xf32>
    %335 = arith.index_cast %c6_i32 : i32 to index
    %c0_158 = arith.constant 0 : index
    %c0_159 = arith.constant 0 : index
    %336 = vector.load %arg13[%335, %c0_158, %c0_159] : memref<8x2x32xf32, #tpu.memory_space<vmem>>, vector<1x2x32xf32>
    %337 = vector.shape_cast %336 : vector<1x2x32xf32> to vector<2x32xf32>
    %338 = arith.addf %337, %324 : vector<2x32xf32>
    %339 = arith.negf %338 : vector<2x32xf32>
    %340 = math.exp %339 : vector<2x32xf32>
    %cst_160 = arith.constant 1.000000e+00 : f32
    %341 = vector.broadcast %cst_160 : f32 to vector<2x32xf32>
    %342 = arith.addf %341, %340 : vector<2x32xf32>
    %343 = arith.divf %341, %342 : vector<2x32xf32>
    %344 = arith.index_cast %c6_i32 : i32 to index
    %c0_161 = arith.constant 0 : index
    %c0_162 = arith.constant 0 : index
    %345 = vector.load %arg14[%344, %c0_161, %c0_162] : memref<8x2x32xf32, #tpu.memory_space<vmem>>, vector<1x2x32xf32>
    %346 = vector.shape_cast %345 : vector<1x2x32xf32> to vector<2x32xf32>
    %347 = vector.broadcast %15 : vector<1x32xf32> to vector<2x32xf32>
    %348 = arith.addf %325, %347 : vector<2x32xf32>
    %349 = arith.mulf %334, %348 : vector<2x32xf32>
    %350 = arith.addf %346, %349 : vector<2x32xf32>
    %351 = math.tanh %350 : vector<2x32xf32>
    %cst_163 = arith.constant 1.000000e+00 : f32
    %352 = vector.broadcast %cst_163 : f32 to vector<2x32xf32>
    %353 = arith.subf %352, %343 : vector<2x32xf32>
    %354 = arith.mulf %353, %351 : vector<2x32xf32>
    %355 = arith.mulf %343, %316 : vector<2x32xf32>
    %356 = arith.addf %354, %355 : vector<2x32xf32>
    %357 = arith.index_cast %c6_i32 : i32 to index
    %c0_164 = arith.constant 0 : index
    %c0_165 = arith.constant 0 : index
    %358 = vector.load %arg15[%357, %c0_164, %c0_165] : memref<8x2x32xf32, #tpu.memory_space<vmem>>, vector<1x2x32xf32>
    %359 = vector.shape_cast %358 : vector<1x2x32xf32> to vector<2x32xf32>
    %360 = arith.subf %356, %316 : vector<2x32xf32>
    %361 = arith.mulf %359, %360 : vector<2x32xf32>
    %362 = arith.addf %316, %361 : vector<2x32xf32>
    %363 = arith.truncf %362 : vector<2x32xf32> to vector<2x32xbf16>
    %364 = arith.index_cast %c6_i32 : i32 to index
    %c0_166 = arith.constant 0 : index
    %c0_167 = arith.constant 0 : index
    %365 = vector.load %arg11[%364, %c0_166, %c0_167] : memref<8x2x32xbf16, #tpu.memory_space<vmem>>, vector<1x2x32xbf16>
    %366 = vector.shape_cast %365 : vector<1x2x32xbf16> to vector<2x32xbf16>
    %367 = vector.shape_cast %363 : vector<2x32xbf16> to vector<1x2x32xbf16>
    tpu.vector_store %arg11[%364, %c0_166, %c0_167], %367 {strides = array<i32>} : memref<8x2x32xbf16, #tpu.memory_space<vmem>>, vector<1x2x32xbf16>,
    %c7_i32 = arith.constant 7 : i32
    %368 = arith.truncf %362 : vector<2x32xf32> to vector<2x32xbf16>
    %cst_168 = arith.constant dense<0.000000e+00> : vector<2x32xf32>
    %369 = tpu.matmul %368, %9, %cst_168 {dimension_numbers = #tpu.dot_dimension_numbers<[1], [0], [0], [1], [0, 0, 1, 1], [], []>} : vector<2x32xbf16>, vector<32x32xbf16>, vector<2x32xf32> -> vector<2x32xf32>
    %cst_169 = arith.constant dense<0.000000e+00> : vector<2x32xf32>
    %370 = tpu.matmul %368, %11, %cst_169 {dimension_numbers = #tpu.dot_dimension_numbers<[1], [0], [0], [1], [0, 0, 1, 1], [], []>} : vector<2x32xbf16>, vector<32x32xbf16>, vector<2x32xf32> -> vector<2x32xf32>
    %cst_170 = arith.constant dense<0.000000e+00> : vector<2x32xf32>
    %371 = tpu.matmul %368, %13, %cst_170 {dimension_numbers = #tpu.dot_dimension_numbers<[1], [0], [0], [1], [0, 0, 1, 1], [], []>} : vector<2x32xbf16>, vector<32x32xbf16>, vector<2x32xf32> -> vector<2x32xf32>
    %372 = arith.index_cast %c7_i32 : i32 to index
    %c0_171 = arith.constant 0 : index
    %c0_172 = arith.constant 0 : index
    %373 = vector.load %arg12[%372, %c0_171, %c0_172] : memref<8x2x32xf32, #tpu.memory_space<vmem>>, vector<1x2x32xf32>
    %374 = vector.shape_cast %373 : vector<1x2x32xf32> to vector<2x32xf32>
    %375 = arith.addf %374, %369 : vector<2x32xf32>
    %376 = arith.negf %375 : vector<2x32xf32>
    %377 = math.exp %376 : vector<2x32xf32>
    %cst_173 = arith.constant 1.000000e+00 : f32
    %378 = vector.broadcast %cst_173 : f32 to vector<2x32xf32>
    %379 = arith.addf %378, %377 : vector<2x32xf32>
    %380 = arith.divf %378, %379 : vector<2x32xf32>
    %381 = arith.index_cast %c7_i32 : i32 to index
    %c0_174 = arith.constant 0 : index
    %c0_175 = arith.constant 0 : index
    %382 = vector.load %arg13[%381, %c0_174, %c0_175] : memref<8x2x32xf32, #tpu.memory_space<vmem>>, vector<1x2x32xf32>
    %383 = vector.shape_cast %382 : vector<1x2x32xf32> to vector<2x32xf32>
    %384 = arith.addf %383, %370 : vector<2x32xf32>
    %385 = arith.negf %384 : vector<2x32xf32>
    %386 = math.exp %385 : vector<2x32xf32>
    %cst_176 = arith.constant 1.000000e+00 : f32
    %387 = vector.broadcast %cst_176 : f32 to vector<2x32xf32>
    %388 = arith.addf %387, %386 : vector<2x32xf32>
    %389 = arith.divf %387, %388 : vector<2x32xf32>
    %390 = arith.index_cast %c7_i32 : i32 to index
    %c0_177 = arith.constant 0 : index
    %c0_178 = arith.constant 0 : index
    %391 = vector.load %arg14[%390, %c0_177, %c0_178] : memref<8x2x32xf32, #tpu.memory_space<vmem>>, vector<1x2x32xf32>
    %392 = vector.shape_cast %391 : vector<1x2x32xf32> to vector<2x32xf32>
    %393 = vector.broadcast %15 : vector<1x32xf32> to vector<2x32xf32>
    %394 = arith.addf %371, %393 : vector<2x32xf32>
    %395 = arith.mulf %380, %394 : vector<2x32xf32>
    %396 = arith.addf %392, %395 : vector<2x32xf32>
    %397 = math.tanh %396 : vector<2x32xf32>
    %cst_179 = arith.constant 1.000000e+00 : f32
    %398 = vector.broadcast %cst_179 : f32 to vector<2x32xf32>
    %399 = arith.subf %398, %389 : vector<2x32xf32>
    %400 = arith.mulf %399, %397 : vector<2x32xf32>
    %401 = arith.mulf %389, %362 : vector<2x32xf32>
    %402 = arith.addf %400, %401 : vector<2x32xf32>
    %403 = arith.index_cast %c7_i32 : i32 to index
    %c0_180 = arith.constant 0 : index
    %c0_181 = arith.constant 0 : index
    %404 = vector.load %arg15[%403, %c0_180, %c0_181] : memref<8x2x32xf32, #tpu.memory_space<vmem>>, vector<1x2x32xf32>
    %405 = vector.shape_cast %404 : vector<1x2x32xf32> to vector<2x32xf32>
    %406 = arith.subf %402, %362 : vector<2x32xf32>
    %407 = arith.mulf %405, %406 : vector<2x32xf32>
    %408 = arith.addf %362, %407 : vector<2x32xf32>
    %409 = arith.truncf %408 : vector<2x32xf32> to vector<2x32xbf16>
    %410 = arith.index_cast %c7_i32 : i32 to index
    %c0_182 = arith.constant 0 : index
    %c0_183 = arith.constant 0 : index
    %411 = vector.load %arg11[%410, %c0_182, %c0_183] : memref<8x2x32xbf16, #tpu.memory_space<vmem>>, vector<1x2x32xbf16>
    %412 = vector.shape_cast %411 : vector<1x2x32xbf16> to vector<2x32xbf16>
    %413 = vector.shape_cast %409 : vector<2x32xbf16> to vector<1x2x32xbf16>
    tpu.vector_store %arg11[%410, %c0_182, %c0_183], %413 {strides = array<i32>} : memref<8x2x32xbf16, #tpu.memory_space<vmem>>, vector<1x2x32xbf16>,
    %c8_i32 = arith.constant 8 : i32
    %c1_184 = arith.constant 1 : index
    %c0_185 = arith.constant 0 : index
    %c0_186 = arith.constant 0 : index
    %c0_187 = arith.constant 0 : index
    %414 = vector.load %arg4[%c1_184, %c0_185, %c0_186, %c0_187] : memref<2x3x32x32xbf16, #tpu.memory_space<vmem>>, vector<1x1x32x32xbf16>
    %415 = vector.shape_cast %414 : vector<1x1x32x32xbf16> to vector<32x32xbf16>
    %c1_188 = arith.constant 1 : index
    %c1_189 = arith.constant 1 : index
    %c0_190 = arith.constant 0 : index
    %c0_191 = arith.constant 0 : index
    %416 = vector.load %arg4[%c1_188, %c1_189, %c0_190, %c0_191] : memref<2x3x32x32xbf16, #tpu.memory_space<vmem>>, vector<1x1x32x32xbf16>
    %417 = vector.shape_cast %416 : vector<1x1x32x32xbf16> to vector<32x32xbf16>
    %c1_192 = arith.constant 1 : index
    %c2_193 = arith.constant 2 : index
    %c0_194 = arith.constant 0 : index
    %c0_195 = arith.constant 0 : index
    %418 = vector.load %arg4[%c1_192, %c2_193, %c0_194, %c0_195] : memref<2x3x32x32xbf16, #tpu.memory_space<vmem>>, vector<1x1x32x32xbf16>
    %419 = vector.shape_cast %418 : vector<1x1x32x32xbf16> to vector<32x32xbf16>
    %c1_196 = arith.constant 1 : index
    %c0_197 = arith.constant 0 : index
    %c0_198 = arith.constant 0 : index
    %420 = vector.load %arg6[%c1_196, %c0_197, %c0_198] : memref<2x1x32xf32, #tpu.memory_space<vmem>>, vector<1x1x32xf32>
    %421 = vector.shape_cast %420 : vector<1x1x32xf32> to vector<1x32xf32>
    %c0_199 = arith.constant 0 : index
    %c0_200 = arith.constant 0 : index
    %c0_201 = arith.constant 0 : index
    %422 = vector.load %arg11[%c0_199, %c0_200, %c0_201] : memref<8x2x32xbf16, #tpu.memory_space<vmem>>, vector<8x2x32xbf16>
    %423 = vector.shape_cast %422 : vector<8x2x32xbf16> to vector<16x32xbf16>
    %c1_202 = arith.constant 1 : index
    %c0_203 = arith.constant 0 : index
    %c0_204 = arith.constant 0 : index
    %c0_205 = arith.constant 0 : index
    %424 = vector.load %arg3[%c1_202, %c0_203, %c0_204, %c0_205] : memref<2x3x32x32xbf16, #tpu.memory_space<vmem>>, vector<1x1x32x32xbf16>
    %425 = vector.shape_cast %424 : vector<1x1x32x32xbf16> to vector<32x32xbf16>
    %cst_206 = arith.constant dense<0.000000e+00> : vector<16x32xf32>
    %426 = tpu.matmul %423, %425, %cst_206 {dimension_numbers = #tpu.dot_dimension_numbers<[1], [0], [0], [1], [0, 0, 1, 1], [], []>} : vector<16x32xbf16>, vector<32x32xbf16>, vector<16x32xf32> -> vector<16x32xf32>
    %c1_207 = arith.constant 1 : index
    %c0_208 = arith.constant 0 : index
    %c0_209 = arith.constant 0 : index
    %c0_210 = arith.constant 0 : index
    %427 = vector.load %arg5[%c1_207, %c0_208, %c0_209, %c0_210] : memref<2x3x1x32xf32, #tpu.memory_space<vmem>>, vector<1x1x1x32xf32>
    %428 = vector.shape_cast %427 : vector<1x1x1x32xf32> to vector<1x32xf32>
    %429 = vector.broadcast %428 : vector<1x32xf32> to vector<16x32xf32>
    %430 = arith.addf %426, %429 : vector<16x32xf32>
    %431 = vector.shape_cast %430 : vector<16x32xf32> to vector<8x2x32xf32>
    %c0_211 = arith.constant 0 : index
    %c0_212 = arith.constant 0 : index
    %c0_213 = arith.constant 0 : index
    %432 = vector.load %arg12[%c0_211, %c0_212, %c0_213] : memref<8x2x32xf32, #tpu.memory_space<vmem>>, vector<8x2x32xf32>
    tpu.vector_store %arg12[%c0_211, %c0_212, %c0_213], %431 {strides = array<i32>} : memref<8x2x32xf32, #tpu.memory_space<vmem>>, vector<8x2x32xf32>,
    %c1_214 = arith.constant 1 : index
    %c1_215 = arith.constant 1 : index
    %c0_216 = arith.constant 0 : index
    %c0_217 = arith.constant 0 : index
    %433 = vector.load %arg3[%c1_214, %c1_215, %c0_216, %c0_217] : memref<2x3x32x32xbf16, #tpu.memory_space<vmem>>, vector<1x1x32x32xbf16>
    %434 = vector.shape_cast %433 : vector<1x1x32x32xbf16> to vector<32x32xbf16>
    %cst_218 = arith.constant dense<0.000000e+00> : vector<16x32xf32>
    %435 = tpu.matmul %423, %434, %cst_218 {dimension_numbers = #tpu.dot_dimension_numbers<[1], [0], [0], [1], [0, 0, 1, 1], [], []>} : vector<16x32xbf16>, vector<32x32xbf16>, vector<16x32xf32> -> vector<16x32xf32>
    %c1_219 = arith.constant 1 : index
    %c1_220 = arith.constant 1 : index
    %c0_221 = arith.constant 0 : index
    %c0_222 = arith.constant 0 : index
    %436 = vector.load %arg5[%c1_219, %c1_220, %c0_221, %c0_222] : memref<2x3x1x32xf32, #tpu.memory_space<vmem>>, vector<1x1x1x32xf32>
    %437 = vector.shape_cast %436 : vector<1x1x1x32xf32> to vector<1x32xf32>
    %438 = vector.broadcast %437 : vector<1x32xf32> to vector<16x32xf32>
    %439 = arith.addf %435, %438 : vector<16x32xf32>
    %440 = vector.shape_cast %439 : vector<16x32xf32> to vector<8x2x32xf32>
    %c0_223 = arith.constant 0 : index
    %c0_224 = arith.constant 0 : index
    %c0_225 = arith.constant 0 : index
    %441 = vector.load %arg13[%c0_223, %c0_224, %c0_225] : memref<8x2x32xf32, #tpu.memory_space<vmem>>, vector<8x2x32xf32>
    tpu.vector_store %arg13[%c0_223, %c0_224, %c0_225], %440 {strides = array<i32>} : memref<8x2x32xf32, #tpu.memory_space<vmem>>, vector<8x2x32xf32>,
    %c1_226 = arith.constant 1 : index
    %c2_227 = arith.constant 2 : index
    %c0_228 = arith.constant 0 : index
    %c0_229 = arith.constant 0 : index
    %442 = vector.load %arg3[%c1_226, %c2_227, %c0_228, %c0_229] : memref<2x3x32x32xbf16, #tpu.memory_space<vmem>>, vector<1x1x32x32xbf16>
    %443 = vector.shape_cast %442 : vector<1x1x32x32xbf16> to vector<32x32xbf16>
    %cst_230 = arith.constant dense<0.000000e+00> : vector<16x32xf32>
    %444 = tpu.matmul %423, %443, %cst_230 {dimension_numbers = #tpu.dot_dimension_numbers<[1], [0], [0], [1], [0, 0, 1, 1], [], []>} : vector<16x32xbf16>, vector<32x32xbf16>, vector<16x32xf32> -> vector<16x32xf32>
    %c1_231 = arith.constant 1 : index
    %c2_232 = arith.constant 2 : index
    %c0_233 = arith.constant 0 : index
    %c0_234 = arith.constant 0 : index
    %445 = vector.load %arg5[%c1_231, %c2_232, %c0_233, %c0_234] : memref<2x3x1x32xf32, #tpu.memory_space<vmem>>, vector<1x1x1x32xf32>
    %446 = vector.shape_cast %445 : vector<1x1x1x32xf32> to vector<1x32xf32>
    %447 = vector.broadcast %446 : vector<1x32xf32> to vector<16x32xf32>
    %448 = arith.addf %444, %447 : vector<16x32xf32>
    %449 = vector.shape_cast %448 : vector<16x32xf32> to vector<8x2x32xf32>
    %c0_235 = arith.constant 0 : index
    %c0_236 = arith.constant 0 : index
    %c0_237 = arith.constant 0 : index
    %450 = vector.load %arg14[%c0_235, %c0_236, %c0_237] : memref<8x2x32xf32, #tpu.memory_space<vmem>>, vector<8x2x32xf32>
    tpu.vector_store %arg14[%c0_235, %c0_236, %c0_237], %449 {strides = array<i32>} : memref<8x2x32xf32, #tpu.memory_space<vmem>>, vector<8x2x32xf32>,
    %cst_238 = arith.constant 0.000000e+00 : f32
    %451 = vector.broadcast %cst_238 : f32 to vector<2x32xf32>
    %c0_i32_239 = arith.constant 0 : i32
    %452 = arith.truncf %451 : vector<2x32xf32> to vector<2x32xbf16>
    %cst_240 = arith.constant dense<0.000000e+00> : vector<2x32xf32>
    %453 = tpu.matmul %452, %415, %cst_240 {dimension_numbers = #tpu.dot_dimension_numbers<[1], [0], [0], [1], [0, 0, 1, 1], [], []>} : vector<2x32xbf16>, vector<32x32xbf16>, vector<2x32xf32> -> vector<2x32xf32>
    %cst_241 = arith.constant dense<0.000000e+00> : vector<2x32xf32>
    %454 = tpu.matmul %452, %417, %cst_241 {dimension_numbers = #tpu.dot_dimension_numbers<[1], [0], [0], [1], [0, 0, 1, 1], [], []>} : vector<2x32xbf16>, vector<32x32xbf16>, vector<2x32xf32> -> vector<2x32xf32>
    %cst_242 = arith.constant dense<0.000000e+00> : vector<2x32xf32>
    %455 = tpu.matmul %452, %419, %cst_242 {dimension_numbers = #tpu.dot_dimension_numbers<[1], [0], [0], [1], [0, 0, 1, 1], [], []>} : vector<2x32xbf16>, vector<32x32xbf16>, vector<2x32xf32> -> vector<2x32xf32>
    %456 = arith.index_cast %c0_i32_239 : i32 to index
    %c0_243 = arith.constant 0 : index
    %c0_244 = arith.constant 0 : index
    %457 = vector.load %arg12[%456, %c0_243, %c0_244] : memref<8x2x32xf32, #tpu.memory_space<vmem>>, vector<1x2x32xf32>
    %458 = vector.shape_cast %457 : vector<1x2x32xf32> to vector<2x32xf32>
    %459 = arith.addf %458, %453 : vector<2x32xf32>
    %460 = arith.negf %459 : vector<2x32xf32>
    %461 = math.exp %460 : vector<2x32xf32>
    %cst_245 = arith.constant 1.000000e+00 : f32
    %462 = vector.broadcast %cst_245 : f32 to vector<2x32xf32>
    %463 = arith.addf %462, %461 : vector<2x32xf32>
    %464 = arith.divf %462, %463 : vector<2x32xf32>
    %465 = arith.index_cast %c0_i32_239 : i32 to index
    %c0_246 = arith.constant 0 : index
    %c0_247 = arith.constant 0 : index
    %466 = vector.load %arg13[%465, %c0_246, %c0_247] : memref<8x2x32xf32, #tpu.memory_space<vmem>>, vector<1x2x32xf32>
    %467 = vector.shape_cast %466 : vector<1x2x32xf32> to vector<2x32xf32>
    %468 = arith.addf %467, %454 : vector<2x32xf32>
    %469 = arith.negf %468 : vector<2x32xf32>
    %470 = math.exp %469 : vector<2x32xf32>
    %cst_248 = arith.constant 1.000000e+00 : f32
    %471 = vector.broadcast %cst_248 : f32 to vector<2x32xf32>
    %472 = arith.addf %471, %470 : vector<2x32xf32>
    %473 = arith.divf %471, %472 : vector<2x32xf32>
    %474 = arith.index_cast %c0_i32_239 : i32 to index
    %c0_249 = arith.constant 0 : index
    %c0_250 = arith.constant 0 : index
    %475 = vector.load %arg14[%474, %c0_249, %c0_250] : memref<8x2x32xf32, #tpu.memory_space<vmem>>, vector<1x2x32xf32>
    %476 = vector.shape_cast %475 : vector<1x2x32xf32> to vector<2x32xf32>
    %477 = vector.broadcast %421 : vector<1x32xf32> to vector<2x32xf32>
    %478 = arith.addf %455, %477 : vector<2x32xf32>
    %479 = arith.mulf %464, %478 : vector<2x32xf32>
    %480 = arith.addf %476, %479 : vector<2x32xf32>
    %481 = math.tanh %480 : vector<2x32xf32>
    %cst_251 = arith.constant 1.000000e+00 : f32
    %482 = vector.broadcast %cst_251 : f32 to vector<2x32xf32>
    %483 = arith.subf %482, %473 : vector<2x32xf32>
    %484 = arith.mulf %483, %481 : vector<2x32xf32>
    %485 = arith.mulf %473, %451 : vector<2x32xf32>
    %486 = arith.addf %484, %485 : vector<2x32xf32>
    %487 = arith.index_cast %c0_i32_239 : i32 to index
    %c0_252 = arith.constant 0 : index
    %c0_253 = arith.constant 0 : index
    %488 = vector.load %arg15[%487, %c0_252, %c0_253] : memref<8x2x32xf32, #tpu.memory_space<vmem>>, vector<1x2x32xf32>
    %489 = vector.shape_cast %488 : vector<1x2x32xf32> to vector<2x32xf32>
    %490 = arith.subf %486, %451 : vector<2x32xf32>
    %491 = arith.mulf %489, %490 : vector<2x32xf32>
    %492 = arith.addf %451, %491 : vector<2x32xf32>
    %493 = arith.truncf %492 : vector<2x32xf32> to vector<2x32xbf16>
    %494 = arith.index_cast %c0_i32_239 : i32 to index
    %c0_254 = arith.constant 0 : index
    %c0_255 = arith.constant 0 : index
    %495 = vector.load %arg11[%494, %c0_254, %c0_255] : memref<8x2x32xbf16, #tpu.memory_space<vmem>>, vector<1x2x32xbf16>
    %496 = vector.shape_cast %495 : vector<1x2x32xbf16> to vector<2x32xbf16>
    %497 = vector.shape_cast %493 : vector<2x32xbf16> to vector<1x2x32xbf16>
    tpu.vector_store %arg11[%494, %c0_254, %c0_255], %497 {strides = array<i32>} : memref<8x2x32xbf16, #tpu.memory_space<vmem>>, vector<1x2x32xbf16>,
    %c1_i32_256 = arith.constant 1 : i32
    %498 = arith.truncf %492 : vector<2x32xf32> to vector<2x32xbf16>
    %cst_257 = arith.constant dense<0.000000e+00> : vector<2x32xf32>
    %499 = tpu.matmul %498, %415, %cst_257 {dimension_numbers = #tpu.dot_dimension_numbers<[1], [0], [0], [1], [0, 0, 1, 1], [], []>} : vector<2x32xbf16>, vector<32x32xbf16>, vector<2x32xf32> -> vector<2x32xf32>
    %cst_258 = arith.constant dense<0.000000e+00> : vector<2x32xf32>
    %500 = tpu.matmul %498, %417, %cst_258 {dimension_numbers = #tpu.dot_dimension_numbers<[1], [0], [0], [1], [0, 0, 1, 1], [], []>} : vector<2x32xbf16>, vector<32x32xbf16>, vector<2x32xf32> -> vector<2x32xf32>
    %cst_259 = arith.constant dense<0.000000e+00> : vector<2x32xf32>
    %501 = tpu.matmul %498, %419, %cst_259 {dimension_numbers = #tpu.dot_dimension_numbers<[1], [0], [0], [1], [0, 0, 1, 1], [], []>} : vector<2x32xbf16>, vector<32x32xbf16>, vector<2x32xf32> -> vector<2x32xf32>
    %502 = arith.index_cast %c1_i32_256 : i32 to index
    %c0_260 = arith.constant 0 : index
    %c0_261 = arith.constant 0 : index
    %503 = vector.load %arg12[%502, %c0_260, %c0_261] : memref<8x2x32xf32, #tpu.memory_space<vmem>>, vector<1x2x32xf32>
    %504 = vector.shape_cast %503 : vector<1x2x32xf32> to vector<2x32xf32>
    %505 = arith.addf %504, %499 : vector<2x32xf32>
    %506 = arith.negf %505 : vector<2x32xf32>
    %507 = math.exp %506 : vector<2x32xf32>
    %cst_262 = arith.constant 1.000000e+00 : f32
    %508 = vector.broadcast %cst_262 : f32 to vector<2x32xf32>
    %509 = arith.addf %508, %507 : vector<2x32xf32>
    %510 = arith.divf %508, %509 : vector<2x32xf32>
    %511 = arith.index_cast %c1_i32_256 : i32 to index
    %c0_263 = arith.constant 0 : index
    %c0_264 = arith.constant 0 : index
    %512 = vector.load %arg13[%511, %c0_263, %c0_264] : memref<8x2x32xf32, #tpu.memory_space<vmem>>, vector<1x2x32xf32>
    %513 = vector.shape_cast %512 : vector<1x2x32xf32> to vector<2x32xf32>
    %514 = arith.addf %513, %500 : vector<2x32xf32>
    %515 = arith.negf %514 : vector<2x32xf32>
    %516 = math.exp %515 : vector<2x32xf32>
    %cst_265 = arith.constant 1.000000e+00 : f32
    %517 = vector.broadcast %cst_265 : f32 to vector<2x32xf32>
    %518 = arith.addf %517, %516 : vector<2x32xf32>
    %519 = arith.divf %517, %518 : vector<2x32xf32>
    %520 = arith.index_cast %c1_i32_256 : i32 to index
    %c0_266 = arith.constant 0 : index
    %c0_267 = arith.constant 0 : index
    %521 = vector.load %arg14[%520, %c0_266, %c0_267] : memref<8x2x32xf32, #tpu.memory_space<vmem>>, vector<1x2x32xf32>
    %522 = vector.shape_cast %521 : vector<1x2x32xf32> to vector<2x32xf32>
    %523 = vector.broadcast %421 : vector<1x32xf32> to vector<2x32xf32>
    %524 = arith.addf %501, %523 : vector<2x32xf32>
    %525 = arith.mulf %510, %524 : vector<2x32xf32>
    %526 = arith.addf %522, %525 : vector<2x32xf32>
    %527 = math.tanh %526 : vector<2x32xf32>
    %cst_268 = arith.constant 1.000000e+00 : f32
    %528 = vector.broadcast %cst_268 : f32 to vector<2x32xf32>
    %529 = arith.subf %528, %519 : vector<2x32xf32>
    %530 = arith.mulf %529, %527 : vector<2x32xf32>
    %531 = arith.mulf %519, %492 : vector<2x32xf32>
    %532 = arith.addf %530, %531 : vector<2x32xf32>
    %533 = arith.index_cast %c1_i32_256 : i32 to index
    %c0_269 = arith.constant 0 : index
    %c0_270 = arith.constant 0 : index
    %534 = vector.load %arg15[%533, %c0_269, %c0_270] : memref<8x2x32xf32, #tpu.memory_space<vmem>>, vector<1x2x32xf32>
    %535 = vector.shape_cast %534 : vector<1x2x32xf32> to vector<2x32xf32>
    %536 = arith.subf %532, %492 : vector<2x32xf32>
    %537 = arith.mulf %535, %536 : vector<2x32xf32>
    %538 = arith.addf %492, %537 : vector<2x32xf32>
    %539 = arith.truncf %538 : vector<2x32xf32> to vector<2x32xbf16>
    %540 = arith.index_cast %c1_i32_256 : i32 to index
    %c0_271 = arith.constant 0 : index
    %c0_272 = arith.constant 0 : index
    %541 = vector.load %arg11[%540, %c0_271, %c0_272] : memref<8x2x32xbf16, #tpu.memory_space<vmem>>, vector<1x2x32xbf16>
    %542 = vector.shape_cast %541 : vector<1x2x32xbf16> to vector<2x32xbf16>
    %543 = vector.shape_cast %539 : vector<2x32xbf16> to vector<1x2x32xbf16>
    tpu.vector_store %arg11[%540, %c0_271, %c0_272], %543 {strides = array<i32>} : memref<8x2x32xbf16, #tpu.memory_space<vmem>>, vector<1x2x32xbf16>,
    %c2_i32_273 = arith.constant 2 : i32
    %544 = arith.truncf %538 : vector<2x32xf32> to vector<2x32xbf16>
    %cst_274 = arith.constant dense<0.000000e+00> : vector<2x32xf32>
    %545 = tpu.matmul %544, %415, %cst_274 {dimension_numbers = #tpu.dot_dimension_numbers<[1], [0], [0], [1], [0, 0, 1, 1], [], []>} : vector<2x32xbf16>, vector<32x32xbf16>, vector<2x32xf32> -> vector<2x32xf32>
    %cst_275 = arith.constant dense<0.000000e+00> : vector<2x32xf32>
    %546 = tpu.matmul %544, %417, %cst_275 {dimension_numbers = #tpu.dot_dimension_numbers<[1], [0], [0], [1], [0, 0, 1, 1], [], []>} : vector<2x32xbf16>, vector<32x32xbf16>, vector<2x32xf32> -> vector<2x32xf32>
    %cst_276 = arith.constant dense<0.000000e+00> : vector<2x32xf32>
    %547 = tpu.matmul %544, %419, %cst_276 {dimension_numbers = #tpu.dot_dimension_numbers<[1], [0], [0], [1], [0, 0, 1, 1], [], []>} : vector<2x32xbf16>, vector<32x32xbf16>, vector<2x32xf32> -> vector<2x32xf32>
    %548 = arith.index_cast %c2_i32_273 : i32 to index
    %c0_277 = arith.constant 0 : index
    %c0_278 = arith.constant 0 : index
    %549 = vector.load %arg12[%548, %c0_277, %c0_278] : memref<8x2x32xf32, #tpu.memory_space<vmem>>, vector<1x2x32xf32>
    %550 = vector.shape_cast %549 : vector<1x2x32xf32> to vector<2x32xf32>
    %551 = arith.addf %550, %545 : vector<2x32xf32>
    %552 = arith.negf %551 : vector<2x32xf32>
    %553 = math.exp %552 : vector<2x32xf32>
    %cst_279 = arith.constant 1.000000e+00 : f32
    %554 = vector.broadcast %cst_279 : f32 to vector<2x32xf32>
    %555 = arith.addf %554, %553 : vector<2x32xf32>
    %556 = arith.divf %554, %555 : vector<2x32xf32>
    %557 = arith.index_cast %c2_i32_273 : i32 to index
    %c0_280 = arith.constant 0 : index
    %c0_281 = arith.constant 0 : index
    %558 = vector.load %arg13[%557, %c0_280, %c0_281] : memref<8x2x32xf32, #tpu.memory_space<vmem>>, vector<1x2x32xf32>
    %559 = vector.shape_cast %558 : vector<1x2x32xf32> to vector<2x32xf32>
    %560 = arith.addf %559, %546 : vector<2x32xf32>
    %561 = arith.negf %560 : vector<2x32xf32>
    %562 = math.exp %561 : vector<2x32xf32>
    %cst_282 = arith.constant 1.000000e+00 : f32
    %563 = vector.broadcast %cst_282 : f32 to vector<2x32xf32>
    %564 = arith.addf %563, %562 : vector<2x32xf32>
    %565 = arith.divf %563, %564 : vector<2x32xf32>
    %566 = arith.index_cast %c2_i32_273 : i32 to index
    %c0_283 = arith.constant 0 : index
    %c0_284 = arith.constant 0 : index
    %567 = vector.load %arg14[%566, %c0_283, %c0_284] : memref<8x2x32xf32, #tpu.memory_space<vmem>>, vector<1x2x32xf32>
    %568 = vector.shape_cast %567 : vector<1x2x32xf32> to vector<2x32xf32>
    %569 = vector.broadcast %421 : vector<1x32xf32> to vector<2x32xf32>
    %570 = arith.addf %547, %569 : vector<2x32xf32>
    %571 = arith.mulf %556, %570 : vector<2x32xf32>
    %572 = arith.addf %568, %571 : vector<2x32xf32>
    %573 = math.tanh %572 : vector<2x32xf32>
    %cst_285 = arith.constant 1.000000e+00 : f32
    %574 = vector.broadcast %cst_285 : f32 to vector<2x32xf32>
    %575 = arith.subf %574, %565 : vector<2x32xf32>
    %576 = arith.mulf %575, %573 : vector<2x32xf32>
    %577 = arith.mulf %565, %538 : vector<2x32xf32>
    %578 = arith.addf %576, %577 : vector<2x32xf32>
    %579 = arith.index_cast %c2_i32_273 : i32 to index
    %c0_286 = arith.constant 0 : index
    %c0_287 = arith.constant 0 : index
    %580 = vector.load %arg15[%579, %c0_286, %c0_287] : memref<8x2x32xf32, #tpu.memory_space<vmem>>, vector<1x2x32xf32>
    %581 = vector.shape_cast %580 : vector<1x2x32xf32> to vector<2x32xf32>
    %582 = arith.subf %578, %538 : vector<2x32xf32>
    %583 = arith.mulf %581, %582 : vector<2x32xf32>
    %584 = arith.addf %538, %583 : vector<2x32xf32>
    %585 = arith.truncf %584 : vector<2x32xf32> to vector<2x32xbf16>
    %586 = arith.index_cast %c2_i32_273 : i32 to index
    %c0_288 = arith.constant 0 : index
    %c0_289 = arith.constant 0 : index
    %587 = vector.load %arg11[%586, %c0_288, %c0_289] : memref<8x2x32xbf16, #tpu.memory_space<vmem>>, vector<1x2x32xbf16>
    %588 = vector.shape_cast %587 : vector<1x2x32xbf16> to vector<2x32xbf16>
    %589 = vector.shape_cast %585 : vector<2x32xbf16> to vector<1x2x32xbf16>
    tpu.vector_store %arg11[%586, %c0_288, %c0_289], %589 {strides = array<i32>} : memref<8x2x32xbf16, #tpu.memory_space<vmem>>, vector<1x2x32xbf16>,
    %c3_i32_290 = arith.constant 3 : i32
    %590 = arith.truncf %584 : vector<2x32xf32> to vector<2x32xbf16>
    %cst_291 = arith.constant dense<0.000000e+00> : vector<2x32xf32>
    %591 = tpu.matmul %590, %415, %cst_291 {dimension_numbers = #tpu.dot_dimension_numbers<[1], [0], [0], [1], [0, 0, 1, 1], [], []>} : vector<2x32xbf16>, vector<32x32xbf16>, vector<2x32xf32> -> vector<2x32xf32>
    %cst_292 = arith.constant dense<0.000000e+00> : vector<2x32xf32>
    %592 = tpu.matmul %590, %417, %cst_292 {dimension_numbers = #tpu.dot_dimension_numbers<[1], [0], [0], [1], [0, 0, 1, 1], [], []>} : vector<2x32xbf16>, vector<32x32xbf16>, vector<2x32xf32> -> vector<2x32xf32>
    %cst_293 = arith.constant dense<0.000000e+00> : vector<2x32xf32>
    %593 = tpu.matmul %590, %419, %cst_293 {dimension_numbers = #tpu.dot_dimension_numbers<[1], [0], [0], [1], [0, 0, 1, 1], [], []>} : vector<2x32xbf16>, vector<32x32xbf16>, vector<2x32xf32> -> vector<2x32xf32>
    %594 = arith.index_cast %c3_i32_290 : i32 to index
    %c0_294 = arith.constant 0 : index
    %c0_295 = arith.constant 0 : index
    %595 = vector.load %arg12[%594, %c0_294, %c0_295] : memref<8x2x32xf32, #tpu.memory_space<vmem>>, vector<1x2x32xf32>
    %596 = vector.shape_cast %595 : vector<1x2x32xf32> to vector<2x32xf32>
    %597 = arith.addf %596, %591 : vector<2x32xf32>
    %598 = arith.negf %597 : vector<2x32xf32>
    %599 = math.exp %598 : vector<2x32xf32>
    %cst_296 = arith.constant 1.000000e+00 : f32
    %600 = vector.broadcast %cst_296 : f32 to vector<2x32xf32>
    %601 = arith.addf %600, %599 : vector<2x32xf32>
    %602 = arith.divf %600, %601 : vector<2x32xf32>
    %603 = arith.index_cast %c3_i32_290 : i32 to index
    %c0_297 = arith.constant 0 : index
    %c0_298 = arith.constant 0 : index
    %604 = vector.load %arg13[%603, %c0_297, %c0_298] : memref<8x2x32xf32, #tpu.memory_space<vmem>>, vector<1x2x32xf32>
    %605 = vector.shape_cast %604 : vector<1x2x32xf32> to vector<2x32xf32>
    %606 = arith.addf %605, %592 : vector<2x32xf32>
    %607 = arith.negf %606 : vector<2x32xf32>
    %608 = math.exp %607 : vector<2x32xf32>
    %cst_299 = arith.constant 1.000000e+00 : f32
    %609 = vector.broadcast %cst_299 : f32 to vector<2x32xf32>
    %610 = arith.addf %609, %608 : vector<2x32xf32>
    %611 = arith.divf %609, %610 : vector<2x32xf32>
    %612 = arith.index_cast %c3_i32_290 : i32 to index
    %c0_300 = arith.constant 0 : index
    %c0_301 = arith.constant 0 : index
    %613 = vector.load %arg14[%612, %c0_300, %c0_301] : memref<8x2x32xf32, #tpu.memory_space<vmem>>, vector<1x2x32xf32>
    %614 = vector.shape_cast %613 : vector<1x2x32xf32> to vector<2x32xf32>
    %615 = vector.broadcast %421 : vector<1x32xf32> to vector<2x32xf32>
    %616 = arith.addf %593, %615 : vector<2x32xf32>
    %617 = arith.mulf %602, %616 : vector<2x32xf32>
    %618 = arith.addf %614, %617 : vector<2x32xf32>
    %619 = math.tanh %618 : vector<2x32xf32>
    %cst_302 = arith.constant 1.000000e+00 : f32
    %620 = vector.broadcast %cst_302 : f32 to vector<2x32xf32>
    %621 = arith.subf %620, %611 : vector<2x32xf32>
    %622 = arith.mulf %621, %619 : vector<2x32xf32>
    %623 = arith.mulf %611, %584 : vector<2x32xf32>
    %624 = arith.addf %622, %623 : vector<2x32xf32>
    %625 = arith.index_cast %c3_i32_290 : i32 to index
    %c0_303 = arith.constant 0 : index
    %c0_304 = arith.constant 0 : index
    %626 = vector.load %arg15[%625, %c0_303, %c0_304] : memref<8x2x32xf32, #tpu.memory_space<vmem>>, vector<1x2x32xf32>
    %627 = vector.shape_cast %626 : vector<1x2x32xf32> to vector<2x32xf32>
    %628 = arith.subf %624, %584 : vector<2x32xf32>
    %629 = arith.mulf %627, %628 : vector<2x32xf32>
    %630 = arith.addf %584, %629 : vector<2x32xf32>
    %631 = arith.truncf %630 : vector<2x32xf32> to vector<2x32xbf16>
    %632 = arith.index_cast %c3_i32_290 : i32 to index
    %c0_305 = arith.constant 0 : index
    %c0_306 = arith.constant 0 : index
    %633 = vector.load %arg11[%632, %c0_305, %c0_306] : memref<8x2x32xbf16, #tpu.memory_space<vmem>>, vector<1x2x32xbf16>
    %634 = vector.shape_cast %633 : vector<1x2x32xbf16> to vector<2x32xbf16>
    %635 = vector.shape_cast %631 : vector<2x32xbf16> to vector<1x2x32xbf16>
    tpu.vector_store %arg11[%632, %c0_305, %c0_306], %635 {strides = array<i32>} : memref<8x2x32xbf16, #tpu.memory_space<vmem>>, vector<1x2x32xbf16>,
    %c4_i32_307 = arith.constant 4 : i32
    %636 = arith.truncf %630 : vector<2x32xf32> to vector<2x32xbf16>
    %cst_308 = arith.constant dense<0.000000e+00> : vector<2x32xf32>
    %637 = tpu.matmul %636, %415, %cst_308 {dimension_numbers = #tpu.dot_dimension_numbers<[1], [0], [0], [1], [0, 0, 1, 1], [], []>} : vector<2x32xbf16>, vector<32x32xbf16>, vector<2x32xf32> -> vector<2x32xf32>
    %cst_309 = arith.constant dense<0.000000e+00> : vector<2x32xf32>
    %638 = tpu.matmul %636, %417, %cst_309 {dimension_numbers = #tpu.dot_dimension_numbers<[1], [0], [0], [1], [0, 0, 1, 1], [], []>} : vector<2x32xbf16>, vector<32x32xbf16>, vector<2x32xf32> -> vector<2x32xf32>
    %cst_310 = arith.constant dense<0.000000e+00> : vector<2x32xf32>
    %639 = tpu.matmul %636, %419, %cst_310 {dimension_numbers = #tpu.dot_dimension_numbers<[1], [0], [0], [1], [0, 0, 1, 1], [], []>} : vector<2x32xbf16>, vector<32x32xbf16>, vector<2x32xf32> -> vector<2x32xf32>
    %640 = arith.index_cast %c4_i32_307 : i32 to index
    %c0_311 = arith.constant 0 : index
    %c0_312 = arith.constant 0 : index
    %641 = vector.load %arg12[%640, %c0_311, %c0_312] : memref<8x2x32xf32, #tpu.memory_space<vmem>>, vector<1x2x32xf32>
    %642 = vector.shape_cast %641 : vector<1x2x32xf32> to vector<2x32xf32>
    %643 = arith.addf %642, %637 : vector<2x32xf32>
    %644 = arith.negf %643 : vector<2x32xf32>
    %645 = math.exp %644 : vector<2x32xf32>
    %cst_313 = arith.constant 1.000000e+00 : f32
    %646 = vector.broadcast %cst_313 : f32 to vector<2x32xf32>
    %647 = arith.addf %646, %645 : vector<2x32xf32>
    %648 = arith.divf %646, %647 : vector<2x32xf32>
    %649 = arith.index_cast %c4_i32_307 : i32 to index
    %c0_314 = arith.constant 0 : index
    %c0_315 = arith.constant 0 : index
    %650 = vector.load %arg13[%649, %c0_314, %c0_315] : memref<8x2x32xf32, #tpu.memory_space<vmem>>, vector<1x2x32xf32>
    %651 = vector.shape_cast %650 : vector<1x2x32xf32> to vector<2x32xf32>
    %652 = arith.addf %651, %638 : vector<2x32xf32>
    %653 = arith.negf %652 : vector<2x32xf32>
    %654 = math.exp %653 : vector<2x32xf32>
    %cst_316 = arith.constant 1.000000e+00 : f32
    %655 = vector.broadcast %cst_316 : f32 to vector<2x32xf32>
    %656 = arith.addf %655, %654 : vector<2x32xf32>
    %657 = arith.divf %655, %656 : vector<2x32xf32>
    %658 = arith.index_cast %c4_i32_307 : i32 to index
    %c0_317 = arith.constant 0 : index
    %c0_318 = arith.constant 0 : index
    %659 = vector.load %arg14[%658, %c0_317, %c0_318] : memref<8x2x32xf32, #tpu.memory_space<vmem>>, vector<1x2x32xf32>
    %660 = vector.shape_cast %659 : vector<1x2x32xf32> to vector<2x32xf32>
    %661 = vector.broadcast %421 : vector<1x32xf32> to vector<2x32xf32>
    %662 = arith.addf %639, %661 : vector<2x32xf32>
    %663 = arith.mulf %648, %662 : vector<2x32xf32>
    %664 = arith.addf %660, %663 : vector<2x32xf32>
    %665 = math.tanh %664 : vector<2x32xf32>
    %cst_319 = arith.constant 1.000000e+00 : f32
    %666 = vector.broadcast %cst_319 : f32 to vector<2x32xf32>
    %667 = arith.subf %666, %657 : vector<2x32xf32>
    %668 = arith.mulf %667, %665 : vector<2x32xf32>
    %669 = arith.mulf %657, %630 : vector<2x32xf32>
    %670 = arith.addf %668, %669 : vector<2x32xf32>
    %671 = arith.index_cast %c4_i32_307 : i32 to index
    %c0_320 = arith.constant 0 : index
    %c0_321 = arith.constant 0 : index
    %672 = vector.load %arg15[%671, %c0_320, %c0_321] : memref<8x2x32xf32, #tpu.memory_space<vmem>>, vector<1x2x32xf32>
    %673 = vector.shape_cast %672 : vector<1x2x32xf32> to vector<2x32xf32>
    %674 = arith.subf %670, %630 : vector<2x32xf32>
    %675 = arith.mulf %673, %674 : vector<2x32xf32>
    %676 = arith.addf %630, %675 : vector<2x32xf32>
    %677 = arith.truncf %676 : vector<2x32xf32> to vector<2x32xbf16>
    %678 = arith.index_cast %c4_i32_307 : i32 to index
    %c0_322 = arith.constant 0 : index
    %c0_323 = arith.constant 0 : index
    %679 = vector.load %arg11[%678, %c0_322, %c0_323] : memref<8x2x32xbf16, #tpu.memory_space<vmem>>, vector<1x2x32xbf16>
    %680 = vector.shape_cast %679 : vector<1x2x32xbf16> to vector<2x32xbf16>
    %681 = vector.shape_cast %677 : vector<2x32xbf16> to vector<1x2x32xbf16>
    tpu.vector_store %arg11[%678, %c0_322, %c0_323], %681 {strides = array<i32>} : memref<8x2x32xbf16, #tpu.memory_space<vmem>>, vector<1x2x32xbf16>,
    %c5_i32_324 = arith.constant 5 : i32
    %682 = arith.truncf %676 : vector<2x32xf32> to vector<2x32xbf16>
    %cst_325 = arith.constant dense<0.000000e+00> : vector<2x32xf32>
    %683 = tpu.matmul %682, %415, %cst_325 {dimension_numbers = #tpu.dot_dimension_numbers<[1], [0], [0], [1], [0, 0, 1, 1], [], []>} : vector<2x32xbf16>, vector<32x32xbf16>, vector<2x32xf32> -> vector<2x32xf32>
    %cst_326 = arith.constant dense<0.000000e+00> : vector<2x32xf32>
    %684 = tpu.matmul %682, %417, %cst_326 {dimension_numbers = #tpu.dot_dimension_numbers<[1], [0], [0], [1], [0, 0, 1, 1], [], []>} : vector<2x32xbf16>, vector<32x32xbf16>, vector<2x32xf32> -> vector<2x32xf32>
    %cst_327 = arith.constant dense<0.000000e+00> : vector<2x32xf32>
    %685 = tpu.matmul %682, %419, %cst_327 {dimension_numbers = #tpu.dot_dimension_numbers<[1], [0], [0], [1], [0, 0, 1, 1], [], []>} : vector<2x32xbf16>, vector<32x32xbf16>, vector<2x32xf32> -> vector<2x32xf32>
    %686 = arith.index_cast %c5_i32_324 : i32 to index
    %c0_328 = arith.constant 0 : index
    %c0_329 = arith.constant 0 : index
    %687 = vector.load %arg12[%686, %c0_328, %c0_329] : memref<8x2x32xf32, #tpu.memory_space<vmem>>, vector<1x2x32xf32>
    %688 = vector.shape_cast %687 : vector<1x2x32xf32> to vector<2x32xf32>
    %689 = arith.addf %688, %683 : vector<2x32xf32>
    %690 = arith.negf %689 : vector<2x32xf32>
    %691 = math.exp %690 : vector<2x32xf32>
    %cst_330 = arith.constant 1.000000e+00 : f32
    %692 = vector.broadcast %cst_330 : f32 to vector<2x32xf32>
    %693 = arith.addf %692, %691 : vector<2x32xf32>
    %694 = arith.divf %692, %693 : vector<2x32xf32>
    %695 = arith.index_cast %c5_i32_324 : i32 to index
    %c0_331 = arith.constant 0 : index
    %c0_332 = arith.constant 0 : index
    %696 = vector.load %arg13[%695, %c0_331, %c0_332] : memref<8x2x32xf32, #tpu.memory_space<vmem>>, vector<1x2x32xf32>
    %697 = vector.shape_cast %696 : vector<1x2x32xf32> to vector<2x32xf32>
    %698 = arith.addf %697, %684 : vector<2x32xf32>
    %699 = arith.negf %698 : vector<2x32xf32>
    %700 = math.exp %699 : vector<2x32xf32>
    %cst_333 = arith.constant 1.000000e+00 : f32
    %701 = vector.broadcast %cst_333 : f32 to vector<2x32xf32>
    %702 = arith.addf %701, %700 : vector<2x32xf32>
    %703 = arith.divf %701, %702 : vector<2x32xf32>
    %704 = arith.index_cast %c5_i32_324 : i32 to index
    %c0_334 = arith.constant 0 : index
    %c0_335 = arith.constant 0 : index
    %705 = vector.load %arg14[%704, %c0_334, %c0_335] : memref<8x2x32xf32, #tpu.memory_space<vmem>>, vector<1x2x32xf32>
    %706 = vector.shape_cast %705 : vector<1x2x32xf32> to vector<2x32xf32>
    %707 = vector.broadcast %421 : vector<1x32xf32> to vector<2x32xf32>
    %708 = arith.addf %685, %707 : vector<2x32xf32>
    %709 = arith.mulf %694, %708 : vector<2x32xf32>
    %710 = arith.addf %706, %709 : vector<2x32xf32>
    %711 = math.tanh %710 : vector<2x32xf32>
    %cst_336 = arith.constant 1.000000e+00 : f32
    %712 = vector.broadcast %cst_336 : f32 to vector<2x32xf32>
    %713 = arith.subf %712, %703 : vector<2x32xf32>
    %714 = arith.mulf %713, %711 : vector<2x32xf32>
    %715 = arith.mulf %703, %676 : vector<2x32xf32>
    %716 = arith.addf %714, %715 : vector<2x32xf32>
    %717 = arith.index_cast %c5_i32_324 : i32 to index
    %c0_337 = arith.constant 0 : index
    %c0_338 = arith.constant 0 : index
    %718 = vector.load %arg15[%717, %c0_337, %c0_338] : memref<8x2x32xf32, #tpu.memory_space<vmem>>, vector<1x2x32xf32>
    %719 = vector.shape_cast %718 : vector<1x2x32xf32> to vector<2x32xf32>
    %720 = arith.subf %716, %676 : vector<2x32xf32>
    %721 = arith.mulf %719, %720 : vector<2x32xf32>
    %722 = arith.addf %676, %721 : vector<2x32xf32>
    %723 = arith.truncf %722 : vector<2x32xf32> to vector<2x32xbf16>
    %724 = arith.index_cast %c5_i32_324 : i32 to index
    %c0_339 = arith.constant 0 : index
    %c0_340 = arith.constant 0 : index
    %725 = vector.load %arg11[%724, %c0_339, %c0_340] : memref<8x2x32xbf16, #tpu.memory_space<vmem>>, vector<1x2x32xbf16>
    %726 = vector.shape_cast %725 : vector<1x2x32xbf16> to vector<2x32xbf16>
    %727 = vector.shape_cast %723 : vector<2x32xbf16> to vector<1x2x32xbf16>
    tpu.vector_store %arg11[%724, %c0_339, %c0_340], %727 {strides = array<i32>} : memref<8x2x32xbf16, #tpu.memory_space<vmem>>, vector<1x2x32xbf16>,
    %c6_i32_341 = arith.constant 6 : i32
    %728 = arith.truncf %722 : vector<2x32xf32> to vector<2x32xbf16>
    %cst_342 = arith.constant dense<0.000000e+00> : vector<2x32xf32>
    %729 = tpu.matmul %728, %415, %cst_342 {dimension_numbers = #tpu.dot_dimension_numbers<[1], [0], [0], [1], [0, 0, 1, 1], [], []>} : vector<2x32xbf16>, vector<32x32xbf16>, vector<2x32xf32> -> vector<2x32xf32>
    %cst_343 = arith.constant dense<0.000000e+00> : vector<2x32xf32>
    %730 = tpu.matmul %728, %417, %cst_343 {dimension_numbers = #tpu.dot_dimension_numbers<[1], [0], [0], [1], [0, 0, 1, 1], [], []>} : vector<2x32xbf16>, vector<32x32xbf16>, vector<2x32xf32> -> vector<2x32xf32>
    %cst_344 = arith.constant dense<0.000000e+00> : vector<2x32xf32>
    %731 = tpu.matmul %728, %419, %cst_344 {dimension_numbers = #tpu.dot_dimension_numbers<[1], [0], [0], [1], [0, 0, 1, 1], [], []>} : vector<2x32xbf16>, vector<32x32xbf16>, vector<2x32xf32> -> vector<2x32xf32>
    %732 = arith.index_cast %c6_i32_341 : i32 to index
    %c0_345 = arith.constant 0 : index
    %c0_346 = arith.constant 0 : index
    %733 = vector.load %arg12[%732, %c0_345, %c0_346] : memref<8x2x32xf32, #tpu.memory_space<vmem>>, vector<1x2x32xf32>
    %734 = vector.shape_cast %733 : vector<1x2x32xf32> to vector<2x32xf32>
    %735 = arith.addf %734, %729 : vector<2x32xf32>
    %736 = arith.negf %735 : vector<2x32xf32>
    %737 = math.exp %736 : vector<2x32xf32>
    %cst_347 = arith.constant 1.000000e+00 : f32
    %738 = vector.broadcast %cst_347 : f32 to vector<2x32xf32>
    %739 = arith.addf %738, %737 : vector<2x32xf32>
    %740 = arith.divf %738, %739 : vector<2x32xf32>
    %741 = arith.index_cast %c6_i32_341 : i32 to index
    %c0_348 = arith.constant 0 : index
    %c0_349 = arith.constant 0 : index
    %742 = vector.load %arg13[%741, %c0_348, %c0_349] : memref<8x2x32xf32, #tpu.memory_space<vmem>>, vector<1x2x32xf32>
    %743 = vector.shape_cast %742 : vector<1x2x32xf32> to vector<2x32xf32>
    %744 = arith.addf %743, %730 : vector<2x32xf32>
    %745 = arith.negf %744 : vector<2x32xf32>
    %746 = math.exp %745 : vector<2x32xf32>
    %cst_350 = arith.constant 1.000000e+00 : f32
    %747 = vector.broadcast %cst_350 : f32 to vector<2x32xf32>
    %748 = arith.addf %747, %746 : vector<2x32xf32>
    %749 = arith.divf %747, %748 : vector<2x32xf32>
    %750 = arith.index_cast %c6_i32_341 : i32 to index
    %c0_351 = arith.constant 0 : index
    %c0_352 = arith.constant 0 : index
    %751 = vector.load %arg14[%750, %c0_351, %c0_352] : memref<8x2x32xf32, #tpu.memory_space<vmem>>, vector<1x2x32xf32>
    %752 = vector.shape_cast %751 : vector<1x2x32xf32> to vector<2x32xf32>
    %753 = vector.broadcast %421 : vector<1x32xf32> to vector<2x32xf32>
    %754 = arith.addf %731, %753 : vector<2x32xf32>
    %755 = arith.mulf %740, %754 : vector<2x32xf32>
    %756 = arith.addf %752, %755 : vector<2x32xf32>
    %757 = math.tanh %756 : vector<2x32xf32>
    %cst_353 = arith.constant 1.000000e+00 : f32
    %758 = vector.broadcast %cst_353 : f32 to vector<2x32xf32>
    %759 = arith.subf %758, %749 : vector<2x32xf32>
    %760 = arith.mulf %759, %757 : vector<2x32xf32>
    %761 = arith.mulf %749, %722 : vector<2x32xf32>
    %762 = arith.addf %760, %761 : vector<2x32xf32>
    %763 = arith.index_cast %c6_i32_341 : i32 to index
    %c0_354 = arith.constant 0 : index
    %c0_355 = arith.constant 0 : index
    %764 = vector.load %arg15[%763, %c0_354, %c0_355] : memref<8x2x32xf32, #tpu.memory_space<vmem>>, vector<1x2x32xf32>
    %765 = vector.shape_cast %764 : vector<1x2x32xf32> to vector<2x32xf32>
    %766 = arith.subf %762, %722 : vector<2x32xf32>
    %767 = arith.mulf %765, %766 : vector<2x32xf32>
    %768 = arith.addf %722, %767 : vector<2x32xf32>
    %769 = arith.truncf %768 : vector<2x32xf32> to vector<2x32xbf16>
    %770 = arith.index_cast %c6_i32_341 : i32 to index
    %c0_356 = arith.constant 0 : index
    %c0_357 = arith.constant 0 : index
    %771 = vector.load %arg11[%770, %c0_356, %c0_357] : memref<8x2x32xbf16, #tpu.memory_space<vmem>>, vector<1x2x32xbf16>
    %772 = vector.shape_cast %771 : vector<1x2x32xbf16> to vector<2x32xbf16>
    %773 = vector.shape_cast %769 : vector<2x32xbf16> to vector<1x2x32xbf16>
    tpu.vector_store %arg11[%770, %c0_356, %c0_357], %773 {strides = array<i32>} : memref<8x2x32xbf16, #tpu.memory_space<vmem>>, vector<1x2x32xbf16>,
    %c7_i32_358 = arith.constant 7 : i32
    %774 = arith.truncf %768 : vector<2x32xf32> to vector<2x32xbf16>
    %cst_359 = arith.constant dense<0.000000e+00> : vector<2x32xf32>
    %775 = tpu.matmul %774, %415, %cst_359 {dimension_numbers = #tpu.dot_dimension_numbers<[1], [0], [0], [1], [0, 0, 1, 1], [], []>} : vector<2x32xbf16>, vector<32x32xbf16>, vector<2x32xf32> -> vector<2x32xf32>
    %cst_360 = arith.constant dense<0.000000e+00> : vector<2x32xf32>
    %776 = tpu.matmul %774, %417, %cst_360 {dimension_numbers = #tpu.dot_dimension_numbers<[1], [0], [0], [1], [0, 0, 1, 1], [], []>} : vector<2x32xbf16>, vector<32x32xbf16>, vector<2x32xf32> -> vector<2x32xf32>
    %cst_361 = arith.constant dense<0.000000e+00> : vector<2x32xf32>
    %777 = tpu.matmul %774, %419, %cst_361 {dimension_numbers = #tpu.dot_dimension_numbers<[1], [0], [0], [1], [0, 0, 1, 1], [], []>} : vector<2x32xbf16>, vector<32x32xbf16>, vector<2x32xf32> -> vector<2x32xf32>
    %778 = arith.index_cast %c7_i32_358 : i32 to index
    %c0_362 = arith.constant 0 : index
    %c0_363 = arith.constant 0 : index
    %779 = vector.load %arg12[%778, %c0_362, %c0_363] : memref<8x2x32xf32, #tpu.memory_space<vmem>>, vector<1x2x32xf32>
    %780 = vector.shape_cast %779 : vector<1x2x32xf32> to vector<2x32xf32>
    %781 = arith.addf %780, %775 : vector<2x32xf32>
    %782 = arith.negf %781 : vector<2x32xf32>
    %783 = math.exp %782 : vector<2x32xf32>
    %cst_364 = arith.constant 1.000000e+00 : f32
    %784 = vector.broadcast %cst_364 : f32 to vector<2x32xf32>
    %785 = arith.addf %784, %783 : vector<2x32xf32>
    %786 = arith.divf %784, %785 : vector<2x32xf32>
    %787 = arith.index_cast %c7_i32_358 : i32 to index
    %c0_365 = arith.constant 0 : index
    %c0_366 = arith.constant 0 : index
    %788 = vector.load %arg13[%787, %c0_365, %c0_366] : memref<8x2x32xf32, #tpu.memory_space<vmem>>, vector<1x2x32xf32>
    %789 = vector.shape_cast %788 : vector<1x2x32xf32> to vector<2x32xf32>
    %790 = arith.addf %789, %776 : vector<2x32xf32>
    %791 = arith.negf %790 : vector<2x32xf32>
    %792 = math.exp %791 : vector<2x32xf32>
    %cst_367 = arith.constant 1.000000e+00 : f32
    %793 = vector.broadcast %cst_367 : f32 to vector<2x32xf32>
    %794 = arith.addf %793, %792 : vector<2x32xf32>
    %795 = arith.divf %793, %794 : vector<2x32xf32>
    %796 = arith.index_cast %c7_i32_358 : i32 to index
    %c0_368 = arith.constant 0 : index
    %c0_369 = arith.constant 0 : index
    %797 = vector.load %arg14[%796, %c0_368, %c0_369] : memref<8x2x32xf32, #tpu.memory_space<vmem>>, vector<1x2x32xf32>
    %798 = vector.shape_cast %797 : vector<1x2x32xf32> to vector<2x32xf32>
    %799 = vector.broadcast %421 : vector<1x32xf32> to vector<2x32xf32>
    %800 = arith.addf %777, %799 : vector<2x32xf32>
    %801 = arith.mulf %786, %800 : vector<2x32xf32>
    %802 = arith.addf %798, %801 : vector<2x32xf32>
    %803 = math.tanh %802 : vector<2x32xf32>
    %cst_370 = arith.constant 1.000000e+00 : f32
    %804 = vector.broadcast %cst_370 : f32 to vector<2x32xf32>
    %805 = arith.subf %804, %795 : vector<2x32xf32>
    %806 = arith.mulf %805, %803 : vector<2x32xf32>
    %807 = arith.mulf %795, %768 : vector<2x32xf32>
    %808 = arith.addf %806, %807 : vector<2x32xf32>
    %809 = arith.index_cast %c7_i32_358 : i32 to index
    %c0_371 = arith.constant 0 : index
    %c0_372 = arith.constant 0 : index
    %810 = vector.load %arg15[%809, %c0_371, %c0_372] : memref<8x2x32xf32, #tpu.memory_space<vmem>>, vector<1x2x32xf32>
    %811 = vector.shape_cast %810 : vector<1x2x32xf32> to vector<2x32xf32>
    %812 = arith.subf %808, %768 : vector<2x32xf32>
    %813 = arith.mulf %811, %812 : vector<2x32xf32>
    %814 = arith.addf %768, %813 : vector<2x32xf32>
    %815 = arith.truncf %814 : vector<2x32xf32> to vector<2x32xbf16>
    %816 = arith.index_cast %c7_i32_358 : i32 to index
    %c0_373 = arith.constant 0 : index
    %c0_374 = arith.constant 0 : index
    %817 = vector.load %arg11[%816, %c0_373, %c0_374] : memref<8x2x32xbf16, #tpu.memory_space<vmem>>, vector<1x2x32xbf16>
    %818 = vector.shape_cast %817 : vector<1x2x32xbf16> to vector<2x32xbf16>
    %819 = vector.shape_cast %815 : vector<2x32xbf16> to vector<1x2x32xbf16>
    tpu.vector_store %arg11[%816, %c0_373, %c0_374], %819 {strides = array<i32>} : memref<8x2x32xbf16, #tpu.memory_space<vmem>>, vector<1x2x32xbf16>,
    %c8_i32_375 = arith.constant 8 : i32
    %c0_376 = arith.constant 0 : index
    %c0_377 = arith.constant 0 : index
    %c0_378 = arith.constant 0 : index
    %820 = vector.load %arg11[%c0_376, %c0_377, %c0_378] : memref<8x2x32xbf16, #tpu.memory_space<vmem>>, vector<8x2x32xbf16>
    %821 = vector.shape_cast %820 : vector<8x2x32xbf16> to vector<16x32xbf16>
    %c0_379 = arith.constant 0 : index
    %c0_380 = arith.constant 0 : index
    %822 = vector.load %arg7[%c0_379, %c0_380] : memref<32x32xbf16, #tpu.memory_space<vmem>>, vector<32x32xbf16>
    %cst_381 = arith.constant dense<0.000000e+00> : vector<16x32xf32>
    %823 = tpu.matmul %821, %822, %cst_381 {dimension_numbers = #tpu.dot_dimension_numbers<[1], [0], [0], [1], [0, 0, 1, 1], [], []>} : vector<16x32xbf16>, vector<32x32xbf16>, vector<16x32xf32> -> vector<16x32xf32>
    %c0_382 = arith.constant 0 : index
    %c0_383 = arith.constant 0 : index
    %824 = vector.load %arg8[%c0_382, %c0_383] : memref<1x32xf32, #tpu.memory_space<vmem>>, vector<1x32xf32>
    %825 = vector.broadcast %824 : vector<1x32xf32> to vector<16x32xf32>
    %826 = arith.addf %823, %825 : vector<16x32xf32>
    %827 = arith.negf %826 : vector<16x32xf32>
    %828 = math.exp %827 : vector<16x32xf32>
    %cst_384 = arith.constant 1.000000e+00 : f32
    %829 = vector.broadcast %cst_384 : f32 to vector<16x32xf32>
    %830 = arith.addf %829, %828 : vector<16x32xf32>
    %831 = arith.divf %829, %830 : vector<16x32xf32>
    %832 = vector.shape_cast %831 : vector<16x32xf32> to vector<8x2x32xf32>
    %c0_385 = arith.constant 0 : index
    %c0_386 = arith.constant 0 : index
    %833 = vector.load %arg9[%c0_385, %c0_386] : memref<1x32xf32, #tpu.memory_space<vmem>>, vector<1x32xf32>
    %834 = vector.shape_cast %833 : vector<1x32xf32> to vector<1x1x32xf32>
    %c0_387 = arith.constant 0 : index
    %c0_388 = arith.constant 0 : index
    %c0_389 = arith.constant 0 : index
    %835 = vector.load %arg15[%c0_387, %c0_388, %c0_389] : memref<8x2x32xf32, #tpu.memory_space<vmem>>, vector<8x2x32xf32>
    %836 = vector.broadcast %834 : vector<1x1x32xf32> to vector<8x2x32xf32>
    %837 = arith.subf %832, %836 : vector<8x2x32xf32>
    %838 = arith.mulf %835, %837 : vector<8x2x32xf32>
    %839 = vector.broadcast %834 : vector<1x1x32xf32> to vector<8x2x32xf32>
    %840 = arith.addf %839, %838 : vector<8x2x32xf32>
    %c0_390 = arith.constant 0 : index
    %c0_391 = arith.constant 0 : index
    %c0_392 = arith.constant 0 : index
    %841 = vector.load %arg10[%c0_390, %c0_391, %c0_392] : memref<8x2x32xf32, #tpu.memory_space<vmem>>, vector<8x2x32xf32>
    tpu.vector_store %arg10[%c0_390, %c0_391, %c0_392], %840 {strides = array<i32>} : memref<8x2x32xf32, #tpu.memory_space<vmem>>, vector<8x2x32xf32>,
    return
  }
  func.func @transform_0(%arg0: i32) -> (i32, i32, i32) {
    %c0_i32 = arith.constant 0 : i32
    %c0_i32_0 = arith.constant 0 : i32
    %c0_i32_1 = arith.constant 0 : i32
    return %c0_i32, %arg0, %c0_i32_0 : i32, i32, i32
  }
  func.func @transform_1(%arg0: i32) -> (i32, i32) {
    %c0_i32 = arith.constant 0 : i32
    %c0_i32_0 = arith.constant 0 : i32
    return %arg0, %c0_i32 : i32, i32
  }
  func.func @transform_2(%arg0: i32) -> (i32, i32, i32, i32) {
    %c0_i32 = arith.constant 0 : i32
    %c0_i32_0 = arith.constant 0 : i32
    %c0_i32_1 = arith.constant 0 : i32
    %c0_i32_2 = arith.constant 0 : i32
    %c0_i32_3 = arith.constant 0 : i32
    return %c0_i32, %c0_i32_0, %c0_i32_1, %c0_i32_2 : i32, i32, i32, i32
  }
  func.func @transform_3(%arg0: i32) -> (i32, i32, i32, i32) {
    %c0_i32 = arith.constant 0 : i32
    %c0_i32_0 = arith.constant 0 : i32
    %c0_i32_1 = arith.constant 0 : i32
    %c0_i32_2 = arith.constant 0 : i32
    %c0_i32_3 = arith.constant 0 : i32
    return %c0_i32, %c0_i32_0, %c0_i32_1, %c0_i32_2 : i32, i32, i32, i32
  }
  func.func @transform_4(%arg0: i32) -> (i32, i32, i32, i32) {
    %c0_i32 = arith.constant 0 : i32
    %c0_i32_0 = arith.constant 0 : i32
    %c0_i32_1 = arith.constant 0 : i32
    %c0_i32_2 = arith.constant 0 : i32
    %c0_i32_3 = arith.constant 0 : i32
    return %c0_i32, %c0_i32_0, %c0_i32_1, %c0_i32_2 : i32, i32, i32, i32
  }
  func.func @transform_5(%arg0: i32) -> (i32, i32, i32) {
    %c0_i32 = arith.constant 0 : i32
    %c0_i32_0 = arith.constant 0 : i32
    %c0_i32_1 = arith.constant 0 : i32
    %c0_i32_2 = arith.constant 0 : i32
    return %c0_i32, %c0_i32_0, %c0_i32_1 : i32, i32, i32
  }
  func.func @transform_6(%arg0: i32) -> (i32, i32) {
    %c0_i32 = arith.constant 0 : i32
    %c0_i32_0 = arith.constant 0 : i32
    %c0_i32_1 = arith.constant 0 : i32
    return %c0_i32, %c0_i32_0 : i32, i32
  }
  func.func @transform_7(%arg0: i32) -> (i32, i32) {
    %c0_i32 = arith.constant 0 : i32
    %c0_i32_0 = arith.constant 0 : i32
    %c0_i32_1 = arith.constant 0 : i32
    return %c0_i32, %c0_i32_0 : i32, i32
  }
  func.func @transform_8(%arg0: i32) -> (i32, i32) {
    %c0_i32 = arith.constant 0 : i32
    %c0_i32_0 = arith.constant 0 : i32
    %c0_i32_1 = arith.constant 0 : i32
    return %c0_i32, %c0_i32_0 : i32, i32
  }
  func.func @transform_9(%arg0: i32) -> (i32, i32, i32) {
    %c0_i32 = arith.constant 0 : i32
    %c0_i32_0 = arith.constant 0 : i32
    %c0_i32_1 = arith.constant 0 : i32
    return %c0_i32, %arg0, %c0_i32_0 : i32, i32, i32
  }
}

</mosaic_0001>

<bundles_post_ra>
// kernel: tpu_custom_call.1
= control target key start
LH: loop header
LB: loop body
LE: loop exit
PB: predicated region body
PF: predicated region fallthrough
CT: control target
= control target key end

     0   :  { %14 = vsyncpa [#allocation8], 0  ;;  %s5582_s0 = inlined_call_operand.hbm [shape: bf16[8,2,32], index: 0, kind: input, shape index: {}]   ;;  %s5583_s1 = inlined_call_operand.vmem [shape: s32[2,1], index: 1, kind: input, shape index: {}]   ;;  %s5584_s2 = inlined_call_operand.hbm [shape: bf16[2,3,32,32], index: 2, kind: input, shape index: {}]   ;;  %s5585_s3 = inlined_call_operand.hbm [shape: bf16[2,3,32,32], index: 3, kind: input, shape index: {}]   ;;  %s5586_s4 = inlined_call_operand.vmem [shape: f32[2,3,1,32], index: 4, kind: input, shape index: {}]   ;;  %s5587_s5 = inlined_call_operand.vmem [shape: f32[2,1,32], index: 5, kind: input, shape index: {}]   ;;  %s5588_s6 = inlined_call_operand.vmem [shape: bf16[32,32], index: 6, kind: input, shape index: {}]   ;;  %s5589_s7 = inlined_call_operand.vmem [shape: f32[1,32], index: 7, kind: input, shape index: {}]   ;;  %s5590_s8 = inlined_call_operand.vmem [shape: f32[1,32], index: 8, kind: input, shape index: {}]   ;;  %s5591_s9 = inlined_call_operand.hbm [shape: f32[8,2,32], index: 9, kind: output, shape index: {}]  }
   0x1   :  { %15 = vsyncpa [#allocation11], 0 }
   0x2   :  { %16 = vsyncpa [#allocation9], 0  ;;  %s4852_s30 = smov [#allocation10]   ;;  %s4758_s13 = scalar_lea.hbm %s5584_s2, 1536 }
   0x3   :  { %s36_s10 = sshll.u32 %s4852_s30, 4  ;;  %p4759_p0 = scmp.ne.s32.totalorder %s5584_s2, %s4758_s13  ;;  %s37_s10 = int_to_ptr.vmem [resolvable:$true] %s36_s10 }
   0x4   :  { %p4762_p1 = scmp.lt.u32.totalorder %s4758_s13, %s5584_s2 }
   0x6   :  { %p4764_p2 = pnand %p4762_p1, %p4759_p0 }
   0x8   :  { %4767 = shalt.err (!%p4764_p2)
}
   0x9   :  { %s4768_s18 = scalar_lea.vmem %s37_s10, 1536  ;;  %p4773_p4 = scmp.lt.s32.totalorder %s37_s10, %s37_s10 }
   0xa   :  { %p4769_p3 = scmp.ne.s32.totalorder %s37_s10, %s4768_s18  ;;  %p4774_p5 = scmp.lt.s32.totalorder %s4768_s18, %s4768_s18 }
   0xc   :  { %p4775_p6 = por %p4774_p5, %p4773_p4 }
   0xe   :  { %p4776_p7 = pnand %p4775_p6, %p4769_p3 }
  0x10   :  { %4779 = shalt.err (!%p4776_p7)
}
  0x11   :  { %s4853_s19 = smov 64   ;;  %s4854_s20 = smov 4  }
  0x12   :  { %42 = dma.hbm_to_vmem [thread:$0]  %s5584_s2, 1536, %s37_s10, [#allocation11], %s4853_s19, %s4853_s19, %s4854_s20  }
  0x13   :  { %s4855_s23 = smov [#allocation7]   ;;  %s4780_s27 = scalar_lea.hbm %s5582_s0, 128 }
  0x14   :  { %s22_s24 = sshll.u32 %s4855_s23, 4  ;;  %p4781_p8 = scmp.ne.s32.totalorder %s5582_s0, %s4780_s27  ;;  %s23_s24 = int_to_ptr.vmem [resolvable:$true] %s22_s24 }
  0x15   :  { %p4784_p9 = scmp.lt.u32.totalorder %s4780_s27, %s5582_s0 }
  0x17   :  { %p4786_p10 = pnand %p4784_p9, %p4781_p8 }
  0x19   :  { %4789 = shalt.err (!%p4786_p10)
}
  0x1a   :  { %s4790_s12 = scalar_lea.vmem %s23_s24, 128  ;;  %p4795_p12 = scmp.lt.s32.totalorder %s23_s24, %s23_s24 }
  0x1b   :  { %p4791_p11 = scmp.ne.s32.totalorder %s23_s24, %s4790_s12  ;;  %p4796_p13 = scmp.lt.s32.totalorder %s4790_s12, %s4790_s12 }
  0x1d   :  { %p4797_p0 = por %p4796_p13, %p4795_p12 }
  0x1f   :  { %p4798_p1 = pnand %p4797_p0, %p4791_p11 }
  0x21   :  { %4801 = shalt.err (!%p4798_p1)
}
  0x22   :  { %s4856_s2 = smov 16   ;;  %s4857_s10 = smov 1  }
  0x23   :  { %28 = dma.hbm_to_vmem [thread:$0]  %s5582_s0, 128, %s23_s24, [#allocation8], %s4856_s2, %s4856_s2, %s4857_s10  }
  0x24   :  { %s4858_s15 = smov [#allocation12]   ;;  %s4802_s21 = scalar_lea.hbm %s5585_s3, 1536 }
  0x25   :  { %s48_s16 = sshll.u32 %s4858_s15, 4  ;;  %p4803_p2 = scmp.ne.s32.totalorder %s5585_s3, %s4802_s21  ;;  %s49_s16 = int_to_ptr.vmem [resolvable:$true] %s48_s16 }
  0x26   :  { %p4806_p3 = scmp.lt.u32.totalorder %s4802_s21, %s5585_s3 }
  0x28   :  { %p4808_p4 = pnand %p4806_p3, %p4803_p2 }
  0x2a   :  { %4811 = shalt.err (!%p4808_p4)
}
  0x2b   :  { %s4812_s27 = scalar_lea.vmem %s49_s16, 1536  ;;  %p4817_p6 = scmp.lt.s32.totalorder %s49_s16, %s49_s16 }
  0x2c   :  { %p4813_p5 = scmp.ne.s32.totalorder %s49_s16, %s4812_s27  ;;  %p4818_p7 = scmp.lt.s32.totalorder %s4812_s27, %s4812_s27 }
  0x2e   :  { %p4819_p8 = por %p4818_p7, %p4817_p6 }
  0x30   :  { %p4820_p9 = pnand %p4819_p8, %p4813_p5 }
  0x32   :  { %4823 = shalt.err (!%p4820_p9)
}
  0x33   :  { %54 = dma.hbm_to_vmem [thread:$0]  %s5585_s3, 1536, %s49_s16, [#allocation11], %s4853_s19, %s4853_s19, %s4854_s20  }
  0x34   :  { %4846 = dma.done.wait [#allocation8], 128  }
  0x35   :  { %4847 = vsyncadd [#allocation8], 4294967168 }
  0x36   :  { %4848 = dma.done.wait [#allocation11], 3072  }
  0x37   :  { %4849 = vsyncadd [#allocation11], 4294964224  ;;  %v4859_v0 = vmov 0.0   ;;  %vm4860_vm0 = vmmov 0   ;;  %v4861_v1 = vmov 1966171168   ;;  %v161_v3 = vlaneseq }
  0x38   :  { %4101 = vmatprep.subr.bf16.mxu0 %v4859_v0  ;;  %4109 = vmatprep.subr.bf16.mxu1 %v4859_v0  ;;  %v159_v2 = vunpack.c.l.s4 %v4861_v1  ;;  %v4862_v4 = vmov 0   ;;  %v4557_v7 = vld [vmem:[#allocation10] sm:$0xff]   ;;  %v4558_v8 = vld [vmem:[#allocation10 + $0x10] sm:$0xff]   ;;  %v4559_v9 = vld [vmem:[#allocation10 + $0x8] sm:$0xff]   ;;  %vm215_vm1 = vcmask 261120   ;;  %vm103_vm2 = vcmask 254976  }
  0x39   :  { %4105 = vmatprep.mubr.msk.bf16.mxu0 %vm4860_vm0, %v4859_v0  ;;  %4113 = vmatprep.mubr.msk.bf16.mxu1 %vm4860_vm0, %v4859_v0  ;;  %v4966_v6 = vshrl.u32 %v161_v3, 7  ;;  %v4560_v10 = vld [vmem:[#allocation10 + $0x18] sm:$0xff]   ;;  %v4561_v32 = vld [vmem:[#allocation10 + $0x20] sm:$0xff]   ;;  %v75_v34 = vld [vmem:[%s5583_s1] sm:$0x3]  ;;  %vm741_vm11 = vcmask 253952  }
  0x3a   :  { %4556 = vset.pattern.permute.xlu0 %v4862_v4  ;;  %v160_v5 = vunpack.c.0.s8 %v159_v2  ;;  %4102 = vmatpush3.bf16.msra.mxu0 %v4557_v7  ;;  %v127_v12 = vld [vmem:[#allocation7] sm:$0x1]  ;;  %v128_v13 = vld [vmem:[#allocation7 + $0x1] sm:$0x1]  ;;  %v129_v14 = vld [vmem:[#allocation7 + $0x2] sm:$0x1] }
  0x3b   :  { %4110 = vmatpush3.bf16.msra.mxu1 %v4558_v8  ;;  %4103 = vmatprep.subr.bf16.mxu0 %v4859_v0  ;;  %v130_v15 = vld [vmem:[#allocation7 + $0x3] sm:$0x1]  ;;  %v131_v16 = vld [vmem:[#allocation7 + $0x4] sm:$0x1]  ;;  %v132_v17 = vld [vmem:[#allocation7 + $0x5] sm:$0x1]  ;;  %v154_v18 = vcombine.low %v127_v12, %v128_v13 }
  0x3c   :  { %v4970_v11 = vsub.s32 %v160_v5, %v4966_v6  ;;  %4111 = vmatprep.subr.bf16.mxu1 %v4859_v0  ;;  %v133_v19 = vld [vmem:[#allocation7 + $0x6] sm:$0x1]  ;;  %v134_v20 = vld [vmem:[#allocation7 + $0x7] sm:$0x1]  ;;  %v155_v21 = vcombine.low %v129_v14, %v130_v15  ;;  %v156_v22 = vcombine.low %v131_v16, %v132_v17  ;;  %v4981_v33 = vld [vmem:[#allocation12] sm:$0xff]   ;;  %77 = vperm.xlu0 %4556, %v75_v34  }
  0x3d   :  { %v157_v23 = vcombine.low %v133_v19, %v134_v20  ;;  %v4563_v36 = vld [vmem:[#allocation10 + $0x28] sm:$0xff]   ;;  %v4997_v38 = vld [vmem:[#allocation12 + $0x10] sm:$0xff]   ;;  %v4999_v39 = vld [vmem:[#allocation12 + $0x20] sm:$0xff]   ;;  %v4863_v51 = vmov 1983009808  }
  0x3e   :  { %4104 = vmatpush3.bf16.msra.mxu0 %v4559_v9  ;;  %v164_v24 = vrot.slane %v154_v18, %v4970_v11  ;;  %v171_v25 = vrot.slane %v155_v21, %v4970_v11  ;;  %v178_v26 = vrot.slane %v156_v22, %v4970_v11  ;;  %v4986_v37 = vld [vmem:[#allocation12 + $0x8] sm:$0xff]   ;;  %v5007_v40 = vld [vmem:[#allocation12 + $0x18] sm:$0xff]   ;;  %v264_v52 = vunpack.c.l.s4 %v4863_v51  ;;  %v3811_v54 = vld [vmem:[%s5586_s4] ss:$0 sm:$0xff] }
  0x3f   :  { %4112 = vmatpush3.bf16.msra.mxu1 %v4560_v10  ;;  %4117 = vmatprep.subr.bf16.mxu0 %v4859_v0  ;;  %v185_v27 = vrot.slane %v157_v23, %v4970_v11  ;;  %v5013_v41 = vld [vmem:[#allocation12 + $0x28] sm:$0xff]   ;;  %v3816_v55 = vld [vmem:[%s5586_s4 + $0x1] ss:$0 sm:$0xff]  ;;  %v3821_v20 = vld [vmem:[%s5586_s4 + $0x2] ss:$0 sm:$0xff] }
  0x40   :  { %4125 = vmatprep.subr.bf16.mxu1 %v4859_v0  ;;  %v186_v28 = vcombine.low %v164_v24, %v171_v25  ;;  %v265_v53 = vunpack.c.0.s8 %v264_v52 }
  0x41   :  { %v187_v29 = vcombine.low %v178_v26, %v185_v27 }
  0x42   :  { %v194_v30 = vrot.slane %v186_v28, %v4970_v11  ;;  %v5059_v56 = vsub.s32 %v265_v53, %v4966_v6 }
  0x43   :  { %v201_v31 = vrot.slane %v187_v29, %v4970_v11 }
  0x45   :  { %v202_v35 = vcombine.low %v194_v30, %v201_v31 }
  0x47   :  { %4106 = vmatmul.mubr.msk.bf16.vlgmr.msra.gmra.mrb[0].mxu0 %vm215_vm1, %v202_v35  ;;  %4114 = vmatmul.mubr.msk.bf16.vlgmr.msra.gmra.mrb[0].mxu1 %vm215_vm1, %v202_v35 }
  0x48   :  { %4118 = vmatpush3.bf16.msra.mxu0 %v4561_v32  ;;  %4126 = vmatpush3.bf16.msra.mxu1 %v4981_v33 }
  0x49   :  { %4119 = vmatprep.subr.bf16.mxu0 %v4859_v0  ;;  %4127 = vmatprep.subr.bf16.mxu1 %v4859_v0 }
  0x4a   :  { %4121 = vmatprep.mubr.msk.bf16.mxu0 %vm4860_vm0, %v4859_v0  ;;  %4129 = vmatprep.mubr.msk.bf16.mxu1 %vm4860_vm0, %v4859_v0 }
  0x4c   :  { %4120 = vmatpush3.bf16.msra.mxu0 %v4563_v36  ;;  %4128 = vmatpush3.bf16.msra.mxu1 %v4986_v37 }
  0x4d   :  { %4133 = vmatprep.subr.bf16.mxu0 %v4859_v0  ;;  %4141 = vmatprep.subr.bf16.mxu1 %v4859_v0 }
  0x4f   :  { %4122 = vmatmul.mubr.msk.bf16.vlgmr.msra.gmra.mrb[4].mxu0 %vm215_vm1, %v202_v35  ;;  %4130 = vmatmul.mubr.bf16.vlgmr.msra.gmra.mrb[4].mxu1 %v4862_v4 }
  0x50   :  { %4134 = vmatpush3.bf16.msra.mxu0 %v4997_v38  ;;  %4137 = vmatprep.mubr.msk.bf16.mxu0 %vm4860_vm0, %v4859_v0 }
  0x51   :  { %4135 = vmatprep.subr.bf16.mxu0 %v4859_v0  ;;  %4142 = vmatpush3.bf16.msra.mxu1 %v4999_v39 }
  0x52   :  { %4143 = vmatprep.subr.bf16.mxu1 %v4859_v0  ;;  %4145 = vmatprep.mubr.msk.bf16.mxu1 %vm4860_vm0, %v4859_v0 }
  0x54   :  { %4136 = vmatpush3.bf16.msra.mxu0 %v5007_v40 }
  0x55   :  { %4144 = vmatpush3.bf16.msra.mxu1 %v5013_v41  ;;  %4149 = vmatprep.subr.bf16.mxu0 %v4859_v0 }
  0x56   :  { %4157 = vmatprep.subr.bf16.mxu1 %v4859_v0 }
  0x57   :  { %4138 = vmatmul.mubr.bf16.vlgmr.msra.gmra.mrb[8].mxu0 %v4862_v4 }
  0x58   :  { %4146 = vmatmul.mubr.bf16.vlgmr.msra.gmra.mrb[8].mxu1 %v4862_v4  ;;  %4150 = vmatpush3.bf16.msra.mxu0 %v4981_v33 }
  0x59   :  { %4158 = vmatpush3.bf16.msra.mxu1 %v4997_v38  ;;  %4151 = vmatprep.subr.bf16.mxu0 %v4859_v0 }
  0x5a   :  { %4159 = vmatprep.subr.bf16.mxu1 %v4859_v0  ;;  %4153 = vmatprep.mubr.msk.bf16.mxu0 %vm4860_vm0, %v4859_v0 }
  0x5b   :  { %4161 = vmatprep.mubr.msk.bf16.mxu1 %vm4860_vm0, %v4859_v0 }
  0x5c   :  { %4152 = vmatpush3.bf16.msra.mxu0 %v4986_v37 }
  0x5d   :  { %4160 = vmatpush3.bf16.msra.mxu1 %v5007_v40  ;;  %4165 = vmatprep.subr.bf16.mxu0 %v4859_v0 }
  0x5e   :  { %4173 = vmatprep.subr.bf16.mxu1 %v4859_v0 }
  0xbb   :  { %v78_v42 = vpop.permute.xlu0 %77 }
  0xbc   :  { %vm79_vm3 = vcmp.gt.s32.totalorder %v78_v42, 0  ;;  %vm80_vm4 = vcmp.gt.s32.totalorder %v78_v42, 1  ;;  %vm81_vm5 = vcmp.gt.s32.totalorder %v78_v42, 2  ;;  %vm82_vm6 = vcmp.gt.s32.totalorder %v78_v42, 3 }
  0xbd   :  { %vm83_vm7 = vcmp.gt.s32.totalorder %v78_v42, 4  ;;  %vm84_vm8 = vcmp.gt.s32.totalorder %v78_v42, 5  ;;  %vm85_vm9 = vcmp.gt.s32.totalorder %v78_v42, 6  ;;  %vm86_vm10 = vcmp.gt.s32.totalorder %v78_v42, 7 }
  0xbe   :  { %v3803_v43 = vsel %vm79_vm3, 1.0, %v4859_v0  ;;  %v3804_v44 = vsel %vm80_vm4, 1.0, %v4859_v0  ;;  %v3805_v45 = vsel %vm81_vm5, 1.0, %v4859_v0  ;;  %v3806_v46 = vsel %vm82_vm6, 1.0, %v4859_v0 }
  0xbf   :  { %v3807_v47 = vsel %vm83_vm7, 1.0, %v4859_v0  ;;  %v3808_v48 = vsel %vm84_vm8, 1.0, %v4859_v0  ;;  %v3809_v49 = vsel %vm85_vm9, 1.0, %v4859_v0  ;;  %v3810_v50 = vsel %vm86_vm10, 1.0, %v4859_v0  ;;  %104 = vst.msk [vmem:[#allocation6] sm:$0x3] %vm103_vm2, %v3803_v43 }
  0xc0   :  { %105 = vst.msk [vmem:[#allocation6 + $0x2] sm:$0x3] %vm103_vm2, %v3804_v44  ;;  %106 = vst.msk [vmem:[#allocation6 + $0x4] sm:$0x3] %vm103_vm2, %v3805_v45 }
  0xc1   :  { %107 = vst.msk [vmem:[#allocation6 + $0x6] sm:$0x3] %vm103_vm2, %v3806_v46  ;;  %108 = vst.msk [vmem:[#allocation6 + $0x8] sm:$0x3] %vm103_vm2, %v3807_v47 }
  0xc2   :  { %109 = vst.msk [vmem:[#allocation6 + $0xa] sm:$0x3] %vm103_vm2, %v3808_v48  ;;  %110 = vst.msk [vmem:[#allocation6 + $0xc] sm:$0x3] %vm103_vm2, %v3809_v49 }
  0xc3   :  { %111 = vst.msk [vmem:[#allocation6 + $0xe] sm:$0x3] %vm103_vm2, %v3810_v50 }
 0x11a   :  { %v253_v57 = vpop.f32.mrb[0].mxu0  ;;  %v371_v58 = vpop.f32.mrb[0].mxu1 }
 0x11b   :  { %v254_v59 = vadd.f32 %v3811_v54, %v253_v57  ;;  %v4107_v60 = vpop.f32.mrb[1].mxu0  ;;  %v372_v61 = vadd.f32 %v3816_v55, %v371_v58  ;;  %v4115_v62 = vpop.f32.mrb[1].mxu1 }
 0x11c   :  { %v256_v63 = vpop.f32.mrb[2].mxu0  ;;  %v374_v1 = vpop.f32.mrb[2].mxu1 }
 0x11d   :  { %v262_v2 = vcombine.high %v254_v59, %v254_v59  ;;  %v269_v3 = vrot.slane %v254_v59, %v5059_v56  ;;  %v380_v5 = vcombine.high %v372_v61, %v372_v61  ;;  %v387_v7 = vrot.slane %v372_v61, %v5059_v56  ;;  %v4108_v8 = vpop.f32.mrb[3].mxu0  ;;  %v4116_v9 = vpop.f32.mrb[3].mxu1 }
 0x11e   :  { %v257_v10 = vadd.f32 %v3811_v54, %v256_v63  ;;  %v375_v12 = vadd.f32 %v3816_v55, %v374_v1 }
 0x11f   :  { %v276_v6 = vrot.slane %v262_v2, %v5059_v56  ;;  %v277_v13 = vcombine.high %v269_v3, %v269_v3  ;;  %304 = vst.msk [vmem:[#allocation3] sm:$0x3] %vm103_vm2, %v269_v3  ;;  %v394_v14 = vrot.slane %v380_v5, %v5059_v56  ;;  %v395_v15 = vcombine.high %v387_v7, %v387_v7 }
 0x120   :  { %422 = vst.msk [vmem:[#allocation4] sm:$0x3] %vm103_vm2, %v387_v7  ;;  %v279_v16 = vcombine.high %v257_v10, %v257_v10  ;;  %v286_v17 = vrot.slane %v257_v10, %v5059_v56  ;;  %v397_v18 = vcombine.high %v375_v12, %v375_v12  ;;  %v404_v19 = vrot.slane %v375_v12, %v5059_v56 }
 0x121   :  { %v278_v21 = vcombine.high %v276_v6, %v276_v6  ;;  %305 = vst.msk [vmem:[#allocation3 + $0x2] sm:$0x3] %vm103_vm2, %v277_v13  ;;  %306 = vst.msk [vmem:[#allocation3 + $0x4] sm:$0x3] %vm103_vm2, %v276_v6  ;;  %v396_v22 = vcombine.high %v394_v14, %v394_v14  ;;  %v5103_v6 = vld [vmem:[%s5587_s5] ss:$0 sm:$0xff] }
 0x122   :  { %423 = vst.msk [vmem:[#allocation4 + $0x2] sm:$0x3] %vm103_vm2, %v395_v15  ;;  %424 = vst.msk [vmem:[#allocation4 + $0x4] sm:$0x3] %vm103_vm2, %v394_v14  ;;  %v293_v23 = vrot.slane %v279_v16, %v5059_v56  ;;  %v294_v24 = vcombine.high %v286_v17, %v286_v17  ;;  %v411_v25 = vrot.slane %v397_v18, %v5059_v56  ;;  %v597_v27 = vpop.f32.mrb[4].mxu1  ;;  %v489_v28 = vpop.f32.mrb[4].mxu0 }
 0x123   :  { %308 = vst.msk [vmem:[#allocation3 + $0x8] sm:$0x3] %vm103_vm2, %v286_v17  ;;  %v412_v26 = vcombine.high %v404_v19, %v404_v19  ;;  %426 = vst.msk [vmem:[#allocation4 + $0x8] sm:$0x3] %vm103_vm2, %v404_v19  ;;  %v4131_v29 = vpop.f32.mrb[5].mxu1  ;;  %v490_v30 = vadd.f32 %v3821_v20, %v489_v28  ;;  %v4123_v31 = vpop.f32.mrb[5].mxu0 }
 0x124   :  { %307 = vst.msk [vmem:[#allocation3 + $0x6] sm:$0x3] %vm103_vm2, %v278_v21  ;;  %425 = vst.msk [vmem:[#allocation4 + $0x6] sm:$0x3] %vm103_vm2, %v396_v22  ;;  %v295_v32 = vcombine.high %v293_v23, %v293_v23  ;;  %v413_v34 = vcombine.high %v411_v25, %v411_v25  ;;  %v600_v35 = vpop.f32.mrb[6].mxu1  ;;  %v492_v36 = vpop.f32.mrb[6].mxu0 }
 0x125   :  { %309 = vst.msk [vmem:[#allocation3 + $0xa] sm:$0x3] %vm103_vm2, %v294_v24  ;;  %310 = vst.msk [vmem:[#allocation3 + $0xc] sm:$0x3] %vm103_vm2, %v293_v23  ;;  %v498_v42 = vcombine.high %v490_v30, %v490_v30  ;;  %v505_v43 = vrot.slane %v490_v30, %v5059_v56  ;;  %v4132_v44 = vpop.f32.mrb[7].mxu1  ;;  %v493_v45 = vadd.f32 %v3821_v20, %v492_v36  ;;  %v4124_v46 = vpop.f32.mrb[7].mxu0 }
 0x126   :  { %427 = vst.msk [vmem:[#allocation4 + $0xa] sm:$0x3] %vm103_vm2, %v412_v26  ;;  %428 = vst.msk [vmem:[#allocation4 + $0xc] sm:$0x3] %vm103_vm2, %v411_v25  ;;  %v655_v47 = vld [vmem:[#allocation3] sm:$0x3] }
 0x127   :  { %311 = vst.msk [vmem:[#allocation3 + $0xe] sm:$0x3] %vm103_vm2, %v295_v32  ;;  %429 = vst.msk [vmem:[#allocation4 + $0xe] sm:$0x3] %vm103_vm2, %v413_v34  ;;  %v656_v48 = vadd.f32 %v655_v47, %v597_v27  ;;  %v512_v49 = vrot.slane %v498_v42, %v5059_v56  ;;  %v513_v50 = vcombine.high %v505_v43, %v505_v43  ;;  %v663_v53 = vld [vmem:[#allocation4] sm:$0x3] }
 0x128   :  { %540 = vst.msk [vmem:[#allocation5] sm:$0x3] %vm103_vm2, %v505_v43  ;;  %v515_v51 = vcombine.high %v493_v45, %v493_v45  ;;  %v522_v52 = vrot.slane %v493_v45, %v5059_v56  ;;  %v737_v24 = vld [vmem:[#allocation6] sm:$0x3]  ;;  %v827_v29 = vld [vmem:[#allocation3 + $0x2] sm:$0x3] }
 0x129   :  { %v3829_v54 = vmul.f32 -1.442695, %v656_v48  ;;  %v514_v55 = vcombine.high %v512_v49, %v512_v49  ;;  %541 = vst.msk [vmem:[#allocation5 + $0x2] sm:$0x3] %vm103_vm2, %v513_v50  ;;  %542 = vst.msk [vmem:[#allocation5 + $0x4] sm:$0x3] %vm103_vm2, %v512_v49 }
 0x12a   :  { %v529_v57 = vrot.slane %v515_v51, %v5059_v56  ;;  %v530_v58 = vcombine.high %v522_v52, %v522_v52  ;;  %544 = vst.msk [vmem:[#allocation5 + $0x8] sm:$0x3] %vm103_vm2, %v522_v52  ;;  %v649_v59 = vpop.f32.mrb[8].mxu0  ;;  %v836_v43 = vld [vmem:[#allocation4 + $0x2] sm:$0x3] }
 0x12b   :  { %4583 = vpow2.f32 %v3829_v54  ;;  %543 = vst.msk [vmem:[#allocation5 + $0x6] sm:$0x3] %vm103_vm2, %v514_v55  ;;  %v664_v61 = vadd.f32 %v663_v53, %v649_v59  ;;  %v4139_v62 = vpop.f32.mrb[9].mxu0  ;;  %v724_v63 = vpop.f32.mrb[8].mxu1 }
 0x12c   :  { %v531_v60 = vcombine.high %v529_v57, %v529_v57  ;;  %546 = vst.msk [vmem:[#allocation5 + $0xc] sm:$0x3] %vm103_vm2, %v529_v57  ;;  %545 = vst.msk [vmem:[#allocation5 + $0xa] sm:$0x3] %vm103_vm2, %v530_v58  ;;  %v652_v1 = vpop.f32.mrb[10].mxu0  ;;  %v4147_v2 = vpop.f32.mrb[9].mxu1  ;;  %v725_v14 = vadd.f32 %v5103_v6, %v724_v63 }
 0x12d   :  { %v4140_v3 = vpop.f32.mrb[11].mxu0  ;;  %v727_v5 = vpop.f32.mrb[10].mxu1  ;;  %v3830_v7 = vmul.f32 -1.442695, %v664_v61 }
 0x12e   :  { %547 = vst.msk [vmem:[#allocation5 + $0xe] sm:$0x3] %vm103_vm2, %v531_v60  ;;  %v4148_v8 = vpop.f32.mrb[11].mxu1 }
 0x12f   :  { %4585 = vpow2.f32 %v3830_v7  ;;  %v671_v17 = vld [vmem:[#allocation5] sm:$0x3]  ;;  %v894_v8 = vld [vmem:[#allocation6 + $0x2] sm:$0x3] }
 0x130   :  { %v845_v60 = vld [vmem:[#allocation5 + $0x2] sm:$0x3] }
 0x135   :  { %v4584_v9 = vpop.eup %4583 }
 0x136   :  { %v660_v10 = vadd.f32 1.0, %v4584_v9 }
 0x138   :  { %4587 = vrcp.f32 %v660_v10 }
 0x139   :  { %v4586_v12 = vpop.eup %4585 }
 0x13a   :  { %v668_v13 = vadd.f32 1.0, %v4586_v12 }
 0x13c   :  { %4589 = vrcp.f32 %v668_v13 }
 0x142   :  { %v4588_v15 = vpop.eup %4587 }
 0x143   :  { %v730_v16 = vmul.f32 %v4588_v15, %v725_v14  ;;  %v985_v14 = vld [vmem:[#allocation3 + $0x4] sm:$0x3] }
 0x145   :  { %v731_v18 = vadd.f32 %v730_v16, %v671_v17 }
 0x146   :  { %v4590_v19 = vpop.eup %4589 }
 0x147   :  { %4591 = vtanh.f32 %v731_v18  ;;  %v733_v20 = vsub.f32 1.0, %v4590_v19  ;;  %v735_v22 = vmul.f32 0.0, %v4590_v19 }
 0x151   :  { %v4592_v21 = vpop.eup %4591 }
 0x152   :  { %v734_v23 = vmul.f32 %v4592_v21, %v733_v20 }
 0x154   :  { %v736_v25 = vadd.f32 %v735_v22, %v734_v23  ;;  %v994_v22 = vld [vmem:[#allocation4 + $0x4] sm:$0x3] }
 0x156   :  { %v5106_v26 = vmul.f32 %v737_v24, %v736_v25 }
 0x158   :  { %v740_v27 = vpack.c.bf16 %v5106_v26, %v5106_v26 }
 0x15a   :  { %742 = vst.msk [vmem:[#allocation2] sm:$0x1] %vm741_vm11, %v740_v27  ;;  %4154 = vmatmul.mubr.msk.bf16.vlgmr.msra.gmra.mrb[12].mxu0 %vm215_vm1, %v740_v27  ;;  %4162 = vmatmul.mubr.msk.bf16.vlgmr.msra.gmra.mrb[12].mxu1 %vm215_vm1, %v740_v27 }
 0x15b   :  { %4166 = vmatpush3.bf16.msra.mxu0 %v4999_v39  ;;  %4169 = vmatprep.mubr.msk.bf16.mxu0 %vm4860_vm0, %v4859_v0 }
 0x15c   :  { %4167 = vmatprep.subr.bf16.mxu0 %v4859_v0  ;;  %4174 = vmatpush3.bf16.msra.mxu1 %v4981_v33 }
 0x15d   :  { %4175 = vmatprep.subr.bf16.mxu1 %v4859_v0  ;;  %4177 = vmatprep.mubr.msk.bf16.mxu1 %vm4860_vm0, %v4859_v0 }
 0x15f   :  { %4168 = vmatpush3.bf16.msra.mxu0 %v5013_v41 }
 0x160   :  { %4181 = vmatprep.subr.bf16.mxu0 %v4859_v0  ;;  %4176 = vmatpush3.bf16.msra.mxu1 %v4986_v37 }
 0x161   :  { %4189 = vmatprep.subr.bf16.mxu1 %v4859_v0 }
 0x162   :  { %4170 = vmatmul.mubr.msk.bf16.vlgmr.msra.gmra.mrb[16].mxu0 %vm215_vm1, %v740_v27 }
 0x163   :  { %4182 = vmatpush3.bf16.msra.mxu0 %v4997_v38  ;;  %4185 = vmatprep.mubr.msk.bf16.mxu0 %vm4860_vm0, %v4859_v0 }
 0x164   :  { %4183 = vmatprep.subr.bf16.mxu0 %v4859_v0 }
 0x167   :  { %4184 = vmatpush3.bf16.msra.mxu0 %v5007_v40 }
 0x168   :  { %4197 = vmatprep.subr.bf16.mxu0 %v4859_v0 }
 0x22d   :  { %v780_v28 = vpop.f32.mrb[12].mxu0  ;;  %v820_v30 = vpop.f32.mrb[12].mxu1 }
 0x22e   :  { %v828_v31 = vadd.f32 %v827_v29, %v780_v28  ;;  %v4155_v32 = vpop.f32.mrb[13].mxu0  ;;  %v4163_v34 = vpop.f32.mrb[13].mxu1  ;;  %v837_v46 = vadd.f32 %v836_v43, %v820_v30 }
 0x22f   :  { %v783_v35 = vpop.f32.mrb[14].mxu0  ;;  %v823_v36 = vpop.f32.mrb[14].mxu1 }
 0x230   :  { %v3836_v42 = vmul.f32 -1.442695, %v828_v31  ;;  %v4156_v44 = vpop.f32.mrb[15].mxu0  ;;  %v4164_v45 = vpop.f32.mrb[15].mxu1  ;;  %v3837_v47 = vmul.f32 -1.442695, %v837_v46 }
 0x231   :  { %v1003_v44 = vld [vmem:[#allocation5 + $0x4] sm:$0x3] }
 0x232   :  { %4593 = vpow2.f32 %v3836_v42 }
 0x233   :  { %4595 = vpow2.f32 %v3837_v47 }
 0x235   :  { %v880_v48 = vpop.f32.mrb[16].mxu0 }
 0x236   :  { %v4171_v49 = vpop.f32.mrb[17].mxu0  ;;  %v881_v57 = vadd.f32 %v5103_v6, %v880_v48 }
 0x237   :  { %v883_v50 = vpop.f32.mrb[18].mxu0 }
 0x238   :  { %v4172_v51 = vpop.f32.mrb[19].mxu0 }
 0x23c   :  { %v4594_v52 = vpop.eup %4593 }
 0x23d   :  { %v832_v53 = vadd.f32 1.0, %v4594_v52  ;;  %v4596_v54 = vpop.eup %4595 }
 0x23e   :  { %v841_v55 = vadd.f32 1.0, %v4596_v54 }
 0x23f   :  { %4597 = vrcp.f32 %v832_v53  ;;  %v1052_v53 = vld [vmem:[#allocation6 + $0x4] sm:$0x3] }
 0x240   :  { %4599 = vrcp.f32 %v841_v55 }
 0x249   :  { %v4598_v58 = vpop.eup %4597 }
 0x24a   :  { %v886_v59 = vmul.f32 %v4598_v58, %v881_v57  ;;  %v4600_v62 = vpop.eup %4599 }
 0x24b   :  { %v889_v63 = vsub.f32 1.0, %v4600_v62  ;;  %v891_v2 = vmul.f32 %v4600_v62, %v5106_v26 }
 0x24c   :  { %v887_v61 = vadd.f32 %v886_v59, %v845_v60  ;;  %v1143_v59 = vld [vmem:[#allocation3 + $0x6] sm:$0x3] }
 0x24e   :  { %4601 = vtanh.f32 %v887_v61 }
 0x258   :  { %v4602_v1 = vpop.eup %4601 }
 0x259   :  { %v890_v3 = vmul.f32 %v4602_v1, %v889_v63 }
 0x25b   :  { %v892_v5 = vadd.f32 %v891_v2, %v890_v3 }
 0x25d   :  { %v895_v7 = vsub.f32 %v892_v5, %v5106_v26  ;;  %v1152_v5 = vld [vmem:[#allocation4 + $0x6] sm:$0x3] }
 0x25f   :  { %v896_v9 = vmul.f32 %v895_v7, %v894_v8 }
 0x261   :  { %v897_v10 = vadd.f32 %v896_v9, %v5106_v26 }
 0x263   :  { %v898_v12 = vpack.c.bf16 %v897_v10, %v897_v10 }
 0x265   :  { %900 = vst.msk [vmem:[#allocation2 + $0x1] sm:$0x1] %vm741_vm11, %v898_v12  ;;  %4178 = vmatmul.mubr.msk.bf16.vlgmr.msra.gmra.mrb[16].mxu1 %vm215_vm1, %v898_v12  ;;  %4186 = vmatmul.mubr.msk.bf16.vlgmr.msra.gmra.mrb[20].mxu0 %vm215_vm1, %v898_v12 }
 0x266   :  { %4190 = vmatpush3.bf16.msra.mxu1 %v4999_v39  ;;  %4193 = vmatprep.mubr.msk.bf16.mxu1 %vm4860_vm0, %v4859_v0 }
 0x267   :  { %4191 = vmatprep.subr.bf16.mxu1 %v4859_v0  ;;  %4198 = vmatpush3.bf16.msra.mxu0 %v4981_v33 }
 0x268   :  { %4199 = vmatprep.subr.bf16.mxu0 %v4859_v0  ;;  %4201 = vmatprep.mubr.msk.bf16.mxu0 %vm4860_vm0, %v4859_v0 }
 0x26a   :  { %4192 = vmatpush3.bf16.msra.mxu1 %v5013_v41 }
 0x26b   :  { %4205 = vmatprep.subr.bf16.mxu1 %v4859_v0  ;;  %4200 = vmatpush3.bf16.msra.mxu0 %v4986_v37 }
 0x26c   :  { %4213 = vmatprep.subr.bf16.mxu0 %v4859_v0 }
 0x26d   :  { %4194 = vmatmul.mubr.msk.bf16.vlgmr.msra.gmra.mrb[20].mxu1 %vm215_vm1, %v898_v12 }
 0x26e   :  { %4206 = vmatpush3.bf16.msra.mxu1 %v4997_v38  ;;  %4209 = vmatprep.mubr.msk.bf16.mxu1 %vm4860_vm0, %v4859_v0 }
 0x26f   :  { %4207 = vmatprep.subr.bf16.mxu1 %v4859_v0 }
 0x272   :  { %4208 = vmatpush3.bf16.msra.mxu1 %v5007_v40 }
 0x273   :  { %4221 = vmatprep.subr.bf16.mxu1 %v4859_v0 }
 0x338   :  { %v938_v13 = vpop.f32.mrb[16].mxu1  ;;  %v978_v15 = vpop.f32.mrb[20].mxu0 }
 0x339   :  { %v986_v16 = vadd.f32 %v985_v14, %v938_v13  ;;  %v4179_v17 = vpop.f32.mrb[17].mxu1  ;;  %v4187_v18 = vpop.f32.mrb[21].mxu0  ;;  %v995_v25 = vadd.f32 %v994_v22, %v978_v15 }
 0x33a   :  { %v941_v19 = vpop.f32.mrb[18].mxu1  ;;  %v981_v20 = vpop.f32.mrb[22].mxu0 }
 0x33b   :  { %v3841_v21 = vmul.f32 -1.442695, %v986_v16  ;;  %v4180_v23 = vpop.f32.mrb[19].mxu1  ;;  %v4188_v24 = vpop.f32.mrb[23].mxu0  ;;  %v3842_v26 = vmul.f32 -1.442695, %v995_v25 }
 0x33c   :  { %v1161_v23 = vld [vmem:[#allocation5 + $0x6] sm:$0x3] }
 0x33d   :  { %4603 = vpow2.f32 %v3841_v21 }
 0x33e   :  { %4605 = vpow2.f32 %v3842_v26 }
 0x340   :  { %v1038_v27 = vpop.f32.mrb[20].mxu1 }
 0x341   :  { %v4195_v28 = vpop.f32.mrb[21].mxu1  ;;  %v1039_v36 = vadd.f32 %v5103_v6, %v1038_v27 }
 0x342   :  { %v1041_v29 = vpop.f32.mrb[22].mxu1 }
 0x343   :  { %v4196_v30 = vpop.f32.mrb[23].mxu1 }
 0x347   :  { %v4604_v31 = vpop.eup %4603 }
 0x348   :  { %v990_v32 = vadd.f32 1.0, %v4604_v31  ;;  %v4606_v34 = vpop.eup %4605 }
 0x349   :  { %v999_v35 = vadd.f32 1.0, %v4606_v34 }
 0x34a   :  { %4607 = vrcp.f32 %v990_v32  ;;  %v1210_v32 = vld [vmem:[#allocation6 + $0x6] sm:$0x3] }
 0x34b   :  { %4609 = vrcp.f32 %v999_v35 }
 0x354   :  { %v4608_v42 = vpop.eup %4607 }
 0x355   :  { %v1044_v43 = vmul.f32 %v4608_v42, %v1039_v36  ;;  %v4610_v46 = vpop.eup %4609 }
 0x356   :  { %v1047_v47 = vsub.f32 1.0, %v4610_v46  ;;  %v1049_v49 = vmul.f32 %v4610_v46, %v897_v10 }
 0x357   :  { %v1045_v45 = vadd.f32 %v1044_v43, %v1003_v44  ;;  %v1301_v43 = vld [vmem:[#allocation3 + $0x8] sm:$0x3] }
 0x359   :  { %4611 = vtanh.f32 %v1045_v45 }
 0x363   :  { %v4612_v48 = vpop.eup %4611 }
 0x364   :  { %v1048_v50 = vmul.f32 %v4612_v48, %v1047_v47 }
 0x366   :  { %v1050_v51 = vadd.f32 %v1049_v49, %v1048_v50 }
 0x368   :  { %v1053_v52 = vsub.f32 %v1050_v51, %v897_v10  ;;  %v1310_v51 = vld [vmem:[#allocation4 + $0x8] sm:$0x3] }
 0x36a   :  { %v1054_v54 = vmul.f32 %v1053_v52, %v1052_v53 }
 0x36c   :  { %v1055_v55 = vadd.f32 %v1054_v54, %v897_v10 }
 0x36e   :  { %v1056_v57 = vpack.c.bf16 %v1055_v55, %v1055_v55 }
 0x370   :  { %1058 = vst.msk [vmem:[#allocation2 + $0x2] sm:$0x1] %vm741_vm11, %v1056_v57  ;;  %4202 = vmatmul.mubr.msk.bf16.vlgmr.msra.gmra.mrb[24].mxu0 %vm215_vm1, %v1056_v57  ;;  %4210 = vmatmul.mubr.msk.bf16.vlgmr.msra.gmra.mrb[24].mxu1 %vm215_vm1, %v1056_v57 }
 0x371   :  { %4214 = vmatpush3.bf16.msra.mxu0 %v4999_v39  ;;  %4217 = vmatprep.mubr.msk.bf16.mxu0 %vm4860_vm0, %v4859_v0 }
 0x372   :  { %4215 = vmatprep.subr.bf16.mxu0 %v4859_v0  ;;  %4222 = vmatpush3.bf16.msra.mxu1 %v4981_v33 }
 0x373   :  { %4223 = vmatprep.subr.bf16.mxu1 %v4859_v0  ;;  %4225 = vmatprep.mubr.msk.bf16.mxu1 %vm4860_vm0, %v4859_v0 }
 0x375   :  { %4216 = vmatpush3.bf16.msra.mxu0 %v5013_v41 }
 0x376   :  { %4229 = vmatprep.subr.bf16.mxu0 %v4859_v0  ;;  %4224 = vmatpush3.bf16.msra.mxu1 %v4986_v37 }
 0x377   :  { %4237 = vmatprep.subr.bf16.mxu1 %v4859_v0 }
 0x378   :  { %4218 = vmatmul.mubr.msk.bf16.vlgmr.msra.gmra.mrb[28].mxu0 %vm215_vm1, %v1056_v57 }
 0x379   :  { %4230 = vmatpush3.bf16.msra.mxu0 %v4997_v38  ;;  %4233 = vmatprep.mubr.msk.bf16.mxu0 %vm4860_vm0, %v4859_v0 }
 0x37a   :  { %4231 = vmatprep.subr.bf16.mxu0 %v4859_v0 }
 0x37d   :  { %4232 = vmatpush3.bf16.msra.mxu0 %v5007_v40 }
 0x37e   :  { %4245 = vmatprep.subr.bf16.mxu0 %v4859_v0 }
 0x443   :  { %v1096_v58 = vpop.f32.mrb[24].mxu0  ;;  %v1136_v60 = vpop.f32.mrb[24].mxu1 }
 0x444   :  { %v1144_v61 = vadd.f32 %v1143_v59, %v1096_v58  ;;  %v4203_v62 = vpop.f32.mrb[25].mxu0  ;;  %v4211_v63 = vpop.f32.mrb[25].mxu1  ;;  %v1153_v9 = vadd.f32 %v1152_v5, %v1136_v60 }
 0x445   :  { %v1099_v1 = vpop.f32.mrb[26].mxu0  ;;  %v1139_v2 = vpop.f32.mrb[26].mxu1 }
 0x446   :  { %v3846_v3 = vmul.f32 -1.442695, %v1144_v61  ;;  %v4204_v7 = vpop.f32.mrb[27].mxu0  ;;  %v4212_v8 = vpop.f32.mrb[27].mxu1  ;;  %v3847_v10 = vmul.f32 -1.442695, %v1153_v9 }
 0x447   :  { %v1319_v7 = vld [vmem:[#allocation5 + $0x8] sm:$0x3] }
 0x448   :  { %4613 = vpow2.f32 %v3846_v3 }
 0x449   :  { %4615 = vpow2.f32 %v3847_v10 }
 0x44b   :  { %v1196_v12 = vpop.f32.mrb[28].mxu0 }
 0x44c   :  { %v4219_v13 = vpop.f32.mrb[29].mxu0  ;;  %v1197_v20 = vadd.f32 %v5103_v6, %v1196_v12 }
 0x44d   :  { %v1199_v14 = vpop.f32.mrb[30].mxu0 }
 0x44e   :  { %v4220_v15 = vpop.f32.mrb[31].mxu0 }
 0x452   :  { %v4614_v16 = vpop.eup %4613 }
 0x453   :  { %v1148_v17 = vadd.f32 1.0, %v4614_v16  ;;  %v4616_v18 = vpop.eup %4615 }
 0x454   :  { %v1157_v19 = vadd.f32 1.0, %v4616_v18 }
 0x455   :  { %4617 = vrcp.f32 %v1148_v17  ;;  %v1368_v17 = vld [vmem:[#allocation6 + $0x8] sm:$0x3] }
 0x456   :  { %4619 = vrcp.f32 %v1157_v19 }
 0x45f   :  { %v4618_v21 = vpop.eup %4617 }
 0x460   :  { %v1202_v22 = vmul.f32 %v4618_v21, %v1197_v20  ;;  %v4620_v25 = vpop.eup %4619  ;;  %v1459_v21 = vld [vmem:[#allocation3 + $0xa] sm:$0x3] }
 0x461   :  { %v1205_v26 = vsub.f32 1.0, %v4620_v25  ;;  %v1207_v28 = vmul.f32 %v4620_v25, %v1055_v55 }
 0x462   :  { %v1203_v24 = vadd.f32 %v1202_v22, %v1161_v23 }
 0x464   :  { %4621 = vtanh.f32 %v1203_v24 }
 0x46e   :  { %v4622_v27 = vpop.eup %4621 }
 0x46f   :  { %v1206_v29 = vmul.f32 %v4622_v27, %v1205_v26 }
 0x471   :  { %v1208_v30 = vadd.f32 %v1207_v28, %v1206_v29  ;;  %v1468_v28 = vld [vmem:[#allocation4 + $0xa] sm:$0x3] }
 0x473   :  { %v1211_v31 = vsub.f32 %v1208_v30, %v1055_v55 }
 0x475   :  { %v1212_v34 = vmul.f32 %v1211_v31, %v1210_v32 }
 0x477   :  { %v1213_v35 = vadd.f32 %v1212_v34, %v1055_v55 }
 0x479   :  { %v1214_v36 = vpack.c.bf16 %v1213_v35, %v1213_v35 }
 0x47b   :  { %1216 = vst.msk [vmem:[#allocation2 + $0x3] sm:$0x1] %vm741_vm11, %v1214_v36  ;;  %4226 = vmatmul.mubr.msk.bf16.vlgmr.msra.gmra.mrb[28].mxu1 %vm215_vm1, %v1214_v36  ;;  %4234 = vmatmul.mubr.msk.bf16.vlgmr.msra.gmra.mrb[32].mxu0 %vm215_vm1, %v1214_v36 }
 0x47c   :  { %4238 = vmatpush3.bf16.msra.mxu1 %v4999_v39  ;;  %4241 = vmatprep.mubr.msk.bf16.mxu1 %vm4860_vm0, %v4859_v0 }
 0x47d   :  { %4239 = vmatprep.subr.bf16.mxu1 %v4859_v0  ;;  %4246 = vmatpush3.bf16.msra.mxu0 %v4981_v33 }
 0x47e   :  { %4247 = vmatprep.subr.bf16.mxu0 %v4859_v0  ;;  %4249 = vmatprep.mubr.msk.bf16.mxu0 %vm4860_vm0, %v4859_v0 }
 0x480   :  { %4240 = vmatpush3.bf16.msra.mxu1 %v5013_v41 }
 0x481   :  { %4253 = vmatprep.subr.bf16.mxu1 %v4859_v0  ;;  %4248 = vmatpush3.bf16.msra.mxu0 %v4986_v37 }
 0x482   :  { %4261 = vmatprep.subr.bf16.mxu0 %v4859_v0 }
 0x483   :  { %4242 = vmatmul.mubr.msk.bf16.vlgmr.msra.gmra.mrb[32].mxu1 %vm215_vm1, %v1214_v36 }
 0x484   :  { %4254 = vmatpush3.bf16.msra.mxu1 %v4997_v38  ;;  %4257 = vmatprep.mubr.msk.bf16.mxu1 %vm4860_vm0, %v4859_v0 }
 0x485   :  { %4255 = vmatprep.subr.bf16.mxu1 %v4859_v0 }
 0x488   :  { %4256 = vmatpush3.bf16.msra.mxu1 %v5007_v40 }
 0x489   :  { %4269 = vmatprep.subr.bf16.mxu1 %v4859_v0 }
 0x54e   :  { %v1254_v42 = vpop.f32.mrb[28].mxu1  ;;  %v1294_v44 = vpop.f32.mrb[32].mxu0 }
 0x54f   :  { %v1302_v45 = vadd.f32 %v1301_v43, %v1254_v42  ;;  %v4227_v46 = vpop.f32.mrb[29].mxu1  ;;  %v4235_v47 = vpop.f32.mrb[33].mxu0  ;;  %v1311_v54 = vadd.f32 %v1310_v51, %v1294_v44 }
 0x550   :  { %v1257_v48 = vpop.f32.mrb[30].mxu1  ;;  %v1297_v49 = vpop.f32.mrb[34].mxu0 }
 0x551   :  { %v3851_v50 = vmul.f32 -1.442695, %v1302_v45  ;;  %v4228_v52 = vpop.f32.mrb[31].mxu1  ;;  %v4236_v53 = vpop.f32.mrb[35].mxu0  ;;  %v3852_v55 = vmul.f32 -1.442695, %v1311_v54 }
 0x552   :  { %v1477_v49 = vld [vmem:[#allocation5 + $0xa] sm:$0x3] }
 0x553   :  { %4623 = vpow2.f32 %v3851_v50 }
 0x554   :  { %4625 = vpow2.f32 %v3852_v55 }
 0x556   :  { %v1354_v57 = vpop.f32.mrb[32].mxu1 }
 0x557   :  { %v4243_v58 = vpop.f32.mrb[33].mxu1  ;;  %v1355_v2 = vadd.f32 %v5103_v6, %v1354_v57 }
 0x558   :  { %v1357_v59 = vpop.f32.mrb[34].mxu1 }
 0x559   :  { %v4244_v60 = vpop.f32.mrb[35].mxu1  ;;  %v1526_v59 = vld [vmem:[#allocation6 + $0xa] sm:$0x3] }
 0x55d   :  { %v4624_v61 = vpop.eup %4623 }
 0x55e   :  { %v1306_v62 = vadd.f32 1.0, %v4624_v61  ;;  %v4626_v63 = vpop.eup %4625 }
 0x55f   :  { %v1315_v1 = vadd.f32 1.0, %v4626_v63  ;;  %v4751_v63 = vld [vmem:[#allocation12] sm:$0xff]  }
 0x560   :  { %4627 = vrcp.f32 %v1306_v62 }
 0x561   :  { %4629 = vrcp.f32 %v1315_v1  ;;  %v4752_v1 = vld [vmem:[#allocation12 + $0x8] sm:$0xff]  }
 0x56a   :  { %v4628_v3 = vpop.eup %4627 }
 0x56b   :  { %v1360_v5 = vmul.f32 %v4628_v3, %v1355_v2  ;;  %v4630_v9 = vpop.eup %4629  ;;  %v1617_v2 = vld [vmem:[#allocation3 + $0xc] sm:$0x3] }
 0x56c   :  { %v1363_v10 = vsub.f32 1.0, %v4630_v9  ;;  %v1365_v13 = vmul.f32 %v4630_v9, %v1213_v35 }
 0x56d   :  { %v1361_v8 = vadd.f32 %v1360_v5, %v1319_v7 }
 0x56f   :  { %4631 = vtanh.f32 %v1361_v8 }
 0x579   :  { %v4632_v12 = vpop.eup %4631 }
 0x57a   :  { %v1364_v14 = vmul.f32 %v4632_v12, %v1363_v10 }
 0x57c   :  { %v1366_v15 = vadd.f32 %v1365_v13, %v1364_v14  ;;  %v1626_v13 = vld [vmem:[#allocation4 + $0xc] sm:$0x3] }
 0x57e   :  { %v1369_v16 = vsub.f32 %v1366_v15, %v1213_v35 }
 0x580   :  { %v1370_v18 = vmul.f32 %v1369_v16, %v1368_v17 }
 0x582   :  { %v1371_v19 = vadd.f32 %v1370_v18, %v1213_v35 }
 0x584   :  { %v1372_v20 = vpack.c.bf16 %v1371_v19, %v1371_v19 }
 0x586   :  { %1374 = vst.msk [vmem:[#allocation2 + $0x4] sm:$0x1] %vm741_vm11, %v1372_v20  ;;  %4250 = vmatmul.mubr.msk.bf16.vlgmr.msra.gmra.mrb[36].mxu0 %vm215_vm1, %v1372_v20  ;;  %4258 = vmatmul.mubr.msk.bf16.vlgmr.msra.gmra.mrb[36].mxu1 %vm215_vm1, %v1372_v20 }
 0x587   :  { %4262 = vmatpush3.bf16.msra.mxu0 %v4999_v39  ;;  %4265 = vmatprep.mubr.msk.bf16.mxu0 %vm4860_vm0, %v4859_v0 }
 0x588   :  { %4263 = vmatprep.subr.bf16.mxu0 %v4859_v0  ;;  %4270 = vmatpush3.bf16.msra.mxu1 %v4981_v33 }
 0x589   :  { %4271 = vmatprep.subr.bf16.mxu1 %v4859_v0  ;;  %4273 = vmatprep.mubr.msk.bf16.mxu1 %vm4860_vm0, %v4859_v0 }
 0x58b   :  { %4264 = vmatpush3.bf16.msra.mxu0 %v5013_v41 }
 0x58c   :  { %4277 = vmatprep.subr.bf16.mxu0 %v4859_v0  ;;  %4272 = vmatpush3.bf16.msra.mxu1 %v4986_v37 }
 0x58d   :  { %4285 = vmatprep.subr.bf16.mxu1 %v4859_v0 }
 0x58e   :  { %4266 = vmatmul.mubr.msk.bf16.vlgmr.msra.gmra.mrb[40].mxu0 %vm215_vm1, %v1372_v20 }
 0x58f   :  { %4278 = vmatpush3.bf16.msra.mxu0 %v4997_v38  ;;  %4281 = vmatprep.mubr.msk.bf16.mxu0 %vm4860_vm0, %v4859_v0 }
 0x590   :  { %4279 = vmatprep.subr.bf16.mxu0 %v4859_v0 }
 0x593   :  { %4280 = vmatpush3.bf16.msra.mxu0 %v5007_v40 }
 0x594   :  { %4293 = vmatprep.subr.bf16.mxu0 %v4859_v0 }
 0x659   :  { %v1412_v33 = vpop.f32.mrb[36].mxu0  ;;  %v1452_v22 = vpop.f32.mrb[36].mxu1 }
 0x65a   :  { %v1460_v23 = vadd.f32 %v1459_v21, %v1412_v33  ;;  %v4251_v37 = vpop.f32.mrb[37].mxu0  ;;  %v4259_v24 = vpop.f32.mrb[37].mxu1  ;;  %v1469_v30 = vadd.f32 %v1468_v28, %v1452_v22 }
 0x65b   :  { %v1415_v25 = vpop.f32.mrb[38].mxu0  ;;  %v1455_v26 = vpop.f32.mrb[38].mxu1 }
 0x65c   :  { %v3856_v27 = vmul.f32 -1.442695, %v1460_v23  ;;  %v4252_v38 = vpop.f32.mrb[39].mxu0  ;;  %v4260_v29 = vpop.f32.mrb[39].mxu1  ;;  %v3857_v31 = vmul.f32 -1.442695, %v1469_v30 }
 0x65d   :  { %v1635_v26 = vld [vmem:[#allocation5 + $0xc] sm:$0x3] }
 0x65e   :  { %4633 = vpow2.f32 %v3856_v27 }
 0x65f   :  { %4635 = vpow2.f32 %v3857_v31 }
 0x661   :  { %v1512_v32 = vpop.f32.mrb[40].mxu0 }
 0x662   :  { %v4267_v34 = vpop.f32.mrb[41].mxu0  ;;  %v1513_v46 = vadd.f32 %v5103_v6, %v1512_v32 }
 0x663   :  { %v1515_v35 = vpop.f32.mrb[42].mxu0 }
 0x664   :  { %v4268_v36 = vpop.f32.mrb[43].mxu0  ;;  %v1684_v35 = vld [vmem:[#allocation6 + $0xc] sm:$0x3] }
 0x668   :  { %v4634_v42 = vpop.eup %4633 }
 0x669   :  { %v1464_v43 = vadd.f32 1.0, %v4634_v42  ;;  %v4636_v44 = vpop.eup %4635 }
 0x66a   :  { %v1473_v45 = vadd.f32 1.0, %v4636_v44  ;;  %v4754_v44 = vld [vmem:[#allocation12 + $0x20] sm:$0xff]  }
 0x66b   :  { %4637 = vrcp.f32 %v1464_v43 }
 0x66c   :  { %4639 = vrcp.f32 %v1473_v45  ;;  %v4755_v45 = vld [vmem:[#allocation12 + $0x28] sm:$0xff]  }
 0x675   :  { %v4638_v47 = vpop.eup %4637 }
 0x676   :  { %v1518_v48 = vmul.f32 %v4638_v47, %v1513_v46  ;;  %v4640_v51 = vpop.eup %4639  ;;  %v4569_v46 = vld [vmem:[#allocation10 + $0x30] sm:$0xff]   ;;  %v4570_v47 = vld [vmem:[#allocation10 + $0x40] sm:$0xff]  }
 0x677   :  { %v1521_v52 = vsub.f32 1.0, %v4640_v51  ;;  %v1523_v54 = vmul.f32 %v4640_v51, %v1371_v19  ;;  %v1775_v51 = vld [vmem:[#allocation3 + $0xe] sm:$0x3] }
 0x678   :  { %v1519_v50 = vadd.f32 %v1518_v48, %v1477_v49  ;;  %v4571_v48 = vld [vmem:[#allocation10 + $0x38] sm:$0xff]   ;;  %v4572_v49 = vld [vmem:[#allocation10 + $0x48] sm:$0xff]  }
 0x67a   :  { %4641 = vtanh.f32 %v1519_v50 }
 0x684   :  { %v4642_v53 = vpop.eup %4641 }
 0x685   :  { %v1522_v55 = vmul.f32 %v4642_v53, %v1521_v52 }
 0x687   :  { %v1524_v57 = vadd.f32 %v1523_v54, %v1522_v55 }
 0x689   :  { %v1527_v58 = vsub.f32 %v1524_v57, %v1371_v19 }
 0x68b   :  { %v1528_v60 = vmul.f32 %v1527_v58, %v1526_v59 }
 0x68d   :  { %v5228_v61 = vadd.f32 %v1528_v60, %v1371_v19  ;;  %v1784_v60 = vld [vmem:[#allocation4 + $0xe] sm:$0x3] }
 0x68f   :  { %v1530_v62 = vpack.c.bf16 %v5228_v61, %v5228_v61 }
 0x691   :  { %1532 = vst.msk [vmem:[#allocation2 + $0x5] sm:$0x1] %vm741_vm11, %v1530_v62  ;;  %4274 = vmatmul.mubr.msk.bf16.vlgmr.msra.gmra.mrb[40].mxu1 %vm215_vm1, %v1530_v62  ;;  %4282 = vmatmul.mubr.msk.bf16.vlgmr.msra.gmra.mrb[44].mxu0 %vm215_vm1, %v1530_v62 }
 0x692   :  { %4286 = vmatpush3.bf16.msra.mxu1 %v4999_v39  ;;  %4289 = vmatprep.mubr.msk.bf16.mxu1 %vm4860_vm0, %v4859_v0  ;;  %v4753_v39 = vld [vmem:[#allocation12 + $0x10] sm:$0xff]  }
 0x693   :  { %4287 = vmatprep.subr.bf16.mxu1 %v4859_v0  ;;  %4294 = vmatpush3.bf16.msra.mxu0 %v4751_v63 }
 0x694   :  { %4295 = vmatprep.subr.bf16.mxu0 %v4859_v0  ;;  %4297 = vmatprep.mubr.msk.bf16.mxu0 %vm4860_vm0, %v4859_v0 }
 0x696   :  { %4288 = vmatpush3.bf16.msra.mxu1 %v5013_v41 }
 0x697   :  { %4301 = vmatprep.subr.bf16.mxu1 %v4859_v0  ;;  %4296 = vmatpush3.bf16.msra.mxu0 %v4752_v1 }
 0x698   :  { %4309 = vmatprep.subr.bf16.mxu0 %v4859_v0 }
 0x699   :  { %4290 = vmatmul.mubr.msk.bf16.vlgmr.msra.gmra.mrb[44].mxu1 %vm215_vm1, %v1530_v62 }
 0x69a   :  { %4302 = vmatpush3.bf16.msra.mxu1 %v4753_v39  ;;  %4305 = vmatprep.mubr.msk.bf16.mxu1 %vm4860_vm0, %v4859_v0 }
 0x69b   :  { %4303 = vmatprep.subr.bf16.mxu1 %v4859_v0 }
 0x69e   :  { %4304 = vmatpush3.bf16.msra.mxu1 %v5007_v40 }
 0x69f   :  { %4317 = vmatprep.subr.bf16.mxu1 %v4859_v0 }
 0x764   :  { %v1570_v41 = vpop.f32.mrb[40].mxu1  ;;  %v1610_v3 = vpop.f32.mrb[44].mxu0 }
 0x765   :  { %v1618_v5 = vadd.f32 %v1617_v2, %v1570_v41  ;;  %v4275_v7 = vpop.f32.mrb[41].mxu1  ;;  %v4283_v8 = vpop.f32.mrb[45].mxu0  ;;  %v1627_v16 = vadd.f32 %v1626_v13, %v1610_v3 }
 0x766   :  { %v1573_v9 = vpop.f32.mrb[42].mxu1  ;;  %v1613_v10 = vpop.f32.mrb[46].mxu0 }
 0x767   :  { %v3861_v12 = vmul.f32 -1.442695, %v1618_v5  ;;  %v4276_v14 = vpop.f32.mrb[43].mxu1  ;;  %v4284_v15 = vpop.f32.mrb[47].mxu0  ;;  %v3862_v17 = vmul.f32 -1.442695, %v1627_v16 }
 0x768   :  { %v1793_v14 = vld [vmem:[#allocation5 + $0xe] sm:$0x3] }
 0x769   :  { %4643 = vpow2.f32 %v3861_v12 }
 0x76a   :  { %4645 = vpow2.f32 %v3862_v17 }
 0x76c   :  { %v1670_v18 = vpop.f32.mrb[44].mxu1 }
 0x76d   :  { %v4291_v19 = vpop.f32.mrb[45].mxu1  ;;  %v1671_v37 = vadd.f32 %v5103_v6, %v1670_v18 }
 0x76e   :  { %v1673_v40 = vpop.f32.mrb[46].mxu1 }
 0x76f   :  { %v4292_v20 = vpop.f32.mrb[47].mxu1 }
 0x773   :  { %v4644_v33 = vpop.eup %4643 }
 0x774   :  { %v1622_v21 = vadd.f32 1.0, %v4644_v33  ;;  %v4646_v22 = vpop.eup %4645 }
 0x775   :  { %v1631_v23 = vadd.f32 1.0, %v4646_v22 }
 0x776   :  { %4647 = vrcp.f32 %v1622_v21  ;;  %v1842_v21 = vld [vmem:[#allocation6 + $0xe] sm:$0x3] }
 0x777   :  { %4649 = vrcp.f32 %v1631_v23 }
 0x780   :  { %v4648_v24 = vpop.eup %4647 }
 0x781   :  { %v1676_v25 = vmul.f32 %v4648_v24, %v1671_v37  ;;  %v4650_v28 = vpop.eup %4649  ;;  %v1869_v37 = vld [vmem:[#allocation2 + $0x3] sm:$0x1]  ;;  %v1867_v24 = vld [vmem:[#allocation2 + $0x1] sm:$0x1] }
 0x782   :  { %v1679_v38 = vsub.f32 1.0, %v4650_v28  ;;  %v1681_v30 = vmul.f32 %v4650_v28, %v5228_v61  ;;  %v1871_v28 = vld [vmem:[#allocation2 + $0x5] sm:$0x1] }
 0x783   :  { %v1677_v27 = vadd.f32 %v1676_v25, %v1635_v26  ;;  %v1868_v25 = vld [vmem:[#allocation2 + $0x2] sm:$0x1] }
 0x784   :  { %v1896_v26 = vcombine.low %v1868_v25, %v1869_v37 }
 0x785   :  { %4651 = vtanh.f32 %v1677_v27  ;;  %v1866_v27 = vld [vmem:[#allocation2] sm:$0x1] }
 0x78f   :  { %v4652_v29 = vpop.eup %4651 }
 0x790   :  { %v1680_v31 = vmul.f32 %v4652_v29, %v1679_v38  ;;  %v1895_v38 = vcombine.low %v1866_v27, %v1867_v24  ;;  %v1870_v29 = vld [vmem:[#allocation2 + $0x4] sm:$0x1] }
 0x792   :  { %v1682_v32 = vadd.f32 %v1681_v30, %v1680_v31  ;;  %v1897_v30 = vcombine.low %v1870_v29, %v1871_v28  ;;  %v1912_v31 = vrot.slane %v1896_v26, %v4970_v11 }
 0x794   :  { %v1685_v34 = vsub.f32 %v1682_v32, %v5228_v61 }
 0x796   :  { %v1686_v36 = vmul.f32 %v1685_v34, %v1684_v35 }
 0x798   :  { %v5255_v42 = vadd.f32 %v1686_v36, %v5228_v61  ;;  %v1905_v36 = vrot.slane %v1895_v38, %v4970_v11 }
 0x79a   :  { %v1688_v43 = vpack.c.bf16 %v5255_v42, %v5255_v42 }
 0x79c   :  { %1690 = vst.msk [vmem:[#allocation2 + $0x6] sm:$0x1] %vm741_vm11, %v1688_v43  ;;  %4298 = vmatmul.mubr.msk.bf16.vlgmr.msra.gmra.mrb[48].mxu0 %vm215_vm1, %v1688_v43  ;;  %4306 = vmatmul.mubr.msk.bf16.vlgmr.msra.gmra.mrb[48].mxu1 %vm215_vm1, %v1688_v43 }
 0x79d   :  { %4310 = vmatpush3.bf16.msra.mxu0 %v4754_v44  ;;  %4313 = vmatprep.mubr.msk.bf16.mxu0 %vm4860_vm0, %v4859_v0  ;;  %v1927_v44 = vcombine.low %v1905_v36, %v1912_v31 }
 0x79e   :  { %4311 = vmatprep.subr.bf16.mxu0 %v4859_v0  ;;  %4321 = vmatprep.mubr.msk.bf16.mxu1 %vm4860_vm0, %v4859_v0 }
 0x79f   :  { %4318 = vmatpush3.bf16.msra.mxu1 %v4569_v46  ;;  %v1935_v46 = vrot.slane %v1927_v44, %v4970_v11 }
 0x7a0   :  { %4319 = vmatprep.subr.bf16.mxu1 %v4859_v0 }
 0x7a1   :  { %4312 = vmatpush3.bf16.msra.mxu0 %v4755_v45 }
 0x7a2   :  { %4325 = vmatprep.subr.bf16.mxu0 %v4859_v0 }
 0x7a3   :  { %4320 = vmatpush3.bf16.msra.mxu1 %v4571_v48  ;;  %v1872_v32 = vld [vmem:[#allocation2 + $0x6] sm:$0x1] }
 0x7a4   :  { %4314 = vmatmul.mubr.msk.bf16.vlgmr.msra.gmra.mrb[52].mxu0 %vm215_vm1, %v1688_v43  ;;  %4333 = vmatprep.subr.bf16.mxu1 %v4859_v0  ;;  %v4573_v48 = vld [vmem:[#allocation10 + $0x50] sm:$0xff]  }
 0x7a5   :  { %4329 = vmatprep.mubr.msk.bf16.mxu0 %vm4860_vm0, %v4859_v0  ;;  %4326 = vmatpush3.bf16.msra.mxu0 %v4570_v47 }
 0x7a6   :  { %4327 = vmatprep.subr.bf16.mxu0 %v4859_v0 }
 0x7a9   :  { %4328 = vmatpush3.bf16.msra.mxu0 %v4572_v49  ;;  %v5286_v49 = vld [vmem:[#allocation12 + $0x30] sm:$0xff]  }
 0x7aa   :  { %4341 = vmatprep.subr.bf16.mxu0 %v4859_v0 }
 0x86f   :  { %v1728_v50 = vpop.f32.mrb[48].mxu0  ;;  %v1768_v52 = vpop.f32.mrb[48].mxu1 }
 0x870   :  { %v1776_v53 = vadd.f32 %v1775_v51, %v1728_v50  ;;  %v4299_v54 = vpop.f32.mrb[49].mxu0  ;;  %v4307_v55 = vpop.f32.mrb[49].mxu1  ;;  %v1785_v63 = vadd.f32 %v1784_v60, %v1768_v52  ;;  %v4575_v51 = vld [vmem:[#allocation10 + $0x58] sm:$0xff]  }
 0x871   :  { %v1731_v57 = vpop.f32.mrb[50].mxu0  ;;  %v1771_v58 = vpop.f32.mrb[50].mxu1  ;;  %v5291_v52 = vld [vmem:[#allocation12 + $0x38] sm:$0xff]   ;;  %v5304_v54 = vld [vmem:[#allocation12 + $0x50] sm:$0xff]   ;;  %v5309_v55 = vld [vmem:[#allocation12 + $0x48] sm:$0xff]  }
 0x872   :  { %v3866_v59 = vmul.f32 -1.442695, %v1776_v53  ;;  %v4300_v61 = vpop.f32.mrb[51].mxu0  ;;  %v4308_v62 = vpop.f32.mrb[51].mxu1  ;;  %v3867_v1 = vmul.f32 -1.442695, %v1785_v63 }
 0x873   :  { %v5300_v53 = vld [vmem:[#allocation12 + $0x40] sm:$0xff]   ;;  %v5315_v57 = vld [vmem:[#allocation12 + $0x58] sm:$0xff]   ;;  %v3876_v58 = vld [vmem:[%s5586_s4 + $0x4] ss:$0 sm:$0xff] }
 0x874   :  { %4653 = vpow2.f32 %v3866_v59 }
 0x875   :  { %4655 = vpow2.f32 %v3867_v1 }
 0x877   :  { %v1828_v39 = vpop.f32.mrb[52].mxu0 }
 0x878   :  { %v4315_v41 = vpop.f32.mrb[53].mxu0  ;;  %v1829_v10 = vadd.f32 %v5103_v6, %v1828_v39 }
 0x879   :  { %v1831_v2 = vpop.f32.mrb[54].mxu0 }
 0x87a   :  { %v4316_v3 = vpop.f32.mrb[55].mxu0 }
 0x87e   :  { %v4654_v5 = vpop.eup %4653 }
 0x87f   :  { %v1780_v7 = vadd.f32 1.0, %v4654_v5  ;;  %v4656_v8 = vpop.eup %4655 }
 0x880   :  { %v1789_v9 = vadd.f32 1.0, %v4656_v8 }
 0x881   :  { %4657 = vrcp.f32 %v1780_v7 }
 0x882   :  { %4659 = vrcp.f32 %v1789_v9 }
 0x88b   :  { %v4658_v12 = vpop.eup %4657 }
 0x88c   :  { %v1834_v13 = vmul.f32 %v4658_v12, %v1829_v10  ;;  %v4660_v16 = vpop.eup %4659 }
 0x88d   :  { %v1837_v17 = vsub.f32 1.0, %v4660_v16  ;;  %v1839_v19 = vmul.f32 %v4660_v16, %v5255_v42 }
 0x88e   :  { %v1835_v15 = vadd.f32 %v1834_v13, %v1793_v14 }
 0x890   :  { %4661 = vtanh.f32 %v1835_v15 }
 0x89a   :  { %v4662_v18 = vpop.eup %4661 }
 0x89b   :  { %v1838_v40 = vmul.f32 %v4662_v18, %v1837_v17 }
 0x89d   :  { %v1840_v20 = vadd.f32 %v1839_v19, %v1838_v40 }
 0x89f   :  { %v1843_v33 = vsub.f32 %v1840_v20, %v5255_v42  ;;  %v3881_v20 = vld [vmem:[%s5586_s4 + $0x5] ss:$0 sm:$0xff] }
 0x8a1   :  { %v1844_v22 = vmul.f32 %v1843_v33, %v1842_v21 }
 0x8a3   :  { %v1845_v23 = vadd.f32 %v1844_v22, %v5255_v42  ;;  %v1919_v42 = vrot.slane %v1897_v30, %v4970_v11 }
 0x8a5   :  { %v1846_v6 = vpack.c.bf16 %v1845_v23, %v1845_v23 }
 0x8a7   :  { %1848 = vst.msk [vmem:[#allocation2 + $0x7] sm:$0x1] %vm741_vm11, %v1846_v6 }
 0x8ae   :  { %v1873_v34 = vld [vmem:[#allocation2 + $0x7] sm:$0x1] }
 0x8af   :  { %v1898_v35 = vcombine.low %v1872_v32, %v1873_v34 }
 0x8b1   :  { %v1926_v43 = vrot.slane %v1898_v35, %v4970_v11 }
 0x8b3   :  { %v1928_v45 = vcombine.low %v1919_v42, %v1926_v43 }
 0x8b5   :  { %v1942_v47 = vrot.slane %v1928_v45, %v4970_v11 }
 0x8b7   :  { %v1943_v50 = vcombine.low %v1935_v46, %v1942_v47 }
 0x8b9   :  { %4322 = vmatmul.mubr.msk.bf16.vlgmr.msra.gmra.mrb[52].mxu1 %vm215_vm1, %v1943_v50  ;;  %4330 = vmatmul.mubr.msk.bf16.vlgmr.msra.gmra.mrb[56].mxu0 %vm215_vm1, %v1943_v50 }
 0x8ba   :  { %4334 = vmatpush3.bf16.msra.mxu1 %v4573_v48  ;;  %4342 = vmatpush3.bf16.msra.mxu0 %v5286_v49 }
 0x8bb   :  { %4335 = vmatprep.subr.bf16.mxu1 %v4859_v0  ;;  %4343 = vmatprep.subr.bf16.mxu0 %v4859_v0 }
 0x8bc   :  { %4337 = vmatprep.mubr.msk.bf16.mxu1 %vm4860_vm0, %v4859_v0  ;;  %4345 = vmatprep.mubr.msk.bf16.mxu0 %vm4860_vm0, %v4859_v0 }
 0x8be   :  { %4336 = vmatpush3.bf16.msra.mxu1 %v4575_v51  ;;  %4344 = vmatpush3.bf16.msra.mxu0 %v5291_v52 }
 0x8bf   :  { %4349 = vmatprep.subr.bf16.mxu1 %v4859_v0  ;;  %4357 = vmatprep.subr.bf16.mxu0 %v4859_v0 }
 0x8c1   :  { %4338 = vmatmul.mubr.msk.bf16.vlgmr.msra.gmra.mrb[56].mxu1 %vm215_vm1, %v1943_v50  ;;  %4346 = vmatmul.mubr.bf16.vlgmr.msra.gmra.mrb[60].mxu0 %v4862_v4 }
 0x8c2   :  { %4350 = vmatpush3.bf16.msra.mxu1 %v5300_v53  ;;  %4353 = vmatprep.mubr.msk.bf16.mxu1 %vm4860_vm0, %v4859_v0 }
 0x8c3   :  { %4351 = vmatprep.subr.bf16.mxu1 %v4859_v0  ;;  %4358 = vmatpush3.bf16.msra.mxu0 %v5304_v54 }
 0x8c4   :  { %4359 = vmatprep.subr.bf16.mxu0 %v4859_v0  ;;  %4361 = vmatprep.mubr.msk.bf16.mxu0 %vm4860_vm0, %v4859_v0 }
 0x8c6   :  { %4352 = vmatpush3.bf16.msra.mxu1 %v5309_v55 }
 0x8c7   :  { %4360 = vmatpush3.bf16.msra.mxu0 %v5315_v57  ;;  %4365 = vmatprep.subr.bf16.mxu1 %v4859_v0 }
 0x8c8   :  { %4373 = vmatprep.subr.bf16.mxu0 %v4859_v0 }
 0x8c9   :  { %4354 = vmatmul.mubr.bf16.vlgmr.msra.gmra.mrb[60].mxu1 %v4862_v4 }
 0x8ca   :  { %4362 = vmatmul.mubr.bf16.vlgmr.msra.gmra.mrb[64].mxu0 %v4862_v4  ;;  %4366 = vmatpush3.bf16.msra.mxu1 %v5286_v49  ;;  %v3871_v4 = vld [vmem:[%s5586_s4 + $0x3] ss:$0 sm:$0xff] }
 0x8cb   :  { %4374 = vmatpush3.bf16.msra.mxu0 %v5300_v53  ;;  %4367 = vmatprep.subr.bf16.mxu1 %v4859_v0 }
 0x8cc   :  { %4375 = vmatprep.subr.bf16.mxu0 %v4859_v0  ;;  %4369 = vmatprep.mubr.msk.bf16.mxu1 %vm4860_vm0, %v4859_v0 }
 0x8cd   :  { %4377 = vmatprep.mubr.msk.bf16.mxu0 %vm4860_vm0, %v4859_v0 }
 0x8ce   :  { %4368 = vmatpush3.bf16.msra.mxu1 %v5291_v52 }
 0x8cf   :  { %4376 = vmatpush3.bf16.msra.mxu0 %v5309_v55  ;;  %4381 = vmatprep.subr.bf16.mxu1 %v4859_v0 }
 0x8d0   :  { %4389 = vmatprep.subr.bf16.mxu0 %v4859_v0 }
 0x98c   :  { %v1993_v59 = vpop.f32.mrb[52].mxu1  ;;  %v2111_v60 = vpop.f32.mrb[56].mxu0 }
 0x98d   :  { %v1994_v61 = vadd.f32 %v3871_v4, %v1993_v59  ;;  %v2112_v62 = vadd.f32 %v3876_v58, %v2111_v60  ;;  %v4323_v63 = vpop.f32.mrb[53].mxu1  ;;  %v4331_v1 = vpop.f32.mrb[57].mxu0 }
 0x98e   :  { %v1996_v39 = vpop.f32.mrb[54].mxu1  ;;  %v2114_v41 = vpop.f32.mrb[58].mxu0 }
 0x98f   :  { %v2002_v2 = vcombine.high %v1994_v61, %v1994_v61  ;;  %v2009_v3 = vrot.slane %v1994_v61, %v5059_v56  ;;  %v2120_v5 = vcombine.high %v2112_v62, %v2112_v62  ;;  %v2127_v7 = vrot.slane %v2112_v62, %v5059_v56  ;;  %v4324_v8 = vpop.f32.mrb[55].mxu1  ;;  %v4332_v9 = vpop.f32.mrb[59].mxu0 }
 0x990   :  { %v1997_v10 = vadd.f32 %v3871_v4, %v1996_v39  ;;  %v2115_v12 = vadd.f32 %v3876_v58, %v2114_v41 }
 0x991   :  { %v2016_v13 = vrot.slane %v2002_v2, %v5059_v56  ;;  %v2017_v14 = vcombine.high %v2009_v3, %v2009_v3  ;;  %2044 = vst.msk [vmem:[#allocation3] sm:$0x3] %vm103_vm2, %v2009_v3  ;;  %v2134_v15 = vrot.slane %v2120_v5, %v5059_v56  ;;  %v2135_v16 = vcombine.high %v2127_v7, %v2127_v7 }
 0x992   :  { %2162 = vst.msk [vmem:[#allocation4] sm:$0x3] %vm103_vm2, %v2127_v7  ;;  %v2019_v17 = vcombine.high %v1997_v10, %v1997_v10  ;;  %v2026_v18 = vrot.slane %v1997_v10, %v5059_v56  ;;  %v2137_v19 = vcombine.high %v2115_v12, %v2115_v12  ;;  %v2144_v40 = vrot.slane %v2115_v12, %v5059_v56  ;;  %v5386_v12 = vld [vmem:[%s5587_s5 + $0x1] ss:$0 sm:$0xff] }
 0x993   :  { %v2018_v33 = vcombine.high %v2016_v13, %v2016_v13  ;;  %2045 = vst.msk [vmem:[#allocation3 + $0x2] sm:$0x3] %vm103_vm2, %v2017_v14  ;;  %2046 = vst.msk [vmem:[#allocation3 + $0x4] sm:$0x3] %vm103_vm2, %v2016_v13  ;;  %v2136_v21 = vcombine.high %v2134_v15, %v2134_v15 }
 0x994   :  { %2163 = vst.msk [vmem:[#allocation4 + $0x2] sm:$0x3] %vm103_vm2, %v2135_v16  ;;  %2164 = vst.msk [vmem:[#allocation4 + $0x4] sm:$0x3] %vm103_vm2, %v2134_v15  ;;  %v2033_v22 = vrot.slane %v2019_v17, %v5059_v56  ;;  %v2034_v23 = vcombine.high %v2026_v18, %v2026_v18  ;;  %v2151_v6 = vrot.slane %v2137_v19, %v5059_v56  ;;  %v2229_v24 = vpop.f32.mrb[56].mxu1  ;;  %v2334_v25 = vpop.f32.mrb[60].mxu0 }
 0x995   :  { %2048 = vst.msk [vmem:[#allocation3 + $0x8] sm:$0x3] %vm103_vm2, %v2026_v18  ;;  %v2152_v37 = vcombine.high %v2144_v40, %v2144_v40  ;;  %2166 = vst.msk [vmem:[#allocation4 + $0x8] sm:$0x3] %vm103_vm2, %v2144_v40  ;;  %v2230_v26 = vadd.f32 %v3881_v20, %v2229_v24  ;;  %v4339_v27 = vpop.f32.mrb[57].mxu1  ;;  %v4347_v28 = vpop.f32.mrb[61].mxu0 }
 0x996   :  { %2047 = vst.msk [vmem:[#allocation3 + $0x6] sm:$0x3] %vm103_vm2, %v2018_v33  ;;  %2165 = vst.msk [vmem:[#allocation4 + $0x6] sm:$0x3] %vm103_vm2, %v2136_v21  ;;  %v2035_v38 = vcombine.high %v2033_v22, %v2033_v22  ;;  %v2153_v29 = vcombine.high %v2151_v6, %v2151_v6  ;;  %v2232_v30 = vpop.f32.mrb[58].mxu1  ;;  %v2337_v31 = vpop.f32.mrb[62].mxu0 }
 0x997   :  { %2049 = vst.msk [vmem:[#allocation3 + $0xa] sm:$0x3] %vm103_vm2, %v2034_v23  ;;  %2050 = vst.msk [vmem:[#allocation3 + $0xc] sm:$0x3] %vm103_vm2, %v2033_v22  ;;  %v2238_v32 = vcombine.high %v2230_v26, %v2230_v26  ;;  %v2245_v34 = vrot.slane %v2230_v26, %v5059_v56  ;;  %v2233_v35 = vadd.f32 %v3881_v20, %v2232_v30  ;;  %v4340_v36 = vpop.f32.mrb[59].mxu1  ;;  %v4348_v42 = vpop.f32.mrb[63].mxu0 }
 0x998   :  { %2167 = vst.msk [vmem:[#allocation4 + $0xa] sm:$0x3] %vm103_vm2, %v2152_v37  ;;  %2168 = vst.msk [vmem:[#allocation4 + $0xc] sm:$0x3] %vm103_vm2, %v2151_v6  ;;  %v2392_v43 = vld [vmem:[#allocation3] sm:$0x3] }
 0x999   :  { %2051 = vst.msk [vmem:[#allocation3 + $0xe] sm:$0x3] %vm103_vm2, %v2035_v38  ;;  %2169 = vst.msk [vmem:[#allocation4 + $0xe] sm:$0x3] %vm103_vm2, %v2153_v29  ;;  %v2252_v44 = vrot.slane %v2238_v32, %v5059_v56  ;;  %v2253_v45 = vcombine.high %v2245_v34, %v2245_v34  ;;  %v2393_v46 = vadd.f32 %v2392_v43, %v2334_v25  ;;  %v2400_v60 = vld [vmem:[#allocation4] sm:$0x3] }
 0x99a   :  { %2280 = vst.msk [vmem:[#allocation5] sm:$0x3] %vm103_vm2, %v2245_v34  ;;  %v2255_v47 = vcombine.high %v2233_v35, %v2233_v35  ;;  %v2262_v48 = vrot.slane %v2233_v35, %v5059_v56  ;;  %v2474_v23 = vld [vmem:[#allocation6] sm:$0x3]  ;;  %v2562_v25 = vld [vmem:[#allocation3 + $0x2] sm:$0x3] }
 0x99b   :  { %v2254_v50 = vcombine.high %v2252_v44, %v2252_v44  ;;  %2281 = vst.msk [vmem:[#allocation5 + $0x2] sm:$0x3] %vm103_vm2, %v2253_v45  ;;  %2282 = vst.msk [vmem:[#allocation5 + $0x4] sm:$0x3] %vm103_vm2, %v2252_v44  ;;  %v3889_v51 = vmul.f32 -1.442695, %v2393_v46 }
 0x99c   :  { %v2269_v4 = vrot.slane %v2255_v47, %v5059_v56  ;;  %v2270_v58 = vcombine.high %v2262_v48, %v2262_v48  ;;  %2284 = vst.msk [vmem:[#allocation5 + $0x8] sm:$0x3] %vm103_vm2, %v2262_v48  ;;  %v2386_v59 = vpop.f32.mrb[60].mxu1  ;;  %v2570_v32 = vld [vmem:[#allocation4 + $0x2] sm:$0x3] }
 0x99d   :  { %2283 = vst.msk [vmem:[#allocation5 + $0x6] sm:$0x3] %vm103_vm2, %v2254_v50  ;;  %4663 = vpow2.f32 %v3889_v51  ;;  %v2401_v62 = vadd.f32 %v2400_v60, %v2386_v59  ;;  %v4355_v63 = vpop.f32.mrb[61].mxu1  ;;  %v2461_v1 = vpop.f32.mrb[64].mxu0 }
 0x99e   :  { %v2271_v61 = vcombine.high %v2269_v4, %v2269_v4  ;;  %2286 = vst.msk [vmem:[#allocation5 + $0xc] sm:$0x3] %vm103_vm2, %v2269_v4  ;;  %2285 = vst.msk [vmem:[#allocation5 + $0xa] sm:$0x3] %vm103_vm2, %v2270_v58  ;;  %v2389_v39 = vpop.f32.mrb[62].mxu1  ;;  %v4363_v41 = vpop.f32.mrb[65].mxu0  ;;  %v2462_v14 = vadd.f32 %v5386_v12, %v2461_v1 }
 0x99f   :  { %v4356_v2 = vpop.f32.mrb[63].mxu1  ;;  %v2464_v3 = vpop.f32.mrb[66].mxu0  ;;  %v3890_v5 = vmul.f32 -1.442695, %v2401_v62 }
 0x9a0   :  { %2287 = vst.msk [vmem:[#allocation5 + $0xe] sm:$0x3] %vm103_vm2, %v2271_v61  ;;  %v4364_v7 = vpop.f32.mrb[67].mxu0 }
 0x9a1   :  { %4665 = vpow2.f32 %v3890_v5  ;;  %v2408_v17 = vld [vmem:[#allocation5] sm:$0x3]  ;;  %v2626_v5 = vld [vmem:[#allocation6 + $0x2] sm:$0x3] }
 0x9a2   :  { %v2578_v60 = vld [vmem:[#allocation5 + $0x2] sm:$0x3] }
 0x9a7   :  { %v4664_v8 = vpop.eup %4663 }
 0x9a8   :  { %v2397_v9 = vadd.f32 1.0, %v4664_v8 }
 0x9aa   :  { %4667 = vrcp.f32 %v2397_v9 }
 0x9ab   :  { %v4666_v10 = vpop.eup %4665 }
 0x9ac   :  { %v2405_v13 = vadd.f32 1.0, %v4666_v10 }
 0x9ae   :  { %4669 = vrcp.f32 %v2405_v13  ;;  %v2715_v13 = vld [vmem:[#allocation3 + $0x4] sm:$0x3] }
 0x9b4   :  { %v4668_v15 = vpop.eup %4667 }
 0x9b5   :  { %v2467_v16 = vmul.f32 %v4668_v15, %v2462_v14 }
 0x9b7   :  { %v2468_v18 = vadd.f32 %v2467_v16, %v2408_v17 }
 0x9b8   :  { %v4670_v19 = vpop.eup %4669 }
 0x9b9   :  { %4671 = vtanh.f32 %v2468_v18  ;;  %v2470_v40 = vsub.f32 1.0, %v4670_v19  ;;  %v2472_v33 = vmul.f32 0.0, %v4670_v19 }
 0x9c3   :  { %v4672_v20 = vpop.eup %4671 }
 0x9c4   :  { %v2471_v21 = vmul.f32 %v4672_v20, %v2470_v40  ;;  %v2723_v20 = vld [vmem:[#allocation4 + $0x4] sm:$0x3] }
 0x9c6   :  { %v2473_v22 = vadd.f32 %v2472_v33, %v2471_v21 }
 0x9c8   :  { %v2475_v6 = vmul.f32 %v2474_v23, %v2473_v22 }
 0x9ca   :  { %v2477_v37 = vpack.c.bf16 %v2475_v6, %v2475_v6 }
 0x9cc   :  { %2478 = vst.msk [vmem:[#allocation2] sm:$0x1] %vm741_vm11, %v2477_v37  ;;  %4370 = vmatmul.mubr.msk.bf16.vlgmr.msra.gmra.mrb[64].mxu1 %vm215_vm1, %v2477_v37  ;;  %4378 = vmatmul.mubr.msk.bf16.vlgmr.msra.gmra.mrb[68].mxu0 %vm215_vm1, %v2477_v37 }
 0x9cd   :  { %4382 = vmatpush3.bf16.msra.mxu1 %v5304_v54  ;;  %4385 = vmatprep.mubr.msk.bf16.mxu1 %vm4860_vm0, %v4859_v0 }
 0x9ce   :  { %4383 = vmatprep.subr.bf16.mxu1 %v4859_v0  ;;  %4390 = vmatpush3.bf16.msra.mxu0 %v5286_v49 }
 0x9cf   :  { %4391 = vmatprep.subr.bf16.mxu0 %v4859_v0  ;;  %4393 = vmatprep.mubr.msk.bf16.mxu0 %vm4860_vm0, %v4859_v0 }
 0x9d1   :  { %4384 = vmatpush3.bf16.msra.mxu1 %v5315_v57 }
 0x9d2   :  { %4397 = vmatprep.subr.bf16.mxu1 %v4859_v0  ;;  %4392 = vmatpush3.bf16.msra.mxu0 %v5291_v52 }
 0x9d3   :  { %4405 = vmatprep.subr.bf16.mxu0 %v4859_v0 }
 0x9d4   :  { %4386 = vmatmul.mubr.msk.bf16.vlgmr.msra.gmra.mrb[68].mxu1 %vm215_vm1, %v2477_v37 }
 0x9d5   :  { %4398 = vmatpush3.bf16.msra.mxu1 %v5300_v53  ;;  %4401 = vmatprep.mubr.msk.bf16.mxu1 %vm4860_vm0, %v4859_v0 }
 0x9d6   :  { %4399 = vmatprep.subr.bf16.mxu1 %v4859_v0 }
 0x9d9   :  { %4400 = vmatpush3.bf16.msra.mxu1 %v5309_v55 }
 0x9da   :  { %4413 = vmatprep.subr.bf16.mxu1 %v4859_v0 }
 0xa9f   :  { %v2516_v24 = vpop.f32.mrb[64].mxu1  ;;  %v2556_v26 = vpop.f32.mrb[68].mxu0 }
 0xaa0   :  { %v2563_v27 = vadd.f32 %v2562_v25, %v2516_v24  ;;  %v4371_v28 = vpop.f32.mrb[65].mxu1  ;;  %v4379_v38 = vpop.f32.mrb[69].mxu0  ;;  %v2571_v36 = vadd.f32 %v2570_v32, %v2556_v26  ;;  %v2731_v32 = vld [vmem:[#allocation5 + $0x4] sm:$0x3] }
 0xaa1   :  { %v2519_v29 = vpop.f32.mrb[66].mxu1  ;;  %v2559_v30 = vpop.f32.mrb[70].mxu0 }
 0xaa2   :  { %v3896_v31 = vmul.f32 -1.442695, %v2563_v27  ;;  %v4372_v34 = vpop.f32.mrb[67].mxu1  ;;  %v4380_v35 = vpop.f32.mrb[71].mxu0  ;;  %v3897_v42 = vmul.f32 -1.442695, %v2571_v36 }
 0xaa4   :  { %4673 = vpow2.f32 %v3896_v31 }
 0xaa5   :  { %4675 = vpow2.f32 %v3897_v42 }
 0xaa7   :  { %v2613_v43 = vpop.f32.mrb[68].mxu1 }
 0xaa8   :  { %v4387_v44 = vpop.f32.mrb[69].mxu1  ;;  %v2614_v4 = vadd.f32 %v5386_v12, %v2613_v43 }
 0xaa9   :  { %v2616_v45 = vpop.f32.mrb[70].mxu1 }
 0xaaa   :  { %v4388_v46 = vpop.f32.mrb[71].mxu1 }
 0xaae   :  { %v4674_v47 = vpop.eup %4673 }
 0xaaf   :  { %v2567_v48 = vadd.f32 1.0, %v4674_v47  ;;  %v4676_v50 = vpop.eup %4675  ;;  %v2779_v47 = vld [vmem:[#allocation6 + $0x4] sm:$0x3] }
 0xab0   :  { %v2575_v51 = vadd.f32 1.0, %v4676_v50 }
 0xab1   :  { %4677 = vrcp.f32 %v2567_v48 }
 0xab2   :  { %4679 = vrcp.f32 %v2575_v51 }
 0xabb   :  { %v4678_v58 = vpop.eup %4677 }
 0xabc   :  { %v2619_v59 = vmul.f32 %v4678_v58, %v2614_v4  ;;  %v4680_v62 = vpop.eup %4679  ;;  %v2868_v58 = vld [vmem:[#allocation3 + $0x6] sm:$0x3] }
 0xabd   :  { %v2622_v63 = vsub.f32 1.0, %v4680_v62  ;;  %v2624_v39 = vmul.f32 %v4680_v62, %v2475_v6 }
 0xabe   :  { %v2620_v61 = vadd.f32 %v2619_v59, %v2578_v60 }
 0xac0   :  { %4681 = vtanh.f32 %v2620_v61 }
 0xaca   :  { %v4682_v1 = vpop.eup %4681 }
 0xacb   :  { %v2623_v41 = vmul.f32 %v4682_v1, %v2622_v63 }
 0xacd   :  { %v2625_v2 = vadd.f32 %v2624_v39, %v2623_v41  ;;  %v2876_v41 = vld [vmem:[#allocation4 + $0x6] sm:$0x3] }
 0xacf   :  { %v2627_v3 = vsub.f32 %v2625_v2, %v2475_v6 }
 0xad1   :  { %v2628_v7 = vmul.f32 %v2627_v3, %v2626_v5 }
 0xad3   :  { %v2629_v8 = vadd.f32 %v2628_v7, %v2475_v6 }
 0xad5   :  { %v2630_v9 = vpack.c.bf16 %v2629_v8, %v2629_v8 }
 0xad7   :  { %2631 = vst.msk [vmem:[#allocation2 + $0x1] sm:$0x1] %vm741_vm11, %v2630_v9  ;;  %4394 = vmatmul.mubr.msk.bf16.vlgmr.msra.gmra.mrb[72].mxu0 %vm215_vm1, %v2630_v9  ;;  %4402 = vmatmul.mubr.msk.bf16.vlgmr.msra.gmra.mrb[72].mxu1 %vm215_vm1, %v2630_v9 }
 0xad8   :  { %4406 = vmatpush3.bf16.msra.mxu0 %v5304_v54  ;;  %4409 = vmatprep.mubr.msk.bf16.mxu0 %vm4860_vm0, %v4859_v0 }
 0xad9   :  { %4407 = vmatprep.subr.bf16.mxu0 %v4859_v0  ;;  %4414 = vmatpush3.bf16.msra.mxu1 %v5286_v49 }
 0xada   :  { %4415 = vmatprep.subr.bf16.mxu1 %v4859_v0  ;;  %4417 = vmatprep.mubr.msk.bf16.mxu1 %vm4860_vm0, %v4859_v0 }
 0xadc   :  { %4408 = vmatpush3.bf16.msra.mxu0 %v5315_v57 }
 0xadd   :  { %4421 = vmatprep.subr.bf16.mxu0 %v4859_v0  ;;  %4416 = vmatpush3.bf16.msra.mxu1 %v5291_v52 }
 0xade   :  { %4429 = vmatprep.subr.bf16.mxu1 %v4859_v0 }
 0xadf   :  { %4410 = vmatmul.mubr.msk.bf16.vlgmr.msra.gmra.mrb[76].mxu0 %vm215_vm1, %v2630_v9 }
 0xae0   :  { %4422 = vmatpush3.bf16.msra.mxu0 %v5300_v53  ;;  %4425 = vmatprep.mubr.msk.bf16.mxu0 %vm4860_vm0, %v4859_v0 }
 0xae1   :  { %4423 = vmatprep.subr.bf16.mxu0 %v4859_v0 }
 0xae4   :  { %4424 = vmatpush3.bf16.msra.mxu0 %v5309_v55 }
 0xae5   :  { %4437 = vmatprep.subr.bf16.mxu0 %v4859_v0 }
 0xbaa   :  { %v2669_v10 = vpop.f32.mrb[72].mxu0  ;;  %v2709_v14 = vpop.f32.mrb[72].mxu1 }
 0xbab   :  { %v2716_v15 = vadd.f32 %v2715_v13, %v2669_v10  ;;  %v4395_v16 = vpop.f32.mrb[73].mxu0  ;;  %v4403_v17 = vpop.f32.mrb[73].mxu1  ;;  %v2724_v22 = vadd.f32 %v2723_v20, %v2709_v14  ;;  %v2884_v20 = vld [vmem:[#allocation5 + $0x6] sm:$0x3] }
 0xbac   :  { %v2672_v18 = vpop.f32.mrb[74].mxu0  ;;  %v2712_v19 = vpop.f32.mrb[74].mxu1 }
 0xbad   :  { %v3901_v40 = vmul.f32 -1.442695, %v2716_v15  ;;  %v4396_v33 = vpop.f32.mrb[75].mxu0  ;;  %v4404_v21 = vpop.f32.mrb[75].mxu1  ;;  %v3902_v23 = vmul.f32 -1.442695, %v2724_v22 }
 0xbaf   :  { %4683 = vpow2.f32 %v3901_v40 }
 0xbb0   :  { %4685 = vpow2.f32 %v3902_v23 }
 0xbb2   :  { %v2766_v6 = vpop.f32.mrb[76].mxu0 }
 0xbb3   :  { %v4411_v37 = vpop.f32.mrb[77].mxu0  ;;  %v2767_v29 = vadd.f32 %v5386_v12, %v2766_v6 }
 0xbb4   :  { %v2769_v24 = vpop.f32.mrb[78].mxu0 }
 0xbb5   :  { %v4412_v25 = vpop.f32.mrb[79].mxu0 }
 0xbb9   :  { %v4684_v26 = vpop.eup %4683 }
 0xbba   :  { %v2720_v27 = vadd.f32 1.0, %v4684_v26  ;;  %v4686_v28 = vpop.eup %4685  ;;  %v2932_v26 = vld [vmem:[#allocation6 + $0x6] sm:$0x3] }
 0xbbb   :  { %v2728_v38 = vadd.f32 1.0, %v4686_v28 }
 0xbbc   :  { %4687 = vrcp.f32 %v2720_v27 }
 0xbbd   :  { %4689 = vrcp.f32 %v2728_v38 }
 0xbc6   :  { %v4688_v30 = vpop.eup %4687 }
 0xbc7   :  { %v2772_v31 = vmul.f32 %v4688_v30, %v2767_v29  ;;  %v4690_v35 = vpop.eup %4689  ;;  %v3021_v30 = vld [vmem:[#allocation3 + $0x8] sm:$0x3] }
 0xbc8   :  { %v2775_v36 = vsub.f32 1.0, %v4690_v35  ;;  %v2777_v43 = vmul.f32 %v4690_v35, %v2629_v8 }
 0xbc9   :  { %v2773_v34 = vadd.f32 %v2772_v31, %v2731_v32 }
 0xbcb   :  { %4691 = vtanh.f32 %v2773_v34 }
 0xbd5   :  { %v4692_v42 = vpop.eup %4691 }
 0xbd6   :  { %v2776_v44 = vmul.f32 %v4692_v42, %v2775_v36 }
 0xbd8   :  { %v2778_v45 = vadd.f32 %v2777_v43, %v2776_v44  ;;  %v3029_v44 = vld [vmem:[#allocation4 + $0x8] sm:$0x3] }
 0xbda   :  { %v2780_v46 = vsub.f32 %v2778_v45, %v2629_v8 }
 0xbdc   :  { %v2781_v48 = vmul.f32 %v2780_v46, %v2779_v47 }
 0xbde   :  { %v2782_v50 = vadd.f32 %v2781_v48, %v2629_v8 }
 0xbe0   :  { %v2783_v51 = vpack.c.bf16 %v2782_v50, %v2782_v50 }
 0xbe2   :  { %2784 = vst.msk [vmem:[#allocation2 + $0x2] sm:$0x1] %vm741_vm11, %v2783_v51  ;;  %4418 = vmatmul.mubr.msk.bf16.vlgmr.msra.gmra.mrb[76].mxu1 %vm215_vm1, %v2783_v51  ;;  %4426 = vmatmul.mubr.msk.bf16.vlgmr.msra.gmra.mrb[80].mxu0 %vm215_vm1, %v2783_v51 }
 0xbe3   :  { %4430 = vmatpush3.bf16.msra.mxu1 %v5304_v54  ;;  %4433 = vmatprep.mubr.msk.bf16.mxu1 %vm4860_vm0, %v4859_v0 }
 0xbe4   :  { %4431 = vmatprep.subr.bf16.mxu1 %v4859_v0  ;;  %4438 = vmatpush3.bf16.msra.mxu0 %v5286_v49 }
 0xbe5   :  { %4439 = vmatprep.subr.bf16.mxu0 %v4859_v0  ;;  %4441 = vmatprep.mubr.msk.bf16.mxu0 %vm4860_vm0, %v4859_v0 }
 0xbe7   :  { %4432 = vmatpush3.bf16.msra.mxu1 %v5315_v57 }
 0xbe8   :  { %4445 = vmatprep.subr.bf16.mxu1 %v4859_v0  ;;  %4440 = vmatpush3.bf16.msra.mxu0 %v5291_v52 }
 0xbe9   :  { %4453 = vmatprep.subr.bf16.mxu0 %v4859_v0 }
 0xbea   :  { %4434 = vmatmul.mubr.msk.bf16.vlgmr.msra.gmra.mrb[80].mxu1 %vm215_vm1, %v2783_v51 }
 0xbeb   :  { %4446 = vmatpush3.bf16.msra.mxu1 %v5300_v53  ;;  %4449 = vmatprep.mubr.msk.bf16.mxu1 %vm4860_vm0, %v4859_v0 }
 0xbec   :  { %4447 = vmatprep.subr.bf16.mxu1 %v4859_v0 }
 0xbef   :  { %4448 = vmatpush3.bf16.msra.mxu1 %v5309_v55 }
 0xbf0   :  { %4461 = vmatprep.subr.bf16.mxu1 %v4859_v0 }
 0xcb5   :  { %v2822_v4 = vpop.f32.mrb[76].mxu1  ;;  %v2862_v59 = vpop.f32.mrb[80].mxu0 }
 0xcb6   :  { %v2869_v60 = vadd.f32 %v2868_v58, %v2822_v4  ;;  %v4419_v61 = vpop.f32.mrb[77].mxu1  ;;  %v4427_v62 = vpop.f32.mrb[81].mxu0  ;;  %v2877_v5 = vadd.f32 %v2876_v41, %v2862_v59  ;;  %v3037_v41 = vld [vmem:[#allocation5 + $0x8] sm:$0x3] }
 0xcb7   :  { %v2825_v63 = vpop.f32.mrb[78].mxu1  ;;  %v2865_v1 = vpop.f32.mrb[82].mxu0 }
 0xcb8   :  { %v3906_v39 = vmul.f32 -1.442695, %v2869_v60  ;;  %v4420_v2 = vpop.f32.mrb[79].mxu1  ;;  %v4428_v3 = vpop.f32.mrb[83].mxu0  ;;  %v3907_v7 = vmul.f32 -1.442695, %v2877_v5 }
 0xcba   :  { %4693 = vpow2.f32 %v3906_v39 }
 0xcbb   :  { %4695 = vpow2.f32 %v3907_v7 }
 0xcbd   :  { %v2919_v8 = vpop.f32.mrb[80].mxu1 }
 0xcbe   :  { %v4435_v9 = vpop.f32.mrb[81].mxu1  ;;  %v2920_v18 = vadd.f32 %v5386_v12, %v2919_v8 }
 0xcbf   :  { %v2922_v10 = vpop.f32.mrb[82].mxu1 }
 0xcc0   :  { %v4436_v13 = vpop.f32.mrb[83].mxu1 }
 0xcc4   :  { %v4694_v14 = vpop.eup %4693 }
 0xcc5   :  { %v2873_v15 = vadd.f32 1.0, %v4694_v14  ;;  %v4696_v16 = vpop.eup %4695  ;;  %v3085_v14 = vld [vmem:[#allocation6 + $0x8] sm:$0x3] }
 0xcc6   :  { %v2881_v17 = vadd.f32 1.0, %v4696_v16 }
 0xcc7   :  { %4697 = vrcp.f32 %v2873_v15 }
 0xcc8   :  { %4699 = vrcp.f32 %v2881_v17 }
 0xcd1   :  { %v4698_v19 = vpop.eup %4697 }
 0xcd2   :  { %v2925_v40 = vmul.f32 %v4698_v19, %v2920_v18  ;;  %v4700_v21 = vpop.eup %4699  ;;  %v3174_v19 = vld [vmem:[#allocation3 + $0xa] sm:$0x3] }
 0xcd3   :  { %v2928_v22 = vsub.f32 1.0, %v4700_v21  ;;  %v2930_v6 = vmul.f32 %v4700_v21, %v2782_v50 }
 0xcd4   :  { %v2926_v33 = vadd.f32 %v2925_v40, %v2884_v20 }
 0xcd6   :  { %4701 = vtanh.f32 %v2926_v33 }
 0xce0   :  { %v4702_v23 = vpop.eup %4701 }
 0xce1   :  { %v2929_v37 = vmul.f32 %v4702_v23, %v2928_v22 }
 0xce3   :  { %v2931_v24 = vadd.f32 %v2930_v6, %v2929_v37  ;;  %v3182_v37 = vld [vmem:[#allocation4 + $0xa] sm:$0x3] }
 0xce5   :  { %v2933_v25 = vsub.f32 %v2931_v24, %v2782_v50 }
 0xce7   :  { %v2934_v27 = vmul.f32 %v2933_v25, %v2932_v26 }
 0xce9   :  { %v2935_v28 = vadd.f32 %v2934_v27, %v2782_v50 }
 0xceb   :  { %v2936_v38 = vpack.c.bf16 %v2935_v28, %v2935_v28 }
 0xced   :  { %2937 = vst.msk [vmem:[#allocation2 + $0x3] sm:$0x1] %vm741_vm11, %v2936_v38  ;;  %4442 = vmatmul.mubr.msk.bf16.vlgmr.msra.gmra.mrb[84].mxu0 %vm215_vm1, %v2936_v38  ;;  %4450 = vmatmul.mubr.msk.bf16.vlgmr.msra.gmra.mrb[84].mxu1 %vm215_vm1, %v2936_v38 }
 0xcee   :  { %4454 = vmatpush3.bf16.msra.mxu0 %v5304_v54  ;;  %4457 = vmatprep.mubr.msk.bf16.mxu0 %vm4860_vm0, %v4859_v0 }
 0xcef   :  { %4455 = vmatprep.subr.bf16.mxu0 %v4859_v0  ;;  %4462 = vmatpush3.bf16.msra.mxu1 %v5286_v49 }
 0xcf0   :  { %4463 = vmatprep.subr.bf16.mxu1 %v4859_v0  ;;  %4465 = vmatprep.mubr.msk.bf16.mxu1 %vm4860_vm0, %v4859_v0 }
 0xcf2   :  { %4456 = vmatpush3.bf16.msra.mxu0 %v5315_v57 }
 0xcf3   :  { %4469 = vmatprep.subr.bf16.mxu0 %v4859_v0  ;;  %4464 = vmatpush3.bf16.msra.mxu1 %v5291_v52 }
 0xcf4   :  { %4477 = vmatprep.subr.bf16.mxu1 %v4859_v0 }
 0xcf5   :  { %4458 = vmatmul.mubr.msk.bf16.vlgmr.msra.gmra.mrb[88].mxu0 %vm215_vm1, %v2936_v38 }
 0xcf6   :  { %4470 = vmatpush3.bf16.msra.mxu0 %v5300_v53  ;;  %4473 = vmatprep.mubr.msk.bf16.mxu0 %vm4860_vm0, %v4859_v0 }
 0xcf7   :  { %4471 = vmatprep.subr.bf16.mxu0 %v4859_v0 }
 0xcfa   :  { %4472 = vmatpush3.bf16.msra.mxu0 %v5309_v55 }
 0xcfb   :  { %4485 = vmatprep.subr.bf16.mxu0 %v4859_v0 }
 0xdc0   :  { %v2975_v29 = vpop.f32.mrb[84].mxu0  ;;  %v3015_v31 = vpop.f32.mrb[84].mxu1 }
 0xdc1   :  { %v3022_v32 = vadd.f32 %v3021_v30, %v2975_v29  ;;  %v4443_v34 = vpop.f32.mrb[85].mxu0  ;;  %v4451_v35 = vpop.f32.mrb[85].mxu1  ;;  %v3030_v47 = vadd.f32 %v3029_v44, %v3015_v31  ;;  %v3190_v44 = vld [vmem:[#allocation5 + $0xa] sm:$0x3] }
 0xdc2   :  { %v2978_v36 = vpop.f32.mrb[86].mxu0  ;;  %v3018_v42 = vpop.f32.mrb[86].mxu1 }
 0xdc3   :  { %v3911_v43 = vmul.f32 -1.442695, %v3022_v32  ;;  %v4444_v45 = vpop.f32.mrb[87].mxu0  ;;  %v4452_v46 = vpop.f32.mrb[87].mxu1  ;;  %v3912_v48 = vmul.f32 -1.442695, %v3030_v47 }
 0xdc5   :  { %4703 = vpow2.f32 %v3911_v43 }
 0xdc6   :  { %4705 = vpow2.f32 %v3912_v48 }
 0xdc8   :  { %v3072_v50 = vpop.f32.mrb[88].mxu0 }
 0xdc9   :  { %v4459_v51 = vpop.f32.mrb[89].mxu0  ;;  %v3073_v63 = vadd.f32 %v5386_v12, %v3072_v50 }
 0xdca   :  { %v3075_v4 = vpop.f32.mrb[90].mxu0 }
 0xdcb   :  { %v4460_v58 = vpop.f32.mrb[91].mxu0 }
 0xdcf   :  { %v4704_v59 = vpop.eup %4703 }
 0xdd0   :  { %v3026_v60 = vadd.f32 1.0, %v4704_v59  ;;  %v4706_v61 = vpop.eup %4705  ;;  %v3238_v59 = vld [vmem:[#allocation6 + $0xa] sm:$0x3] }
 0xdd1   :  { %v3034_v62 = vadd.f32 1.0, %v4706_v61 }
 0xdd2   :  { %4707 = vrcp.f32 %v3026_v60 }
 0xdd3   :  { %4709 = vrcp.f32 %v3034_v62 }
 0xddc   :  { %v4708_v1 = vpop.eup %4707 }
 0xddd   :  { %v3078_v39 = vmul.f32 %v4708_v1, %v3073_v63  ;;  %v4710_v3 = vpop.eup %4709 }
 0xdde   :  { %v3081_v5 = vsub.f32 1.0, %v4710_v3  ;;  %v3083_v8 = vmul.f32 %v4710_v3, %v2935_v28  ;;  %v3335_v3 = vld [vmem:[#allocation4 + $0xc] sm:$0x3] }
 0xddf   :  { %v3079_v2 = vadd.f32 %v3078_v39, %v3037_v41 }
 0xde1   :  { %4711 = vtanh.f32 %v3079_v2 }
 0xdeb   :  { %v4712_v7 = vpop.eup %4711 }
 0xdec   :  { %v3082_v9 = vmul.f32 %v4712_v7, %v3081_v5 }
 0xdee   :  { %v3084_v10 = vadd.f32 %v3083_v8, %v3082_v9 }
 0xdf0   :  { %v3086_v13 = vsub.f32 %v3084_v10, %v2935_v28 }
 0xdf2   :  { %v3087_v15 = vmul.f32 %v3086_v13, %v3085_v14 }
 0xdf4   :  { %v3088_v16 = vadd.f32 %v3087_v15, %v2935_v28 }
 0xdf6   :  { %v3089_v17 = vpack.c.bf16 %v3088_v16, %v3088_v16 }
 0xdf8   :  { %3090 = vst.msk [vmem:[#allocation2 + $0x4] sm:$0x1] %vm741_vm11, %v3089_v17  ;;  %4466 = vmatmul.mubr.msk.bf16.vlgmr.msra.gmra.mrb[88].mxu1 %vm215_vm1, %v3089_v17  ;;  %4474 = vmatmul.mubr.msk.bf16.vlgmr.msra.gmra.mrb[92].mxu0 %vm215_vm1, %v3089_v17 }
 0xdf9   :  { %4478 = vmatpush3.bf16.msra.mxu1 %v5304_v54  ;;  %4481 = vmatprep.mubr.msk.bf16.mxu1 %vm4860_vm0, %v4859_v0 }
 0xdfa   :  { %4479 = vmatprep.subr.bf16.mxu1 %v4859_v0  ;;  %4486 = vmatpush3.bf16.msra.mxu0 %v5286_v49 }
 0xdfb   :  { %4487 = vmatprep.subr.bf16.mxu0 %v4859_v0  ;;  %4489 = vmatprep.mubr.msk.bf16.mxu0 %vm4860_vm0, %v4859_v0 }
 0xdfd   :  { %4480 = vmatpush3.bf16.msra.mxu1 %v5315_v57 }
 0xdfe   :  { %4493 = vmatprep.subr.bf16.mxu1 %v4859_v0  ;;  %4488 = vmatpush3.bf16.msra.mxu0 %v5291_v52 }
 0xdff   :  { %4501 = vmatprep.subr.bf16.mxu0 %v4859_v0 }
 0xe00   :  { %4482 = vmatmul.mubr.msk.bf16.vlgmr.msra.gmra.mrb[92].mxu1 %vm215_vm1, %v3089_v17 }
 0xe01   :  { %4494 = vmatpush3.bf16.msra.mxu1 %v5300_v53  ;;  %4497 = vmatprep.mubr.msk.bf16.mxu1 %vm4860_vm0, %v4859_v0 }
 0xe02   :  { %4495 = vmatprep.subr.bf16.mxu1 %v4859_v0 }
 0xe05   :  { %4496 = vmatpush3.bf16.msra.mxu1 %v5309_v55 }
 0xe06   :  { %4509 = vmatprep.subr.bf16.mxu1 %v4859_v0 }
 0xecb   :  { %v3128_v18 = vpop.f32.mrb[88].mxu1  ;;  %v3168_v40 = vpop.f32.mrb[92].mxu0 }
 0xecc   :  { %v3175_v20 = vadd.f32 %v3174_v19, %v3128_v18  ;;  %v4467_v33 = vpop.f32.mrb[89].mxu1  ;;  %v4475_v21 = vpop.f32.mrb[93].mxu0  ;;  %v3183_v26 = vadd.f32 %v3182_v37, %v3168_v40 }
 0xecd   :  { %v3131_v22 = vpop.f32.mrb[90].mxu1  ;;  %v3171_v23 = vpop.f32.mrb[94].mxu0 }
 0xece   :  { %v3916_v6 = vmul.f32 -1.442695, %v3175_v20  ;;  %v4468_v24 = vpop.f32.mrb[91].mxu1  ;;  %v4476_v25 = vpop.f32.mrb[95].mxu0  ;;  %v3917_v27 = vmul.f32 -1.442695, %v3183_v26 }
 0xecf   :  { %v3343_v20 = vld [vmem:[#allocation5 + $0xc] sm:$0x3]  ;;  %v3391_v26 = vld [vmem:[#allocation6 + $0xc] sm:$0x3] }
 0xed0   :  { %4713 = vpow2.f32 %v3916_v6 }
 0xed1   :  { %4715 = vpow2.f32 %v3917_v27 }
 0xed3   :  { %v3225_v28 = vpop.f32.mrb[92].mxu1 }
 0xed4   :  { %v4483_v38 = vpop.f32.mrb[93].mxu1  ;;  %v3226_v36 = vadd.f32 %v5386_v12, %v3225_v28 }
 0xed5   :  { %v3228_v29 = vpop.f32.mrb[94].mxu1 }
 0xed6   :  { %v4484_v30 = vpop.f32.mrb[95].mxu1  ;;  %v4756_v29 = vld [vmem:[#allocation12 + $0x50] sm:$0xff]  }
 0xed7   :  { %v4757_v30 = vld [vmem:[#allocation12 + $0x58] sm:$0xff]  }
 0xeda   :  { %v4714_v31 = vpop.eup %4713 }
 0xedb   :  { %v3179_v32 = vadd.f32 1.0, %v4714_v31  ;;  %v4716_v34 = vpop.eup %4715  ;;  %v4581_v31 = vld [vmem:[%s5588_s6] sm:$0xff]  }
 0xedc   :  { %v3187_v35 = vadd.f32 1.0, %v4716_v34 }
 0xedd   :  { %4717 = vrcp.f32 %v3179_v32  ;;  %v4582_v32 = vld [vmem:[%s5588_s6 + $0x8] sm:$0xff]  }
 0xede   :  { %4719 = vrcp.f32 %v3187_v35  ;;  %v3480_v35 = vld [vmem:[#allocation3 + $0xe] sm:$0x3] }
 0xee7   :  { %v4718_v42 = vpop.eup %4717 }
 0xee8   :  { %v3231_v43 = vmul.f32 %v4718_v42, %v3226_v36  ;;  %v4720_v46 = vpop.eup %4719 }
 0xee9   :  { %v3234_v47 = vsub.f32 1.0, %v4720_v46  ;;  %v3236_v50 = vmul.f32 %v4720_v46, %v3088_v16 }
 0xeea   :  { %v3232_v45 = vadd.f32 %v3231_v43, %v3190_v44 }
 0xeec   :  { %4721 = vtanh.f32 %v3232_v45 }
 0xef6   :  { %v4722_v48 = vpop.eup %4721 }
 0xef7   :  { %v3235_v51 = vmul.f32 %v4722_v48, %v3234_v47  ;;  %v3488_v48 = vld [vmem:[#allocation4 + $0xe] sm:$0x3] }
 0xef9   :  { %v3237_v4 = vadd.f32 %v3236_v50, %v3235_v51 }
 0xefb   :  { %v3239_v58 = vsub.f32 %v3237_v4, %v3088_v16 }
 0xefd   :  { %v3240_v60 = vmul.f32 %v3239_v58, %v3238_v59 }
 0xeff   :  { %v3241_v61 = vadd.f32 %v3240_v60, %v3088_v16 }
 0xf01   :  { %v3242_v62 = vpack.c.bf16 %v3241_v61, %v3241_v61 }
 0xf03   :  { %3243 = vst.msk [vmem:[#allocation2 + $0x5] sm:$0x1] %vm741_vm11, %v3242_v62  ;;  %4490 = vmatmul.mubr.msk.bf16.vlgmr.msra.gmra.mrb[96].mxu0 %vm215_vm1, %v3242_v62  ;;  %4498 = vmatmul.mubr.msk.bf16.vlgmr.msra.gmra.mrb[96].mxu1 %vm215_vm1, %v3242_v62 }
 0xf04   :  { %4502 = vmatpush3.bf16.msra.mxu0 %v5304_v54  ;;  %4505 = vmatprep.mubr.msk.bf16.mxu0 %vm4860_vm0, %v4859_v0  ;;  %v3327_v54 = vld [vmem:[#allocation3 + $0xc] sm:$0x3] }
 0xf05   :  { %4503 = vmatprep.subr.bf16.mxu0 %v4859_v0  ;;  %4510 = vmatpush3.bf16.msra.mxu1 %v5286_v49 }
 0xf06   :  { %4511 = vmatprep.subr.bf16.mxu1 %v4859_v0  ;;  %4513 = vmatprep.mubr.msk.bf16.mxu1 %vm4860_vm0, %v4859_v0 }
 0xf08   :  { %4504 = vmatpush3.bf16.msra.mxu0 %v5315_v57 }
 0xf09   :  { %4517 = vmatprep.subr.bf16.mxu0 %v4859_v0  ;;  %4512 = vmatpush3.bf16.msra.mxu1 %v5291_v52 }
 0xf0a   :  { %4525 = vmatprep.subr.bf16.mxu1 %v4859_v0 }
 0xf0b   :  { %4506 = vmatmul.mubr.msk.bf16.vlgmr.msra.gmra.mrb[100].mxu0 %vm215_vm1, %v3242_v62 }
 0xf0c   :  { %4518 = vmatpush3.bf16.msra.mxu0 %v5300_v53  ;;  %4521 = vmatprep.mubr.msk.bf16.mxu0 %vm4860_vm0, %v4859_v0 }
 0xf0d   :  { %4519 = vmatprep.subr.bf16.mxu0 %v4859_v0 }
 0xf10   :  { %4520 = vmatpush3.bf16.msra.mxu0 %v5309_v55 }
 0xf11   :  { %4533 = vmatprep.subr.bf16.mxu0 %v4859_v0 }
 0xfd6   :  { %v3281_v49 = vpop.f32.mrb[96].mxu0  ;;  %v3321_v57 = vpop.f32.mrb[96].mxu1 }
 0xfd7   :  { %v3328_v63 = vadd.f32 %v3327_v54, %v3281_v49  ;;  %v4491_v52 = vpop.f32.mrb[97].mxu0  ;;  %v4499_v1 = vpop.f32.mrb[97].mxu1  ;;  %v3336_v7 = vadd.f32 %v3335_v3, %v3321_v57 }
 0xfd8   :  { %v3284_v39 = vpop.f32.mrb[98].mxu0  ;;  %v3324_v41 = vpop.f32.mrb[98].mxu1 }
 0xfd9   :  { %v3921_v2 = vmul.f32 -1.442695, %v3328_v63  ;;  %v4492_v53 = vpop.f32.mrb[99].mxu0  ;;  %v4500_v5 = vpop.f32.mrb[99].mxu1  ;;  %v3922_v8 = vmul.f32 -1.442695, %v3336_v7 }
 0xfda   :  { %v3496_v39 = vld [vmem:[#allocation5 + $0xe] sm:$0x3] }
 0xfdb   :  { %4723 = vpow2.f32 %v3921_v2 }
 0xfdc   :  { %4725 = vpow2.f32 %v3922_v8 }
 0xfde   :  { %v3378_v9 = vpop.f32.mrb[100].mxu0 }
 0xfdf   :  { %v4507_v10 = vpop.f32.mrb[101].mxu0  ;;  %v3379_v18 = vadd.f32 %v5386_v12, %v3378_v9 }
 0xfe0   :  { %v3381_v55 = vpop.f32.mrb[102].mxu0  ;;  %v3544_v10 = vld [vmem:[#allocation6 + $0xe] sm:$0x3] }
 0xfe1   :  { %v4508_v13 = vpop.f32.mrb[103].mxu0 }
 0xfe5   :  { %v4724_v14 = vpop.eup %4723 }
 0xfe6   :  { %v3332_v15 = vadd.f32 1.0, %v4724_v14  ;;  %v4726_v16 = vpop.eup %4725 }
 0xfe7   :  { %v3340_v17 = vadd.f32 1.0, %v4726_v16  ;;  %v3552_v16 = vld [vmem:[#allocation2 + $0x2] sm:$0x1] }
 0xfe8   :  { %4727 = vrcp.f32 %v3332_v15  ;;  %v3553_v15 = vld [vmem:[#allocation2 + $0x3] sm:$0x1] }
 0xfe9   :  { %4729 = vrcp.f32 %v3340_v17  ;;  %v3578_v17 = vcombine.low %v3552_v16, %v3553_v15 }
 0xff2   :  { %v4728_v19 = vpop.eup %4727 }
 0xff3   :  { %v3384_v40 = vmul.f32 %v4728_v19, %v3379_v18  ;;  %v4730_v21 = vpop.eup %4729  ;;  %v3550_v18 = vld [vmem:[#allocation2] sm:$0x1]  ;;  %v3555_v19 = vld [vmem:[#allocation2 + $0x5] sm:$0x1] }
 0xff4   :  { %v3387_v22 = vsub.f32 1.0, %v4730_v21  ;;  %v3389_v6 = vmul.f32 %v4730_v21, %v3241_v61  ;;  %v3594_v21 = vrot.slane %v3578_v17, %v4970_v11 }
 0xff5   :  { %v3385_v33 = vadd.f32 %v3384_v40, %v3343_v20  ;;  %v3554_v20 = vld [vmem:[#allocation2 + $0x4] sm:$0x1] }
 0xff7   :  { %4731 = vtanh.f32 %v3385_v33  ;;  %v3579_v33 = vcombine.low %v3554_v20, %v3555_v19  ;;  %v3745_v19 = vld [vmem:[#allocation6 + $0xc] sm:$0x3] }
0x1001   :  { %v4732_v23 = vpop.eup %4731 }
0x1002   :  { %v3388_v37 = vmul.f32 %v4732_v23, %v3387_v22 }
0x1004   :  { %v3390_v24 = vadd.f32 %v3389_v6, %v3388_v37 }
0x1006   :  { %v3392_v25 = vsub.f32 %v3390_v24, %v3241_v61  ;;  %v3601_v24 = vrot.slane %v3579_v33, %v4970_v11 }
0x1008   :  { %v3393_v27 = vmul.f32 %v3392_v25, %v3391_v26 }
0x100a   :  { %v3394_v28 = vadd.f32 %v3393_v27, %v3241_v61 }
0x100c   :  { %v3395_v38 = vpack.c.bf16 %v3394_v28, %v3394_v28 }
0x100e   :  { %3396 = vst.msk [vmem:[#allocation2 + $0x6] sm:$0x1] %vm741_vm11, %v3395_v38  ;;  %4514 = vmatmul.mubr.msk.bf16.vlgmr.msra.gmra.mrb[100].mxu1 %vm215_vm1, %v3395_v38  ;;  %4522 = vmatmul.mubr.msk.bf16.vlgmr.msra.gmra.mrb[104].mxu0 %vm215_vm1, %v3395_v38 }
0x100f   :  { %4526 = vmatpush3.bf16.msra.mxu1 %v4756_v29  ;;  %4529 = vmatprep.mubr.msk.bf16.mxu1 %vm4860_vm0, %v4859_v0 }
0x1010   :  { %4527 = vmatprep.subr.bf16.mxu1 %v4859_v0  ;;  %4537 = vmatprep.mubr.msk.bf16.mxu0 %vm4860_vm0, %v4859_v0 }
0x1011   :  { %4534 = vmatpush3.bf16.msra.mxu0 %v4581_v31 }
0x1012   :  { %4535 = vmatprep.subr.bf16.mxu0 %v4859_v0 }
0x1013   :  { %4528 = vmatpush3.bf16.msra.mxu1 %v4757_v30  ;;  %v3929_v30 = vld [vmem:[%s5589_s7] ss:$0 sm:$0xff]  ;;  %s4864_s7 = smov [#allocation13]  }
0x1015   :  { %4536 = vmatpush3.bf16.msra.mxu0 %v4582_v32  ;;  %v3556_v22 = vld [vmem:[#allocation2 + $0x6] sm:$0x1] }
0x1016   :  { %4530 = vmatmul.mubr.msk.bf16.vlgmr.msra.gmra.mrb[104].mxu1 %vm215_vm1, %v3395_v38 }
0x10e1   :  { %v3434_v34 = vpop.f32.mrb[100].mxu1  ;;  %v3474_v36 = vpop.f32.mrb[104].mxu0 }
0x10e2   :  { %v3481_v42 = vadd.f32 %v3480_v35, %v3434_v34  ;;  %v4515_v43 = vpop.f32.mrb[101].mxu1  ;;  %v4523_v44 = vpop.f32.mrb[105].mxu0  ;;  %v3489_v4 = vadd.f32 %v3488_v48, %v3474_v36 }
0x10e3   :  { %v3437_v45 = vpop.f32.mrb[102].mxu1  ;;  %v3477_v46 = vpop.f32.mrb[106].mxu0 }
0x10e4   :  { %v3926_v47 = vmul.f32 -1.442695, %v3481_v42  ;;  %v4516_v50 = vpop.f32.mrb[103].mxu1  ;;  %v4524_v51 = vpop.f32.mrb[107].mxu0  ;;  %v3927_v58 = vmul.f32 -1.442695, %v3489_v4 }
0x10e5   :  { %v3935_v50 = vld [vmem:[%s5590_s8] ss:$0 sm:$0xff]  ;;  %s3790_s8 = sshll.u32 %s4864_s7, 4  ;;  %s3791_s8 = int_to_ptr.vmem [resolvable:$true] %s3790_s8 }
0x10e6   :  { %4733 = vpow2.f32 %v3926_v47  ;;  %s4824_s0 = scalar_lea.vmem %s3791_s8, 256  ;;  %p4829_p11 = scmp.lt.s32.totalorder %s3791_s8, %s3791_s8 }
0x10e7   :  { %4735 = vpow2.f32 %v3927_v58  ;;  %p4825_p10 = scmp.ne.s32.totalorder %s3791_s8, %s4824_s0  ;;  %p4830_p12 = scmp.lt.s32.totalorder %s4824_s0, %s4824_s0 }
0x10e9   :  { %v3531_v59 = vpop.f32.mrb[104].mxu1  ;;  %p4831_p13 = por %p4830_p12, %p4829_p11 }
0x10ea   :  { %v4531_v60 = vpop.f32.mrb[105].mxu1  ;;  %v3532_v63 = vadd.f32 %v5386_v12, %v3531_v59  ;;  %v3551_v12 = vld [vmem:[#allocation2 + $0x1] sm:$0x1] }
0x10eb   :  { %v3534_v61 = vpop.f32.mrb[106].mxu1  ;;  %v3577_v40 = vcombine.low %v3550_v18, %v3551_v12  ;;  %v3744_v18 = vld [vmem:[#allocation6 + $0xa] sm:$0x3]  ;;  %p4832_p0 = pnand %p4831_p13, %p4825_p10 }
0x10ec   :  { %v4532_v0 = vpop.f32.mrb[107].mxu1 }
0x10ed   :  { %v3587_v37 = vrot.slane %v3577_v40, %v4970_v11 }
0x10ef   :  { %v3609_v26 = vcombine.low %v3587_v37, %v3594_v21 }
0x10f0   :  { %v4734_v62 = vpop.eup %4733 }
0x10f1   :  { %v3485_v49 = vadd.f32 1.0, %v4734_v62  ;;  %v4736_v54 = vpop.eup %4735  ;;  %v3739_v62 = vld [vmem:[#allocation6] sm:$0x3] }
0x10f2   :  { %v3493_v57 = vadd.f32 1.0, %v4736_v54 }
0x10f3   :  { %4737 = vrcp.f32 %v3485_v49 }
0x10f4   :  { %4739 = vrcp.f32 %v3493_v57 }
0x10fd   :  { %v4738_v52 = vpop.eup %4737 }
0x10fe   :  { %v3537_v1 = vmul.f32 %v4738_v52, %v3532_v63  ;;  %v4740_v2 = vpop.eup %4739 }
0x10ff   :  { %v3540_v3 = vsub.f32 1.0, %v4740_v2  ;;  %v3542_v5 = vmul.f32 %v4740_v2, %v3394_v28 }
0x1100   :  { %v3538_v41 = vadd.f32 %v3537_v1, %v3496_v39  ;;  %v3740_v1 = vld [vmem:[#allocation6 + $0x2] sm:$0x3]  ;;  %v3741_v39 = vld [vmem:[#allocation6 + $0x4] sm:$0x3] }
0x1102   :  { %4741 = vtanh.f32 %v3538_v41 }
0x110c   :  { %v4742_v53 = vpop.eup %4741 }
0x110d   :  { %v3541_v7 = vmul.f32 %v4742_v53, %v3540_v3 }
0x110f   :  { %v3543_v8 = vadd.f32 %v3542_v5, %v3541_v7 }
0x1111   :  { %v3545_v9 = vsub.f32 %v3543_v8, %v3394_v28 }
0x1113   :  { %v3546_v55 = vmul.f32 %v3545_v9, %v3544_v10  ;;  %v3743_v9 = vld [vmem:[#allocation6 + $0x8] sm:$0x3]  ;;  %v3742_v10 = vld [vmem:[#allocation6 + $0x6] sm:$0x3] }
0x1115   :  { %v3547_v13 = vadd.f32 %v3546_v55, %v3394_v28  ;;  %v3617_v28 = vrot.slane %v3609_v26, %v4970_v11 }
0x1117   :  { %v3548_v14 = vpack.c.bf16 %v3547_v13, %v3547_v13 }
0x1119   :  { %3549 = vst.msk [vmem:[#allocation2 + $0x7] sm:$0x1] %vm741_vm11, %v3548_v14 }
0x1120   :  { %v3557_v23 = vld [vmem:[#allocation2 + $0x7] sm:$0x1] }
0x1121   :  { %v3580_v6 = vcombine.low %v3556_v22, %v3557_v23  ;;  %v3746_v22 = vld [vmem:[#allocation6 + $0xe] sm:$0x3] }
0x1123   :  { %v3608_v25 = vrot.slane %v3580_v6, %v4970_v11 }
0x1125   :  { %v3610_v27 = vcombine.low %v3601_v24, %v3608_v25 }
0x1127   :  { %v3624_v38 = vrot.slane %v3610_v27, %v4970_v11 }
0x1129   :  { %v3625_v29 = vcombine.low %v3617_v28, %v3624_v38 }
0x112b   :  { %4538 = vmatmul.mubr.msk.bf16.vlgmr.msra.gmra.mrb[108].mxu0 %vm215_vm1, %v3625_v29 }
0x11fe   :  { %v3675_v31 = vpop.f32.mrb[108].mxu0 }
0x11ff   :  { %v3676_v32 = vadd.f32 %v3929_v30, %v3675_v31  ;;  %v4539_v34 = vpop.f32.mrb[109].mxu0 }
0x1200   :  { %v3678_v35 = vpop.f32.mrb[110].mxu0 }
0x1201   :  { %v3933_v36 = vmul.f32 -1.442695, %v3676_v32  ;;  %v3679_v42 = vadd.f32 %v3929_v30, %v3678_v35  ;;  %v4540_v43 = vpop.f32.mrb[111].mxu0 }
0x1203   :  { %4743 = vpow2.f32 %v3933_v36  ;;  %v3934_v44 = vmul.f32 -1.442695, %v3679_v42 }
0x1205   :  { %4745 = vpow2.f32 %v3934_v44 }
0x120d   :  { %v4744_v45 = vpop.eup %4743 }
0x120e   :  { %v3688_v46 = vadd.f32 1.0, %v4744_v45 }
0x120f   :  { %v4746_v11 = vpop.eup %4745 }
0x1210   :  { %4747 = vrcp.f32 %v3688_v46  ;;  %v3689_v47 = vadd.f32 1.0, %v4746_v11 }
0x1212   :  { %4749 = vrcp.f32 %v3689_v47 }
0x121a   :  { %v4748_v48 = vpop.eup %4747 }
0x121b   :  { %v3696_v51 = vcombine.high %v4748_v48, %v4748_v48  ;;  %v3703_v4 = vrot.slane %v4748_v48, %v5059_v56 }
0x121c   :  { %v4750_v58 = vpop.eup %4749 }
0x121d   :  { %v3710_v59 = vrot.slane %v3696_v51, %v5059_v56  ;;  %v3711_v60 = vcombine.high %v3703_v4, %v3703_v4  ;;  %v3753_v61 = vsub.f32 %v3703_v4, %v3935_v50  ;;  %v3713_v0 = vcombine.high %v4750_v58, %v4750_v58 }
0x121e   :  { %v3720_v49 = vrot.slane %v4750_v58, %v5059_v56 }
0x121f   :  { %v3712_v54 = vcombine.high %v3710_v59, %v3710_v59  ;;  %v3754_v57 = vsub.f32 %v3711_v60, %v3935_v50  ;;  %v3755_v63 = vsub.f32 %v3710_v59, %v3935_v50  ;;  %v3761_v52 = vmul.f32 %v3753_v61, %v3739_v62 }
0x1220   :  { %v3727_v41 = vrot.slane %v3713_v0, %v5059_v56  ;;  %v3728_v2 = vcombine.high %v3720_v49, %v3720_v49  ;;  %v3757_v3 = vsub.f32 %v3720_v49, %v3935_v50 }
0x1221   :  { %v3756_v53 = vsub.f32 %v3712_v54, %v3935_v50  ;;  %v3762_v5 = vmul.f32 %v3754_v57, %v3740_v1  ;;  %v3763_v7 = vmul.f32 %v3755_v63, %v3741_v39  ;;  %v3769_v8 = vadd.f32 %v3935_v50, %v3761_v52 }
0x1222   :  { %v3729_v55 = vcombine.high %v3727_v41, %v3727_v41  ;;  %v3758_v13 = vsub.f32 %v3728_v2, %v3935_v50  ;;  %v3759_v14 = vsub.f32 %v3727_v41, %v3935_v50  ;;  %v3765_v15 = vmul.f32 %v3757_v3, %v3743_v9 }
0x1223   :  { %v3764_v12 = vmul.f32 %v3756_v53, %v3742_v10  ;;  %v3770_v16 = vadd.f32 %v3935_v50, %v3762_v5  ;;  %v3771_v17 = vadd.f32 %v3935_v50, %v3763_v7  ;;  %3777 = vst.msk [vmem:[#allocation13] sm:$0x3] %vm103_vm2, %v3769_v8 }
0x1224   :  { %v3760_v56 = vsub.f32 %v3729_v55, %v3935_v50  ;;  %v3766_v40 = vmul.f32 %v3758_v13, %v3744_v18  ;;  %v3767_v20 = vmul.f32 %v3759_v14, %v3745_v19  ;;  %v3773_v33 = vadd.f32 %v3935_v50, %v3765_v15 }
0x1225   :  { %v3772_v21 = vadd.f32 %v3935_v50, %v3764_v12  ;;  %3778 = vst.msk [vmem:[#allocation13 + $0x2] sm:$0x3] %vm103_vm2, %v3770_v16  ;;  %3779 = vst.msk [vmem:[#allocation13 + $0x4] sm:$0x3] %vm103_vm2, %v3771_v17 }
0x1226   :  { %v3768_v23 = vmul.f32 %v3760_v56, %v3746_v22  ;;  %v3774_v6 = vadd.f32 %v3935_v50, %v3766_v40  ;;  %v3775_v37 = vadd.f32 %v3935_v50, %v3767_v20  ;;  %3781 = vst.msk [vmem:[#allocation13 + $0x8] sm:$0x3] %vm103_vm2, %v3773_v33 }
0x1227   :  { %3780 = vst.msk [vmem:[#allocation13 + $0x6] sm:$0x3] %vm103_vm2, %v3772_v21 }
0x1228   :  { %v3776_v24 = vadd.f32 %v3935_v50, %v3768_v23  ;;  %3782 = vst.msk [vmem:[#allocation13 + $0xa] sm:$0x3] %vm103_vm2, %v3774_v6  ;;  %3783 = vst.msk [vmem:[#allocation13 + $0xc] sm:$0x3] %vm103_vm2, %v3775_v37 }
0x122a   :  { %3784 = vst.msk [vmem:[#allocation13 + $0xe] sm:$0x3] %vm103_vm2, %v3776_v24 }
0x122b   :  { %4835 = shalt.err (!%p4832_p0)
}
0x122c   :  { %s4836_s19 = scalar_lea.hbm %s5591_s9, 256 }
0x122d   :  { %p4837_p1 = scmp.ne.s32.totalorder %s5591_s9, %s4836_s19  ;;  %p4840_p2 = scmp.lt.u32.totalorder %s4836_s19, %s5591_s9 }
0x122f   :  { %p4842_p3 = pnand %p4840_p2, %p4837_p1 }
0x1231   :  { %4845 = shalt.err (!%p4842_p3)
}
0x1232   :  { %s4865_s30 = smov 32   ;;  %s4866_s11 = smov 2  }
0x1233   :  { %3796 = dma.vmem_to_hbm [thread:$0]  %s3791_s8, 256, %s5591_s9, [#allocation9], %s4865_s30, %s4865_s30, %s4866_s11  }
0x1234   :  { %4850 = dma.done.wait [#allocation9], 256  }
0x1235   :  { %4851 = vsyncadd [#allocation9], 4294967040 }
0x1236   :  { %3800 = vsyncpa [#allocation8], 1 }
0x1237   :  { %3801 = vsyncpa [#allocation11], 1 }
0x1238   :  { %3802 = vsyncpa [#allocation9], 1 }

</bundles_post_ra>
